<compile_context>
chip_gen: v6e
topology: v6e:2x2x1
jax: 0.10.0
libtpu: 0.0.40
codegen_flags: <defaults>
</compile_context>

<pallas_src>
import jax
import jax.numpy as jnp
from jax.experimental import pallas as pl
from jax.experimental.pallas import tpu as pltpu


def _disc_kernel(x_ref,
                 w1_ref, b1_ref,
                 w2_ref, b2_ref,
                 w3_ref, b3_ref,
                 w4_ref, b4_ref,
                 o_ref):
    cdt = w1_ref.dtype  # compute dtype of the MXU operands (bf16 by default)

    # Layer 1: (tm, 784) x-tile, cast f32->bf16 in-kernel, f32 accumulation.
    h = jnp.dot(x_ref[...].astype(cdt), w1_ref[...],
                preferred_element_type=jnp.float32)
    h = jnp.maximum(h + b1_ref[...], 0.0)

    # Layer 2: (tm, 512) @ (512, 256).
    h = jnp.dot(h.astype(cdt), w2_ref[...],
                preferred_element_type=jnp.float32)
    h = jnp.maximum(h + b2_ref[...], 0.0)

    # Layer 3: (tm, 256) @ (256, 128).
    h = jnp.dot(h.astype(cdt), w3_ref[...],
                preferred_element_type=jnp.float32)
    h = jnp.maximum(h + b3_ref[...], 0.0)

    # Layer 4 (output width 1): contract the (1,128) weight row against h's
    # feature axis, producing a lane-major (1, tm) logit row directly.  This
    # keeps the output store lane-dense (no masked vst.msk, no sublane->lane
    # transpose of the result).
    logit = jax.lax.dot_general(
        w4_ref[...], h.astype(cdt),
        dimension_numbers=(((1,), (1,)), ((), ())),
        preferred_element_type=jnp.float32) + b4_ref[...]          # (1, tm)

    o_ref[...] = jax.nn.sigmoid(logit).reshape(o_ref.shape).astype(o_ref.dtype)


def _num_tensorcores():
    """Best-effort TensorCore count per device (v7x / v4-megacore have 2)."""
    try:
        kind = jax.devices()[0].device_kind.lower()
        if "v7" in kind or "v4" in kind:
            return 2
    except Exception:  # pragma: no cover - defensive
        pass
    return 1


def prepare_params(params, compute_dtype=jnp.bfloat16):
    """One-time weight prep: (out,in) -> (in,out), cast to compute dtype.

    Call once and reuse across forward calls / training steps so the fused
    Pallas kernel is the only per-step HBM consumer.
    """
    return {
        "w1": jnp.asarray(params["w1"]).T.astype(compute_dtype),      # (784, 512)
        "b1": jnp.asarray(params["b1"]).reshape(1, -1).astype(jnp.float32),
        "w2": jnp.asarray(params["w2"]).T.astype(compute_dtype),      # (512, 256)
        "b2": jnp.asarray(params["b2"]).reshape(1, -1).astype(jnp.float32),
        "w3": jnp.asarray(params["w3"]).T.astype(compute_dtype),      # (256, 128)
        "b3": jnp.asarray(params["b3"]).reshape(1, -1).astype(jnp.float32),
        "w4": jnp.asarray(params["w4"]).reshape(1, -1).astype(compute_dtype),  # (1, 128)
        "b4": jnp.asarray(params["b4"]).reshape(1, 1).astype(jnp.float32),
    }


def discriminator_forward(x, prep, *, tm=None):
    """x: (B, 784) float32.  prep: output of prepare_params()."""
    B, D_in = x.shape
    assert D_in == 784

    n_cores = _num_tensorcores()
    if tm is None:
        tm = 512
    # Keep >=2 grid steps per TensorCore (so BlockSpec double-buffering can
    # hide the x DMA on 2-TC chips), but never shrink below 256 rows: on
    # single-TC v5e/v6e a smaller tile only underfills the MXU M dim and adds
    # per-step overhead.
    while tm > 256 and pl.cdiv(B, tm) < 2 * n_cores:
        tm //= 2
    # Don't let the tile dwarf a tiny batch (demo sizes); keep sublane multiple.
    while tm > 8 and tm >= 2 * B:
        tm //= 2
    tm = max(8, tm)

    num_tiles = pl.cdiv(B, tm)
    B_pad = num_tiles * tm
    x_in = x if B_pad == B else jnp.pad(x, ((0, B_pad - B), (0, 0)))

    def resident(arr):
        # Whole-array block, VMEM-resident across the batch grid.
        nd = arr.ndim
        return pl.BlockSpec(arr.shape, lambda i, _nd=nd: (0,) * _nd)
        # TODO(synk): pipeline_mode=pl.Buffered(1) would drop the useless
        # second buffer for these constant-index inputs (~1.2 MB VMEM).

    flops = 2 * B_pad * (784 * 512 + 512 * 256 + 256 * 128 + 128)
    bytes_accessed = (
        x_in.size * x_in.dtype.itemsize
        + sum(a.size * a.dtype.itemsize for a in prep.values())
        + B_pad * 4)

    out = pl.pallas_call(
        _disc_kernel,
        out_shape=jax.ShapeDtypeStruct((num_tiles, 1, tm), jnp.float32),
        grid_spec=pltpu.PrefetchScalarGridSpec(
            num_scalar_prefetch=0,
            grid=(num_tiles,),
            in_specs=[
                pl.BlockSpec((tm, D_in), lambda i: (i, 0)),   # x tile (f32)
                resident(prep["w1"]), resident(prep["b1"]),
                resident(prep["w2"]), resident(prep["b2"]),
                resident(prep["w3"]), resident(prep["b3"]),
                resident(prep["w4"]), resident(prep["b4"]),
            ],
            out_specs=pl.BlockSpec((1, 1, tm), lambda i: (i, 0, 0)),
        ),
        compiler_params=pltpu.CompilerParams(
            dimension_semantics=("parallel",),
            vmem_limit_bytes=32 * 1024 * 1024,
        ),
        cost_estimate=pl.CostEstimate(
            flops=flops, transcendentals=B_pad, bytes_accessed=bytes_accessed),
    )(x_in,
      prep["w1"], prep["b1"], prep["w2"], prep["b2"],
      prep["w3"], prep["b3"], prep["w4"], prep["b4"])

    # (num_tiles, 1, tm) lane-major logits back to (B, 1); bytes are trivial.
    return out.reshape(B_pad, 1)[:B]


def init_params(key):
    """Deterministic synthetic init matching nn.Linear shapes (out, in)."""
    sizes = [(512, 784), (256, 512), (128, 256), (1, 128)]
    params = {}
    keys = jax.random.split(key, 2 * len(sizes))
    for idx, (out_f, in_f) in enumerate(sizes):
        bound = 1.0 / jnp.sqrt(in_f)
        params[f"w{idx + 1}"] = jax.random.uniform(
            keys[2 * idx], (out_f, in_f), jnp.float32, -bound, bound)
        params[f"b{idx + 1}"] = jax.random.uniform(
            keys[2 * idx + 1], (out_f,), jnp.float32, -bound, bound)
    return params


def reference_forward(x, params):
    h = x
    for i in range(1, 4):
        h = jnp.maximum(h @ params[f"w{i}"].T + params[f"b{i}"], 0.0)
    logit = h @ params["w4"].T + params["b4"]
    return jax.nn.sigmoid(logit)


if __name__ == "__main__":
    key = jax.random.PRNGKey(0)
    pkey, xkey = jax.random.split(key)
    params = init_params(pkey)

    # One-time weight prep (hoisted out of the per-call forward).
    prep = prepare_params(params)

    # B not a multiple of the tile: exercises the pad + lane-dense-output
    # reshape path as well as a multi-step grid.
    B = 500
    x = jax.random.normal(xkey, (B, 1 * 28 * 28), dtype=jnp.float32)

    out = jax.block_until_ready(discriminator_forward(x, prep))
    ref = reference_forward(x, params)

    assert out.shape == (B, 1)
    # bf16 weights / in-kernel bf16 x cast with f32 accumulation -> loose tol.
    assert jnp.allclose(out, ref, atol=2e-2, rtol=2e-2), "mismatch vs reference"

    print("KERNEL_OK")
</pallas_src>

<mosaic_0001>
module attributes {stable_mosaic.version = 11 : i64} {
  func.func @_disc_kernel(%arg0: i32, %arg1: memref<256x784xf32, #tpu.memory_space<vmem>>, %arg2: memref<784x512xbf16, #tpu.memory_space<vmem>>, %arg3: memref<1x512xf32, #tpu.memory_space<vmem>>, %arg4: memref<512x256xbf16, #tpu.memory_space<vmem>>, %arg5: memref<1x256xf32, #tpu.memory_space<vmem>>, %arg6: memref<256x128xbf16, #tpu.memory_space<vmem>>, %arg7: memref<1x128xf32, #tpu.memory_space<vmem>>, %arg8: memref<1x128xbf16, #tpu.memory_space<vmem>>, %arg9: memref<1x1xf32, #tpu.memory_space<vmem>>, %arg10: memref<1x1x256xf32, #tpu.memory_space<vmem>>) attributes {dimension_semantics = [#tpu.dimension_semantics<parallel>], iteration_bounds = array<i64: 2>, scalar_prefetch = 0 : i64, scratch_operands = 0 : i64, tpu.core_type = #tpu.core_type<tc>, window_params = [{transform_indices = @transform_0, window_bounds = array<i64: 256, 784>}, {pipeline_mode = #tpu.pipeline_mode<synchronous>, transform_indices = @transform_1, window_bounds = array<i64: 784, 512>}, {pipeline_mode = #tpu.pipeline_mode<synchronous>, transform_indices = @transform_2, window_bounds = array<i64: 1, 512>}, {pipeline_mode = #tpu.pipeline_mode<synchronous>, transform_indices = @transform_3, window_bounds = array<i64: 512, 256>}, {pipeline_mode = #tpu.pipeline_mode<synchronous>, transform_indices = @transform_4, window_bounds = array<i64: 1, 256>}, {pipeline_mode = #tpu.pipeline_mode<synchronous>, transform_indices = @transform_5, window_bounds = array<i64: 256, 128>}, {pipeline_mode = #tpu.pipeline_mode<synchronous>, transform_indices = @transform_6, window_bounds = array<i64: 1, 128>}, {pipeline_mode = #tpu.pipeline_mode<synchronous>, transform_indices = @transform_7, window_bounds = array<i64: 1, 128>}, {pipeline_mode = #tpu.pipeline_mode<synchronous>, transform_indices = @transform_8, window_bounds = array<i64: 1, 1>}, {transform_indices = @transform_9, window_bounds = array<i64: 1, 1, 256>}]} {
    %c0 = arith.constant 0 : index
    %c0_0 = arith.constant 0 : index
    %0 = vector.load %arg1[%c0, %c0_0] : memref<256x784xf32, #tpu.memory_space<vmem>>, vector<256x784xf32>
    %1 = arith.truncf %0 : vector<256x784xf32> to vector<256x784xbf16>
    %c0_1 = arith.constant 0 : index
    %c0_2 = arith.constant 0 : index
    %2 = vector.load %arg2[%c0_1, %c0_2] : memref<784x512xbf16, #tpu.memory_space<vmem>>, vector<784x512xbf16>
    %cst = arith.constant dense<0.000000e+00> : vector<256x512xf32>
    %3 = tpu.matmul %1, %2, %cst {dimension_numbers = #tpu.dot_dimension_numbers<[1], [0], [0], [1], [0, 0, 1, 1], [], []>} : vector<256x784xbf16>, vector<784x512xbf16>, vector<256x512xf32> -> vector<256x512xf32>
    %c0_3 = arith.constant 0 : index
    %c0_4 = arith.constant 0 : index
    %4 = vector.load %arg3[%c0_3, %c0_4] : memref<1x512xf32, #tpu.memory_space<vmem>>, vector<1x512xf32>
    %5 = vector.broadcast %4 : vector<1x512xf32> to vector<256x512xf32>
    %6 = arith.addf %3, %5 : vector<256x512xf32>
    %cst_5 = arith.constant 0.000000e+00 : f32
    %7 = vector.broadcast %cst_5 : f32 to vector<256x512xf32>
    %8 = arith.maximumf %6, %7 : vector<256x512xf32>
    %9 = arith.truncf %8 : vector<256x512xf32> to vector<256x512xbf16>
    %c0_6 = arith.constant 0 : index
    %c0_7 = arith.constant 0 : index
    %10 = vector.load %arg4[%c0_6, %c0_7] : memref<512x256xbf16, #tpu.memory_space<vmem>>, vector<512x256xbf16>
    %cst_8 = arith.constant dense<0.000000e+00> : vector<256x256xf32>
    %11 = tpu.matmul %9, %10, %cst_8 {dimension_numbers = #tpu.dot_dimension_numbers<[1], [0], [0], [1], [0, 0, 1, 1], [], []>} : vector<256x512xbf16>, vector<512x256xbf16>, vector<256x256xf32> -> vector<256x256xf32>
    %c0_9 = arith.constant 0 : index
    %c0_10 = arith.constant 0 : index
    %12 = vector.load %arg5[%c0_9, %c0_10] : memref<1x256xf32, #tpu.memory_space<vmem>>, vector<1x256xf32>
    %13 = vector.broadcast %12 : vector<1x256xf32> to vector<256x256xf32>
    %14 = arith.addf %11, %13 : vector<256x256xf32>
    %cst_11 = arith.constant 0.000000e+00 : f32
    %15 = vector.broadcast %cst_11 : f32 to vector<256x256xf32>
    %16 = arith.maximumf %14, %15 : vector<256x256xf32>
    %17 = arith.truncf %16 : vector<256x256xf32> to vector<256x256xbf16>
    %c0_12 = arith.constant 0 : index
    %c0_13 = arith.constant 0 : index
    %18 = vector.load %arg6[%c0_12, %c0_13] : memref<256x128xbf16, #tpu.memory_space<vmem>>, vector<256x128xbf16>
    %cst_14 = arith.constant dense<0.000000e+00> : vector<256x128xf32>
    %19 = tpu.matmul %17, %18, %cst_14 {dimension_numbers = #tpu.dot_dimension_numbers<[1], [0], [0], [1], [0, 0, 1, 1], [], []>} : vector<256x256xbf16>, vector<256x128xbf16>, vector<256x128xf32> -> vector<256x128xf32>
    %c0_15 = arith.constant 0 : index
    %c0_16 = arith.constant 0 : index
    %20 = vector.load %arg7[%c0_15, %c0_16] : memref<1x128xf32, #tpu.memory_space<vmem>>, vector<1x128xf32>
    %21 = vector.broadcast %20 : vector<1x128xf32> to vector<256x128xf32>
    %22 = arith.addf %19, %21 : vector<256x128xf32>
    %cst_17 = arith.constant 0.000000e+00 : f32
    %23 = vector.broadcast %cst_17 : f32 to vector<256x128xf32>
    %24 = arith.maximumf %22, %23 : vector<256x128xf32>
    %c0_18 = arith.constant 0 : index
    %c0_19 = arith.constant 0 : index
    %25 = vector.load %arg8[%c0_18, %c0_19] : memref<1x128xbf16, #tpu.memory_space<vmem>>, vector<1x128xbf16>
    %26 = arith.truncf %24 : vector<256x128xf32> to vector<256x128xbf16>
    %cst_20 = arith.constant dense<0.000000e+00> : vector<1x256xf32>
    %27 = tpu.matmul %25, %26, %cst_20 {dimension_numbers = #tpu.dot_dimension_numbers<[1], [1], [0], [0], [0, 0, 1, 0], [], []>} : vector<1x128xbf16>, vector<256x128xbf16>, vector<1x256xf32> -> vector<1x256xf32>
    %c0_21 = arith.constant 0 : index
    %c0_22 = arith.constant 0 : index
    %28 = vector.load %arg9[%c0_21, %c0_22] : memref<1x1xf32, #tpu.memory_space<vmem>>, vector<1x1xf32>
    %29 = vector.broadcast %28 : vector<1x1xf32> to vector<1x256xf32>
    %30 = arith.addf %27, %29 : vector<1x256xf32>
    %31 = arith.negf %30 : vector<1x256xf32>
    %32 = math.exp %31 : vector<1x256xf32>
    %cst_23 = arith.constant 1.000000e+00 : f32
    %33 = vector.broadcast %cst_23 : f32 to vector<1x256xf32>
    %34 = arith.addf %33, %32 : vector<1x256xf32>
    %35 = arith.divf %33, %34 : vector<1x256xf32>
    %36 = vector.shape_cast %35 : vector<1x256xf32> to vector<1x1x256xf32>
    %c0_24 = arith.constant 0 : index
    %c0_25 = arith.constant 0 : index
    %c0_26 = arith.constant 0 : index
    %37 = vector.load %arg10[%c0_24, %c0_25, %c0_26] : memref<1x1x256xf32, #tpu.memory_space<vmem>>, vector<1x1x256xf32>
    tpu.vector_store %arg10[%c0_24, %c0_25, %c0_26], %36 {strides = array<i32>} : memref<1x1x256xf32, #tpu.memory_space<vmem>>, vector<1x1x256xf32>,
    return
  }
  func.func @transform_0(%arg0: i32) -> (i32, i32) {
    %c0_i32 = arith.constant 0 : i32
    %c0_i32_0 = arith.constant 0 : i32
    return %arg0, %c0_i32 : i32, i32
  }
  func.func @transform_1(%arg0: i32) -> (i32, i32) {
    %c0_i32 = arith.constant 0 : i32
    %c0_i32_0 = arith.constant 0 : i32
    %c0_i32_1 = arith.constant 0 : i32
    return %c0_i32, %c0_i32_0 : i32, i32
  }
  func.func @transform_2(%arg0: i32) -> (i32, i32) {
    %c0_i32 = arith.constant 0 : i32
    %c0_i32_0 = arith.constant 0 : i32
    %c0_i32_1 = arith.constant 0 : i32
    return %c0_i32, %c0_i32_0 : i32, i32
  }
  func.func @transform_3(%arg0: i32) -> (i32, i32) {
    %c0_i32 = arith.constant 0 : i32
    %c0_i32_0 = arith.constant 0 : i32
    %c0_i32_1 = arith.constant 0 : i32
    return %c0_i32, %c0_i32_0 : i32, i32
  }
  func.func @transform_4(%arg0: i32) -> (i32, i32) {
    %c0_i32 = arith.constant 0 : i32
    %c0_i32_0 = arith.constant 0 : i32
    %c0_i32_1 = arith.constant 0 : i32
    return %c0_i32, %c0_i32_0 : i32, i32
  }
  func.func @transform_5(%arg0: i32) -> (i32, i32) {
    %c0_i32 = arith.constant 0 : i32
    %c0_i32_0 = arith.constant 0 : i32
    %c0_i32_1 = arith.constant 0 : i32
    return %c0_i32, %c0_i32_0 : i32, i32
  }
  func.func @transform_6(%arg0: i32) -> (i32, i32) {
    %c0_i32 = arith.constant 0 : i32
    %c0_i32_0 = arith.constant 0 : i32
    %c0_i32_1 = arith.constant 0 : i32
    return %c0_i32, %c0_i32_0 : i32, i32
  }
  func.func @transform_7(%arg0: i32) -> (i32, i32) {
    %c0_i32 = arith.constant 0 : i32
    %c0_i32_0 = arith.constant 0 : i32
    %c0_i32_1 = arith.constant 0 : i32
    return %c0_i32, %c0_i32_0 : i32, i32
  }
  func.func @transform_8(%arg0: i32) -> (i32, i32) {
    %c0_i32 = arith.constant 0 : i32
    %c0_i32_0 = arith.constant 0 : i32
    %c0_i32_1 = arith.constant 0 : i32
    return %c0_i32, %c0_i32_0 : i32, i32
  }
  func.func @transform_9(%arg0: i32) -> (i32, i32, i32) {
    %c0_i32 = arith.constant 0 : i32
    %c0_i32_0 = arith.constant 0 : i32
    %c0_i32_1 = arith.constant 0 : i32
    return %arg0, %c0_i32, %c0_i32_0 : i32, i32, i32
  }
}

</mosaic_0001>

<bundles_post_ra>
// kernel: tpu_custom_call.1
= control target key start
LH: loop header
LB: loop body
LE: loop exit
PB: predicated region body
PF: predicated region fallthrough
CT: control target
= control target key end

     0   :  { %s9231_s0 = inlined_call_operand.vmem [shape: f32[512,784], index: 0, kind: input, shape index: {}]   ;;  %s9232_s1 = inlined_call_operand.vmem [shape: bf16[784,512], index: 1, kind: input, shape index: {}]   ;;  %s9233_s2 = inlined_call_operand.vmem [shape: f32[1,512], index: 2, kind: input, shape index: {}]   ;;  %s9234_s3 = inlined_call_operand.vmem [shape: bf16[512,256], index: 3, kind: input, shape index: {}]   ;;  %s9235_s4 = inlined_call_operand.vmem [shape: f32[1,256], index: 4, kind: input, shape index: {}]   ;;  %s9236_s5 = inlined_call_operand.vmem [shape: bf16[256,128], index: 5, kind: input, shape index: {}]   ;;  %s9237_s6 = inlined_call_operand.vmem [shape: f32[1,128], index: 6, kind: input, shape index: {}]   ;;  %s9238_s7 = inlined_call_operand.vmem [shape: bf16[1,128], index: 7, kind: input, shape index: {}]   ;;  %s9239_s8 = inlined_call_operand.<no memory space> [shape: f32[1,1], index: 8, kind: input, shape index: {}]   ;;  %s9240_s9 = inlined_call_operand.hbm [shape: f32[2,1,256], index: 9, kind: output, shape index: {}]  }
   0x1   :  { %v14_v0 = vstv %s9239_s8 }
   0x2   :  { %15 = vst [vmem:[#allocation2] sm:$0x1] %v14_v0 }
   0x3   :  { %16 = vsyncpa [#allocation4], 0 }
   0x4   :  { %18 = vsyncpa [#allocation4 + $0x1], 0  ;;  %s6103_s11 = smov 0   ;;  %s6105_s12 = smov 0  }
   0x5   :  { %s6107_s13 = smov 0   ;;  %s6109_s14 = smov 0  }
   0x6 LB: > { %s5040_s8 = sadd.s32 4294967295, %s6045_s14   ;;  %s5041_s15 = sadd.s32 4294967294, %s6045_s14   ;;  %s6045_s14 = sphi %s6109_s14, %s9762_s14   ;;  %s6041_s13 = sphi %s6107_s13, %s9761_s13   ;;  %s6037_s12 = sphi %s6105_s12, %s9760_s12   ;;  %s6033_s11 = sphi %s6103_s11, %s9759_s11  }
   0x7   : > { %s6126_s16 = sadd.s32 1, %s6045_s14   ;;  %s225_s17 = sadd.s32 1, %s6041_s13 }
   0x8   : > { %s222_s18 = ssub.s32 %s6045_s14, %s6126_s16  ;;  %p235_p0 = scmp.ne.s32.totalorder %s6041_s13, %s6037_s12 }
   0x9   : > { %p223_p1 = scmp.eq.s32.totalorder %s222_s18, 0  ;;  %p236_p2 = scmp.eq.s32.totalorder %s5040_s8, 1 }
   0xa   : > { %p241_p3 = scmp.ne.s32.totalorder %s6037_s12, %s6033_s11  ;;  %p242_p4 = scmp.eq.s32.totalorder %s5041_s15, 1 }
   0xb   : > { %s6136_s19 = scalar_select %p223_p1, %s6041_s13, %s225_s17  }
   0xc   : > { %p6138_p5 = por %p236_p2, %p235_p0  ;;  %p6142_p6 = por %p242_p4, %p241_p3 }
   0xd   : > { %p5044_p7 = scmp.ge.s32.totalorder %s6045_s14, 1  ;;  %p294_p8 = scmp.lt.s32.totalorder %s6045_s14, 3 }
   0xf   : > { %p295_p9 = pnand %p5044_p7, %p294_p8 }
  0x11   : > { %298 = sbr.rel (%p295_p9) target bundleno = 1586 (0x632), region = 56 }
  0x16   : > { %v5570_v1 = vld [vmem:[%s9232_s1 + $0xe4] ss:$16 sps:$4 sm:$0xff]   ;;  %v5572_v2 = vld [vmem:[%s9232_s1 + $0xe0] ss:$16 sps:$4 sm:$0xff]   ;;  %s6160_s30 = sshll.u32 %s5040_s8, 5  ;;  %vm1873_vm0 = vcmask 130048  }
  0x17   : > { %1922 = vmatprep.subr.bf16.mxu0 %v5570_v1  ;;  %5495 = vmatprep.subr.bf16.mxu1 %v5570_v1  ;;  %v5573_v3 = vld [vmem:[%s9232_s1 + $0xc4] ss:$16 sps:$4 sm:$0xff]   ;;  %v5575_v4 = vld [vmem:[%s9232_s1 + $0xc0] ss:$16 sps:$4 sm:$0xff]   ;;  %p332_p10 = scmp.lt.s32.totalorder %s6160_s30, 63  ;;  %s328_s22 = sand.u32 1, %s6037_s12  }
  0x18   : > { %1923 = vmatpush1.bf16.msra.mxu0 %v5572_v2  ;;  %5511 = vmatpush1.bf16.msra.mxu1 %v5572_v2  ;;  %v5576_v5 = vld [vmem:[%s9232_s1 + $0xa4] ss:$16 sps:$4 sm:$0xff]   ;;  %v5578_v6 = vld [vmem:[%s9232_s1 + $0xa0] ss:$16 sps:$4 sm:$0xff]   ;;  %s4980_s27 = scalar_lea.hbm %s9240_s9, %s6160_s30  ;;  %s6049_s10 = smov [#allocation3]  }
  0x19   : > { %1924 = vmatprep.subr.bf16.mxu0 %v5573_v3  ;;  %5496 = vmatprep.subr.bf16.mxu1 %v5573_v3  ;;  %v5579_v7 = vld [vmem:[%s9232_s1 + $0x84] ss:$16 sps:$4 sm:$0xff]   ;;  %s333_s23 = scalar_select %p332_p10, %s6160_s30, 63  ;;  %v5581_v8 = vld [vmem:[%s9232_s1 + $0x80] ss:$16 sps:$4 sm:$0xff]  }
  0x1a   : > { %v5582_v9 = vld [vmem:[%s9232_s1 + $0x64] ss:$16 sps:$4 sm:$0xff]   ;;  %v5584_v10 = vld [vmem:[%s9232_s1 + $0x60] ss:$16 sps:$4 sm:$0xff]   ;;  %s5989_s15 = sshll.u32 %s6049_s10, 4  ;;  %s5990_s15 = int_to_ptr.vmem [resolvable:$false] %s5989_s15 }
  0x1b   : > { %s5527_s28 = smul.u32 56, %s333_s23  ;;  %v5585_v11 = vld [vmem:[%s9232_s1 + $0x44] ss:$16 sps:$4 sm:$0xff]   ;;  %v5587_v12 = vld [vmem:[%s9232_s1 + $0x40] ss:$16 sps:$4 sm:$0xff]   ;;  %s5991_s17 = scalar_lea.vmem %s5990_s15, 64 }
  0x1c   : > { %1925 = vmatpush1.bf16.msra.mxu0 %v5575_v4  ;;  %5512 = vmatpush1.bf16.msra.mxu1 %v5575_v4  ;;  %v5588_v13 = vld [vmem:[%s9232_s1 + $0x24] ss:$16 sps:$4 sm:$0xff]   ;;  %v5590_v19 = vld [vmem:[%s9232_s1 + $0x20] ss:$16 sps:$4 sm:$0xff]  }
  0x1d   : > { %1926 = vmatprep.subr.bf16.mxu0 %v5576_v5  ;;  %5497 = vmatprep.subr.bf16.mxu1 %v5576_v5  ;;  %s6188_s8 = scalar_lea.vmem %s9231_s0, %s5527_s28  ;;  %v5591_v21 = vld [vmem:[%s9232_s1 + $0x4] ss:$16 sps:$4 sm:$0xff]   ;;  %v5593_v22 = vld [vmem:[%s9232_s1] ss:$16 sps:$4 sm:$0xff]   ;;  %s4968_s28 = scalar_lea.sflag [#allocation4], %s328_s22 }
  0x1e   : > { %v340_v14 = vld [vmem:[%s6188_s8 + $0x8] sm:$0xff]  ;;  %v347_v15 = vld [vmem:[%s6188_s8 + $0x40] sm:$0xff]  ;;  %v346_v40 = vld [vmem:[%s6188_s8 + $0x38] sm:$0xff] }
  0x1f   : > { %v6198_v16 = vpack.c.bf16 %v347_v15, %v340_v14  ;;  %v452_v17 = vld [vmem:[%s6188_s8 + $0x388] sm:$0xff]  ;;  %v459_v18 = vld [vmem:[%s6188_s8 + $0x3c0] sm:$0xff]  ;;  %v458_v42 = vld [vmem:[%s6188_s8 + $0x3b8] sm:$0xff] }
  0x20   : > { %1927 = vmatpush1.bf16.msra.mxu0 %v5578_v6  ;;  %5513 = vmatpush1.bf16.msra.mxu1 %v5578_v6  ;;  %v6205_v20 = vpack.c.bf16 %v459_v18, %v452_v17  ;;  %v5594_v23 = vld [vmem:[%s9232_s1 + $0x1e4] ss:$16 sps:$4 sm:$0xff]   ;;  %v5596_v24 = vld [vmem:[%s9232_s1 + $0x1e0] ss:$16 sps:$4 sm:$0xff]   ;;  %v354_v45 = vld [vmem:[%s6188_s8 + $0x78] sm:$0xff] }
  0x21   : > { %1928 = vmatprep.subr.bf16.mxu0 %v5579_v7  ;;  %5498 = vmatprep.subr.bf16.mxu1 %v5579_v7  ;;  %v5597_v25 = vld [vmem:[%s9232_s1 + $0x1c4] ss:$16 sps:$4 sm:$0xff]   ;;  %v5599_v26 = vld [vmem:[%s9232_s1 + $0x1c0] ss:$16 sps:$4 sm:$0xff]   ;;  %v466_v49 = vld [vmem:[%s6188_s8 + $0x3f8] sm:$0xff] }
  0x22   : > { %1954 = vmatprep.mubr.bf16.mxu0 %v6198_v16  ;;  %2034 = vmatprep.mubr.bf16.mxu1 %v6205_v20  ;;  %v5600_v27 = vld [vmem:[%s9232_s1 + $0x1a4] ss:$16 sps:$4 sm:$0xff]   ;;  %v5602_v28 = vld [vmem:[%s9232_s1 + $0x1a0] ss:$16 sps:$4 sm:$0xff]   ;;  %v360_v60 = vld [vmem:[%s6188_s8 + $0xa8] sm:$0xff] }
  0x23   : > { %v5603_v29 = vld [vmem:[%s9232_s1 + $0x184] ss:$16 sps:$4 sm:$0xff]   ;;  %v5605_v30 = vld [vmem:[%s9232_s1 + $0x180] ss:$16 sps:$4 sm:$0xff]   ;;  %v472_v62 = vld [vmem:[%s6188_s8 + $0x428] sm:$0xff] }
  0x24   : > { %1929 = vmatpush1.bf16.msra.mxu0 %v5581_v8  ;;  %5514 = vmatpush1.bf16.msra.mxu1 %v5581_v8  ;;  %v5606_v31 = vld [vmem:[%s9232_s1 + $0x164] ss:$16 sps:$4 sm:$0xff]   ;;  %v5608_v32 = vld [vmem:[%s9232_s1 + $0x160] ss:$16 sps:$4 sm:$0xff]   ;;  %v368_v1 = vld [vmem:[%s6188_s8 + $0xe8] sm:$0xff] }
  0x25   : > { %1930 = vmatprep.subr.bf16.mxu0 %v5582_v9  ;;  %5499 = vmatprep.subr.bf16.mxu1 %v5582_v9  ;;  %v5609_v33 = vld [vmem:[%s9232_s1 + $0x144] ss:$16 sps:$4 sm:$0xff]   ;;  %v5611_v34 = vld [vmem:[%s9232_s1 + $0x140] ss:$16 sps:$4 sm:$0xff]   ;;  %v480_v5 = vld [vmem:[%s6188_s8 + $0x468] sm:$0xff] }
  0x26   : > { %v5612_v35 = vld [vmem:[%s9232_s1 + $0x124] ss:$16 sps:$4 sm:$0xff]   ;;  %v5614_v36 = vld [vmem:[%s9232_s1 + $0x120] ss:$16 sps:$4 sm:$0xff]   ;;  %v374_v17 = vld [vmem:[%s6188_s8 + $0x118] sm:$0xff] }
  0x27   : > { %v5615_v37 = vld [vmem:[%s9232_s1 + $0x104] ss:$16 sps:$4 sm:$0xff]   ;;  %v5617_v38 = vld [vmem:[%s9232_s1 + $0x100] ss:$16 sps:$4 sm:$0xff]  }
  0x28   : > { %1931 = vmatpush1.bf16.msra.mxu0 %v5584_v10  ;;  %5515 = vmatpush1.bf16.msra.mxu1 %v5584_v10  ;;  %v339_v39 = vld [vmem:[%s6188_s8] sm:$0xff]  ;;  %v361_v48 = vld [vmem:[%s6188_s8 + $0xb0] sm:$0xff] }
  0x29   : > { %1932 = vmatprep.subr.bf16.mxu0 %v5585_v11  ;;  %5500 = vmatprep.subr.bf16.mxu1 %v5585_v11  ;;  %v451_v41 = vld [vmem:[%s6188_s8 + $0x380] sm:$0xff]  ;;  %v6274_v46 = vpack.c.bf16 %v346_v40, %v339_v39  ;;  %v473_v50 = vld [vmem:[%s6188_s8 + $0x430] sm:$0xff]  ;;  %v6299_v57 = vpack.c.bf16 %v361_v48, %v354_v45  ;;  %v500_v40 = vld [vmem:[%s6188_s8 + $0x508] sm:$0xff] }
  0x2a   : > { %v5620_v43 = vld [vmem:[%s9232_s1 + $0x2e4] ss:$16 sps:$4 sm:$0xff]   ;;  %v6276_v47 = vpack.c.bf16 %v458_v42, %v451_v41  ;;  %v5618_v51 = vld [vmem:[%s9232_s1 + $0x2e0] ss:$16 sps:$4 sm:$0xff]   ;;  %v6301_v58 = vpack.c.bf16 %v473_v50, %v466_v49  ;;  %v508_v49 = vld [vmem:[%s6188_s8 + $0x548] sm:$0xff] }
  0x2b   : > { %v5623_v44 = vld [vmem:[%s9232_s1 + $0x4e4] ss:$16 sps:$4 sm:$0xff]   ;;  %v5621_v52 = vld [vmem:[%s9232_s1 + $0x4e0] ss:$16 sps:$4 sm:$0xff]  }
  0x2c   : > { %1933 = vmatpush1.bf16.msra.mxu0 %v5587_v12  ;;  %5516 = vmatpush1.bf16.msra.mxu1 %v5587_v12  ;;  %v5626_v53 = vld [vmem:[%s9232_s1 + $0x2c4] ss:$16 sps:$4 sm:$0xff]   ;;  %v5624_v55 = vld [vmem:[%s9232_s1 + $0x2c0] ss:$16 sps:$4 sm:$0xff]  }
  0x2d   : > { %1934 = vmatprep.subr.bf16.mxu0 %v5588_v13  ;;  %5501 = vmatprep.subr.bf16.mxu1 %v5588_v13  ;;  %v5629_v54 = vld [vmem:[%s9232_s1 + $0x4c4] ss:$16 sps:$4 sm:$0xff]   ;;  %v5627_v56 = vld [vmem:[%s9232_s1 + $0x4c0] ss:$16 sps:$4 sm:$0xff]  }
  0x2e   : > { %v353_v59 = vld [vmem:[%s6188_s8 + $0x70] sm:$0xff]  ;;  %v375_v4 = vld [vmem:[%s6188_s8 + $0x120] sm:$0xff] }
  0x2f   : > { %v465_v61 = vld [vmem:[%s6188_s8 + $0x3f0] sm:$0xff]  ;;  %v6318_v2 = vpack.c.bf16 %v360_v60, %v353_v59  ;;  %v487_v6 = vld [vmem:[%s6188_s8 + $0x4a0] sm:$0xff]  ;;  %v6343_v13 = vpack.c.bf16 %v375_v4, %v368_v1 }
  0x30   : > { %1935 = vmatpush1.bf16.msra.mxu0 %v5590_v19  ;;  %5517 = vmatpush1.bf16.msra.mxu1 %v5590_v19  ;;  %v5632_v63 = vld [vmem:[%s9232_s1 + $0x2a4] ss:$16 sps:$4 sm:$0xff]   ;;  %v6320_v3 = vpack.c.bf16 %v472_v62, %v465_v61  ;;  %v5630_v7 = vld [vmem:[%s9232_s1 + $0x2a0] ss:$16 sps:$4 sm:$0xff]   ;;  %v6345_v14 = vpack.c.bf16 %v487_v6, %v480_v5  ;;  %v486_v19 = vld [vmem:[%s6188_s8 + $0x498] sm:$0xff] }
  0x31   : > { %1936 = vmatprep.subr.bf16.mxu0 %v5591_v21  ;;  %5502 = vmatprep.subr.bf16.mxu1 %v5591_v21  ;;  %v5635_v0 = vld [vmem:[%s9232_s1 + $0x4a4] ss:$16 sps:$4 sm:$0xff]   ;;  %v5633_v8 = vld [vmem:[%s9232_s1 + $0x4a0] ss:$16 sps:$4 sm:$0xff]   ;;  %v402_v62 = vld [vmem:[%s6188_s8 + $0x1f8] sm:$0xff] }
  0x32   : > { %v5638_v9 = vld [vmem:[%s9232_s1 + $0x284] ss:$16 sps:$4 sm:$0xff]   ;;  %v5636_v11 = vld [vmem:[%s9232_s1 + $0x280] ss:$16 sps:$4 sm:$0xff]   ;;  %v410_v5 = vld [vmem:[%s6188_s8 + $0x238] sm:$0xff] }
  0x33   : > { %v5641_v10 = vld [vmem:[%s9232_s1 + $0x484] ss:$16 sps:$4 sm:$0xff]   ;;  %v5639_v12 = vld [vmem:[%s9232_s1 + $0x480] ss:$16 sps:$4 sm:$0xff]  }
  0x34   : > { %1937 = vmatpush1.bf16.msra.mxu0 %v5593_v22  ;;  %5518 = vmatpush1.bf16.msra.mxu1 %v5593_v22  ;;  %v367_v15 = vld [vmem:[%s6188_s8 + $0xe0] sm:$0xff]  ;;  %v493_v39 = vld [vmem:[%s6188_s8 + $0x4d0] sm:$0xff] }
  0x35   : > { %1938 = vmatprep.subr.bf16.mxu0 %v5594_v23  ;;  %5503 = vmatprep.subr.bf16.mxu1 %v5594_v23  ;;  %v479_v18 = vld [vmem:[%s6188_s8 + $0x460] sm:$0xff]  ;;  %v382_v23 = vld [vmem:[%s6188_s8 + $0x158] sm:$0xff]  ;;  %v6408_v45 = vpack.c.bf16 %v500_v40, %v493_v39 }
  0x36   : > { %v5644_v21 = vld [vmem:[%s9232_s1 + $0x264] ss:$16 sps:$4 sm:$0xff]   ;;  %v5660_v59 = vld [vmem:[%s9232_s1 + $0x200] ss:$16 sps:$4 sm:$0xff]  }
  0x37   : > { %v5647_v22 = vld [vmem:[%s9232_s1 + $0x464] ss:$16 sps:$4 sm:$0xff]   ;;  %v5663_v60 = vld [vmem:[%s9232_s1 + $0x400] ss:$16 sps:$4 sm:$0xff]  }
  0x38   : > { %1939 = vmatpush2.bf16.msra.mxu0 %v5596_v24  ;;  %5519 = vmatpush2.bf16.msra.mxu1 %v5596_v24  ;;  %v6362_v24 = vpack.c.bf16 %v374_v17, %v367_v15  ;;  %v5656_v41 = vld [vmem:[%s9232_s1 + $0x224] ss:$16 sps:$4 sm:$0xff]   ;;  %v5678_v39 = vld [vmem:[%s9232_s1 + $0x3a0] ss:$16 sps:$4 sm:$0xff]  }
  0x39   : > { %1940 = vmatprep.subr.bf16.mxu0 %v5597_v25  ;;  %5504 = vmatprep.subr.bf16.mxu1 %v5597_v25  ;;  %v6364_v25 = vpack.c.bf16 %v486_v19, %v479_v18  ;;  %v5659_v42 = vld [vmem:[%s9232_s1 + $0x424] ss:$16 sps:$4 sm:$0xff]   ;;  %v5681_v40 = vld [vmem:[%s9232_s1 + $0x5a0] ss:$16 sps:$4 sm:$0xff]  }
  0x3a   : > { %v403_v48 = vld [vmem:[%s6188_s8 + $0x200] sm:$0xff] }
  0x3b   : > { %v515_v50 = vld [vmem:[%s6188_s8 + $0x580] sm:$0xff] }
  0x3c   : > { %1941 = vmatpush2.bf16.msra.mxu0 %v5599_v26  ;;  %5520 = vmatpush2.bf16.msra.mxu1 %v5599_v26  ;;  %v389_v26 = vld [vmem:[%s6188_s8 + $0x190] sm:$0xff]  ;;  %v395_v61 = vld [vmem:[%s6188_s8 + $0x1c0] sm:$0xff] }
  0x3d   : > { %1942 = vmatprep.subr.bf16.mxu0 %v5600_v27  ;;  %5505 = vmatprep.subr.bf16.mxu1 %v5600_v27  ;;  %v494_v27 = vld [vmem:[%s6188_s8 + $0x4d8] sm:$0xff]  ;;  %v5668_v1 = vld [vmem:[%s9232_s1 + $0x3e4] ss:$16 sps:$4 sm:$0xff]   ;;  %v6450_v6 = vpack.c.bf16 %v402_v62, %v395_v61  ;;  %v5690_v62 = vld [vmem:[%s9232_s1 + $0x360] ss:$16 sps:$4 sm:$0xff]  }
  0x3e   : > { %v5671_v4 = vld [vmem:[%s9232_s1 + $0x5e4] ss:$16 sps:$4 sm:$0xff]   ;;  %v438_v61 = vld [vmem:[%s6188_s8 + $0x318] sm:$0xff] }
  0x3f   : > { %v5674_v15 = vld [vmem:[%s9232_s1 + $0x3c4] ss:$16 sps:$4 sm:$0xff]  }
  0x40   : > { %1943 = vmatpush2.bf16.msra.mxu0 %v5602_v28  ;;  %5521 = vmatpush2.bf16.msra.mxu1 %v5602_v28  ;;  %v501_v28 = vld [vmem:[%s6188_s8 + $0x510] sm:$0xff] }
  0x41   : > { %1944 = vmatprep.subr.bf16.mxu0 %v5603_v29  ;;  %5506 = vmatprep.subr.bf16.mxu1 %v5603_v29  ;;  %v5642_v29 = vld [vmem:[%s9232_s1 + $0x260] ss:$16 sps:$4 sm:$0xff]   ;;  %v5677_v17 = vld [vmem:[%s9232_s1 + $0x5c4] ss:$16 sps:$4 sm:$0xff]  }
  0x44   : > { %1945 = vmatpush2.bf16.msra.mxu0 %v5605_v30  ;;  %5522 = vmatpush2.bf16.msra.mxu1 %v5605_v30  ;;  %v5645_v30 = vld [vmem:[%s9232_s1 + $0x460] ss:$16 sps:$4 sm:$0xff]  }
  0x45   : > { %1946 = vmatprep.subr.bf16.mxu0 %v5606_v31  ;;  %5507 = vmatprep.subr.bf16.mxu1 %v5606_v31  ;;  %v5650_v31 = vld [vmem:[%s9232_s1 + $0x244] ss:$16 sps:$4 sm:$0xff]  }
  0x48   : > { %1947 = vmatpush2.bf16.msra.mxu0 %v5608_v32  ;;  %5523 = vmatpush2.bf16.msra.mxu1 %v5608_v32  ;;  %v5653_v32 = vld [vmem:[%s9232_s1 + $0x444] ss:$16 sps:$4 sm:$0xff]  }
  0x49   : > { %1948 = vmatprep.subr.bf16.mxu0 %v5609_v33  ;;  %5508 = vmatprep.subr.bf16.mxu1 %v5609_v33  ;;  %v5648_v33 = vld [vmem:[%s9232_s1 + $0x240] ss:$16 sps:$4 sm:$0xff]  }
  0x4c   : > { %1949 = vmatpush2.bf16.msra.mxu0 %v5611_v34  ;;  %5524 = vmatpush2.bf16.msra.mxu1 %v5611_v34  ;;  %v5651_v34 = vld [vmem:[%s9232_s1 + $0x440] ss:$16 sps:$4 sm:$0xff]  }
  0x4d   : > { %1950 = vmatprep.subr.bf16.mxu0 %v5612_v35  ;;  %5509 = vmatprep.subr.bf16.mxu1 %v5612_v35  ;;  %v6387_v35 = vpack.c.bf16 %v389_v26, %v382_v23  ;;  %v409_v23 = vld [vmem:[%s6188_s8 + $0x230] sm:$0xff]  ;;  %v416_v26 = vld [vmem:[%s6188_s8 + $0x268] sm:$0xff] }
  0x50   : > { %1951 = vmatpush2.bf16.msra.mxu0 %v5614_v36  ;;  %5525 = vmatpush2.bf16.msra.mxu1 %v5614_v36  ;;  %v6389_v36 = vpack.c.bf16 %v501_v28, %v494_v27  ;;  %v521_v27 = vld [vmem:[%s6188_s8 + $0x5b0] sm:$0xff]  ;;  %v528_v28 = vld [vmem:[%s6188_s8 + $0x5e8] sm:$0xff] }
  0x51   : > { %1952 = vmatprep.subr.bf16.mxu0 %v5615_v37  ;;  %5510 = vmatprep.subr.bf16.mxu1 %v5615_v37  ;;  %v381_v37 = vld [vmem:[%s6188_s8 + $0x150] sm:$0xff] }
  0x54   : > { %1953 = vmatpush2.bf16.msra.mxu0 %v5617_v38  ;;  %5526 = vmatpush2.bf16.msra.mxu1 %v5617_v38  ;;  %v388_v38 = vld [vmem:[%s6188_s8 + $0x188] sm:$0xff] }
  0x55   : > { %2115 = vmatprep.subr.bf16.mxu1 %v5620_v43  ;;  %2308 = vmatprep.subr.bf16.mxu0 %v5623_v44  ;;  %v396_v43 = vld [vmem:[%s6188_s8 + $0x1c8] sm:$0xff]  ;;  %v6406_v44 = vpack.c.bf16 %v388_v38, %v381_v37  ;;  %v543_v38 = vld [vmem:[%s6188_s8 + $0x660] sm:$0xff] }
  0x56   : > { %v536_v37 = vld [vmem:[%s6188_s8 + $0x628] sm:$0xff] }
  0x57   : > { %1955 = vmatmul.mubr.bf16.vlgmr.msra.gmra.mxu0 %v6274_v46  ;;  %2035 = vmatmul.mubr.bf16.vlgmr.msra.gmra.mxu1 %v6276_v47 }
  0x58   : > { %2116 = vmatpush1.bf16.msra.mxu1 %v5618_v51  ;;  %2309 = vmatpush1.bf16.msra.mxu0 %v5621_v52  ;;  %v5654_v51 = vld [vmem:[%s9232_s1 + $0x220] ss:$16 sps:$4 sm:$0xff]  }
  0x59   : > { %2117 = vmatprep.subr.bf16.mxu1 %v5626_v53  ;;  %2310 = vmatprep.subr.bf16.mxu0 %v5629_v54  ;;  %v5657_v52 = vld [vmem:[%s9232_s1 + $0x420] ss:$16 sps:$4 sm:$0xff]   ;;  %v5662_v53 = vld [vmem:[%s9232_s1 + $0x204] ss:$16 sps:$4 sm:$0xff]  }
  0x5a   : > { %1964 = vmatprep.mubr.bf16.mxu0 %v6299_v57  ;;  %2044 = vmatprep.mubr.bf16.mxu1 %v6301_v58  ;;  %v5665_v54 = vld [vmem:[%s9232_s1 + $0x404] ss:$16 sps:$4 sm:$0xff]  }
  0x5c   : > { %2118 = vmatpush1.bf16.msra.mxu1 %v5624_v55  ;;  %2311 = vmatpush1.bf16.msra.mxu0 %v5627_v56  ;;  %v6425_v55 = vpack.c.bf16 %v403_v48, %v396_v43  ;;  %v6427_v56 = vpack.c.bf16 %v515_v50, %v508_v49  ;;  %v6515_v48 = vpack.c.bf16 %v543_v38, %v536_v37  ;;  %v5684_v49 = vld [vmem:[%s9232_s1 + $0x380] ss:$16 sps:$4 sm:$0xff]   ;;  %v344_v37 = vld [vmem:[%s6188_s8 + $0x28] sm:$0xff] }
  0x5d   : > { %2119 = vmatprep.subr.bf16.mxu1 %v5632_v63  ;;  %2312 = vmatprep.subr.bf16.mxu0 %v5635_v0  ;;  %v507_v63 = vld [vmem:[%s6188_s8 + $0x540] sm:$0xff]  ;;  %v514_v0 = vld [vmem:[%s6188_s8 + $0x578] sm:$0xff] }
  0x5e   : > { %v5687_v50 = vld [vmem:[%s9232_s1 + $0x580] ss:$16 sps:$4 sm:$0xff]  }
  0x5f   : > { %1965 = vmatmul.mubr.bf16.gmra.mxu0 %v6318_v2  ;;  %2045 = vmatmul.mubr.bf16.gmra.mxu1 %v6320_v3  ;;  %v351_v38 = vld [vmem:[%s6188_s8 + $0x60] sm:$0xff] }
  0x60   : > { %2120 = vmatpush1.bf16.msra.mxu1 %v5630_v7  ;;  %2313 = vmatpush1.bf16.msra.mxu0 %v5633_v8  ;;  %v6452_v7 = vpack.c.bf16 %v514_v0, %v507_v63  ;;  %v417_v8 = vld [vmem:[%s6188_s8 + $0x270] sm:$0xff] }
  0x61   : > { %2121 = vmatprep.subr.bf16.mxu1 %v5638_v9  ;;  %2314 = vmatprep.subr.bf16.mxu0 %v5641_v10  ;;  %v522_v9 = vld [vmem:[%s6188_s8 + $0x5b8] sm:$0xff]  ;;  %v529_v10 = vld [vmem:[%s6188_s8 + $0x5f0] sm:$0xff]  ;;  %v6469_v18 = vpack.c.bf16 %v417_v8, %v410_v5 }
  0x62   : > { %1974 = vmatprep.mubr.bf16.mxu0 %v6343_v13  ;;  %2054 = vmatprep.mubr.bf16.mxu1 %v6345_v14  ;;  %v6471_v19 = vpack.c.bf16 %v529_v10, %v522_v9  ;;  %v445_v63 = vld [vmem:[%s6188_s8 + $0x350] sm:$0xff] }
  0x63   : > { %v557_v5 = vld [vmem:[%s6188_s8 + $0x6d0] sm:$0xff] }
  0x64   : > { %2122 = vmatpush1.bf16.msra.mxu1 %v5636_v11  ;;  %2315 = vmatpush1.bf16.msra.mxu0 %v5639_v12  ;;  %v5666_v11 = vld [vmem:[%s9232_s1 + $0x3e0] ss:$16 sps:$4 sm:$0xff]   ;;  %v5698_v9 = vld [vmem:[%s9232_s1 + $0x344] ss:$16 sps:$4 sm:$0xff]  }
  0x65   : > { %2123 = vmatprep.subr.bf16.mxu1 %v5644_v21  ;;  %2316 = vmatprep.subr.bf16.mxu0 %v5647_v22  ;;  %v5669_v12 = vld [vmem:[%s9232_s1 + $0x5e0] ss:$16 sps:$4 sm:$0xff]   ;;  %v5701_v10 = vld [vmem:[%s9232_s1 + $0x544] ss:$16 sps:$4 sm:$0xff]  }
  0x66   : > { %v5672_v21 = vld [vmem:[%s9232_s1 + $0x3c0] ss:$16 sps:$4 sm:$0xff]  }
  0x67   : > { %1975 = vmatmul.mubr.bf16.gmra.mxu0 %v6362_v24  ;;  %2055 = vmatmul.mubr.bf16.gmra.mxu1 %v6364_v25  ;;  %v5675_v22 = vld [vmem:[%s9232_s1 + $0x5c0] ss:$16 sps:$4 sm:$0xff]  }
  0x68   : > { %2124 = vmatpush1.bf16.msra.mxu1 %v5642_v29  ;;  %2317 = vmatpush1.bf16.msra.mxu0 %v5645_v30  ;;  %v5680_v29 = vld [vmem:[%s9232_s1 + $0x3a4] ss:$16 sps:$4 sm:$0xff]   ;;  %v5693_v8 = vld [vmem:[%s9232_s1 + $0x560] ss:$16 sps:$4 sm:$0xff]  }
  0x69   : > { %2125 = vmatprep.subr.bf16.mxu1 %v5650_v31  ;;  %2318 = vmatprep.subr.bf16.mxu0 %v5653_v32  ;;  %v5683_v30 = vld [vmem:[%s9232_s1 + $0x5a4] ss:$16 sps:$4 sm:$0xff]   ;;  %v424_v31 = vld [vmem:[%s6188_s8 + $0x2a8] sm:$0xff]  ;;  %v6494_v32 = vpack.c.bf16 %v416_v26, %v409_v23 }
  0x6a   : > { %1984 = vmatprep.mubr.bf16.mxu0 %v6387_v35  ;;  %2064 = vmatprep.mubr.bf16.mxu1 %v6389_v36  ;;  %v549_v23 = vld [vmem:[%s6188_s8 + $0x690] sm:$0xff]  ;;  %v556_v26 = vld [vmem:[%s6188_s8 + $0x6c8] sm:$0xff] }
  0x6c   : > { %2126 = vmatpush1.bf16.msra.mxu1 %v5648_v33  ;;  %2319 = vmatpush1.bf16.msra.mxu0 %v5651_v34  ;;  %v6496_v33 = vpack.c.bf16 %v528_v28, %v521_v27  ;;  %v431_v34 = vld [vmem:[%s6188_s8 + $0x2e0] sm:$0xff] }
  0x6d   : > { %2127 = vmatprep.subr.bf16.mxu1 %v5656_v41  ;;  %2320 = vmatprep.subr.bf16.mxu0 %v5659_v42  ;;  %v5686_v41 = vld [vmem:[%s9232_s1 + $0x384] ss:$16 sps:$4 sm:$0xff]   ;;  %v6513_v43 = vpack.c.bf16 %v431_v34, %v424_v31  ;;  %v6584_v31 = vpack.c.bf16 %v556_v26, %v549_v23  ;;  %v5717_v23 = vld [vmem:[%s9232_s1 + $0xe8] ss:$16 sps:$4 sm:$0xff]  }
  0x6e   : > { %v5689_v42 = vld [vmem:[%s9232_s1 + $0x584] ss:$16 sps:$4 sm:$0xff]  }
  0x6f   : > { %1985 = vmatmul.mubr.bf16.gmra.mxu0 %v6406_v44  ;;  %2065 = vmatmul.mubr.bf16.gmra.mxu1 %v6408_v45  ;;  %v5704_v27 = vld [vmem:[%s9232_s1 + $0x324] ss:$16 sps:$4 sm:$0xff]  }
  0x70   : > { %2128 = vmatpush1.bf16.msra.mxu1 %v5654_v51  ;;  %2321 = vmatpush1.bf16.msra.mxu0 %v5657_v52  ;;  %v423_v51 = vld [vmem:[%s6188_s8 + $0x2a0] sm:$0xff]  ;;  %v430_v52 = vld [vmem:[%s6188_s8 + $0x2d8] sm:$0xff]  ;;  %v349_v34 = vld [vmem:[%s6188_s8 + $0x50] sm:$0xff] }
  0x71   : > { %2129 = vmatprep.subr.bf16.mxu1 %v5662_v53  ;;  %2322 = vmatprep.subr.bf16.mxu0 %v5665_v54  ;;  %v535_v53 = vld [vmem:[%s6188_s8 + $0x620] sm:$0xff]  ;;  %v542_v54 = vld [vmem:[%s6188_s8 + $0x658] sm:$0xff]  ;;  %v6542_v0 = vpack.c.bf16 %v430_v52, %v423_v51  ;;  %v6609_v52 = vpack.c.bf16 %v351_v38, %v344_v37  ;;  %v377_v38 = vld [vmem:[%s6188_s8 + $0x130] sm:$0xff] }
  0x72   : > { %1994 = vmatprep.mubr.bf16.mxu0 %v6425_v55  ;;  %2074 = vmatprep.mubr.bf16.mxu1 %v6427_v56  ;;  %v5707_v28 = vld [vmem:[%s9232_s1 + $0x524] ss:$16 sps:$4 sm:$0xff]   ;;  %v370_v37 = vld [vmem:[%s6188_s8 + $0xf8] sm:$0xff] }
  0x73   : > { %9331 = vst [vmem:[#allocation6_spill] sm:$0xff] %v6609_v52  ;;  %v355_v26 = vld [vmem:[%s6188_s8 + $0x80] sm:$0xff] }
  0x74   : > { %2130 = vmatpush1.bf16.msra.mxu1 %v5660_v59  ;;  %2323 = vmatpush1.bf16.msra.mxu0 %v5663_v60  ;;  %v5692_v59 = vld [vmem:[%s9232_s1 + $0x364] ss:$16 sps:$4 sm:$0xff]  }
  0x75   : > { %2131 = vmatprep.subr.bf16.mxu1 %v5668_v1  ;;  %2324 = vmatprep.subr.bf16.mxu0 %v5671_v4  ;;  %v5695_v60 = vld [vmem:[%s9232_s1 + $0x564] ss:$16 sps:$4 sm:$0xff]   ;;  %v6544_v1 = vpack.c.bf16 %v542_v54, %v535_v53  ;;  %v550_v4 = vld [vmem:[%s6188_s8 + $0x698] sm:$0xff]  ;;  %v348_v54 = vld [vmem:[%s6188_s8 + $0x48] sm:$0xff] }
  0x76   : > { %v341_v53 = vld [vmem:[%s6188_s8 + $0x10] sm:$0xff] }
  0x77   : > { %1995 = vmatmul.mubr.bf16.gmra.mxu0 %v6450_v6  ;;  %2075 = vmatmul.mubr.bf16.gmra.mxu1 %v6452_v7 }
  0x78   : > { %2132 = vmatpush2.bf16.msra.mxu1 %v5666_v11  ;;  %2325 = vmatpush2.bf16.msra.mxu0 %v5669_v12  ;;  %v5696_v11 = vld [vmem:[%s9232_s1 + $0x340] ss:$16 sps:$4 sm:$0xff]   ;;  %v6560_v12 = vpack.c.bf16 %v445_v63, %v438_v61  ;;  %v356_v61 = vld [vmem:[%s6188_s8 + $0x88] sm:$0xff]  ;;  %v358_v63 = vld [vmem:[%s6188_s8 + $0x98] sm:$0xff] }
  0x79   : > { %2133 = vmatprep.subr.bf16.mxu1 %v5674_v15  ;;  %2326 = vmatprep.subr.bf16.mxu0 %v5677_v17  ;;  %v6562_v15 = vpack.c.bf16 %v557_v5, %v550_v4  ;;  %v5699_v17 = vld [vmem:[%s9232_s1 + $0x540] ss:$16 sps:$4 sm:$0xff]   ;;  %v5716_v5 = vld [vmem:[%s9232_s1 + $0x604] ss:$16 sps:$4 sm:$0xff]  }
  0x7a   : > { %2004 = vmatprep.mubr.bf16.mxu0 %v6469_v18  ;;  %2084 = vmatprep.mubr.bf16.mxu1 %v6471_v19  ;;  %v365_v4 = vld [vmem:[%s6188_s8 + $0xd0] sm:$0xff] }
  0x7c   : > { %2134 = vmatpush2.bf16.msra.mxu1 %v5672_v21  ;;  %2327 = vmatpush2.bf16.msra.mxu0 %v5675_v22  ;;  %v437_v21 = vld [vmem:[%s6188_s8 + $0x310] sm:$0xff]  ;;  %v444_v22 = vld [vmem:[%s6188_s8 + $0x348] sm:$0xff] }
  0x7d   : > { %2135 = vmatprep.subr.bf16.mxu1 %v5680_v29  ;;  %2328 = vmatprep.subr.bf16.mxu0 %v5683_v30  ;;  %v342_v29 = vld [vmem:[%s6188_s8 + $0x18] sm:$0xff]  ;;  %v6582_v30 = vpack.c.bf16 %v444_v22, %v437_v21  ;;  %v6636_v21 = vpack.c.bf16 %v365_v4, %v358_v63  ;;  %v5714_v22 = vld [vmem:[%s9232_s1 + $0x600] ss:$16 sps:$4 sm:$0xff]  }
  0x7e   : > { %v6607_v51 = vpack.c.bf16 %v349_v34, %v342_v29  ;;  %v357_v29 = vld [vmem:[%s6188_s8 + $0x90] sm:$0xff]  ;;  %v364_v34 = vld [vmem:[%s6188_s8 + $0xc8] sm:$0xff]  ;;  %v371_v63 = vld [vmem:[%s6188_s8 + $0x100] sm:$0xff] }
  0x7f   : > { %2005 = vmatmul.mubr.bf16.gmra.mxu0 %v6494_v32  ;;  %2085 = vmatmul.mubr.bf16.gmra.mxu1 %v6496_v33  ;;  %9335 = vst [vmem:[#allocation10_spill] sm:$0xff] %v6636_v21  ;;  %v378_v4 = vld [vmem:[%s6188_s8 + $0x138] sm:$0xff] }
  0x80   : > { %2136 = vmatpush2.bf16.msra.mxu1 %v5678_v39  ;;  %2329 = vmatpush2.bf16.msra.mxu0 %v5681_v40  ;;  %v5702_v39 = vld [vmem:[%s9232_s1 + $0x320] ss:$16 sps:$4 sm:$0xff]  }
  0x81   : > { %2137 = vmatprep.subr.bf16.mxu1 %v5686_v41  ;;  %2330 = vmatprep.subr.bf16.mxu0 %v5689_v42  ;;  %v5705_v40 = vld [vmem:[%s9232_s1 + $0x520] ss:$16 sps:$4 sm:$0xff]   ;;  %v5710_v41 = vld [vmem:[%s9232_s1 + $0x304] ss:$16 sps:$4 sm:$0xff]  }
  0x82   : > { %2014 = vmatprep.mubr.bf16.mxu0 %v6513_v43  ;;  %2094 = vmatprep.mubr.bf16.mxu1 %v6515_v48  ;;  %v5713_v42 = vld [vmem:[%s9232_s1 + $0x504] ss:$16 sps:$4 sm:$0xff]  }
  0x84   : > { %2138 = vmatpush2.bf16.msra.mxu1 %v5684_v49  ;;  %2331 = vmatpush2.bf16.msra.mxu0 %v5687_v50  ;;  %v5708_v49 = vld [vmem:[%s9232_s1 + $0x300] ss:$16 sps:$4 sm:$0xff]  }
  0x85   : > { %2139 = vmatprep.subr.bf16.mxu1 %v5692_v59  ;;  %2332 = vmatprep.subr.bf16.mxu0 %v5695_v60  ;;  %v5711_v50 = vld [vmem:[%s9232_s1 + $0x500] ss:$16 sps:$4 sm:$0xff]   ;;  %v350_v60 = vld [vmem:[%s6188_s8 + $0x58] sm:$0xff] }
  0x86   : > { %v343_v59 = vld [vmem:[%s6188_s8 + $0x20] sm:$0xff] }
  0x87   : > { %2015 = vmatmul.mubr.bf16.gmra.mxu0 %v6542_v0  ;;  %2095 = vmatmul.mubr.bf16.gmra.mxu1 %v6544_v1 }
  0x88   : > { %2140 = vmatpush2.bf16.msra.mxu1 %v5690_v62  ;;  %2333 = vmatpush2.bf16.msra.mxu0 %v5693_v8  ;;  %v363_v62 = vld [vmem:[%s6188_s8 + $0xc0] sm:$0xff]  ;;  %v5719_v8 = vld [vmem:[%s9232_s1 + $0xec] ss:$16 sps:$4 sm:$0xff]  }
  0x89   : > { %2141 = vmatprep.subr.bf16.mxu1 %v5698_v9  ;;  %2334 = vmatprep.subr.bf16.mxu0 %v5701_v10  ;;  %v6629_v9 = vpack.c.bf16 %v348_v54, %v341_v53  ;;  %v6631_v10 = vpack.c.bf16 %v350_v60, %v343_v59  ;;  %v6669_v53 = vpack.c.bf16 %v377_v38, %v370_v37  ;;  %v5723_v59 = vld [vmem:[%s9232_s1 + $0xa8] ss:$16 sps:$4 sm:$0xff]   ;;  %v369_v60 = vld [vmem:[%s6188_s8 + $0xf0] sm:$0xff] }
  0x8a   : > { %2024 = vmatprep.mubr.bf16.mxu0 %v6560_v12  ;;  %2104 = vmatprep.mubr.bf16.mxu1 %v6562_v15  ;;  %v5729_v38 = vld [vmem:[%s9232_s1 + $0x68] ss:$16 sps:$4 sm:$0xff]  }
  0x8b   : > { %9332 = vst [vmem:[#allocation7_spill] sm:$0xff] %v6629_v9  ;;  %9333 = vst [vmem:[#allocation8_spill] sm:$0xff] %v6631_v10 }
  0x8c   : > { %2142 = vmatpush2.bf16.msra.mxu1 %v5696_v11  ;;  %2335 = vmatpush2.bf16.msra.mxu0 %v5699_v17  ;;  %v9241_v11 = vmov 0   ;;  %v6634_v17 = vpack.c.bf16 %v363_v62, %v356_v61  ;;  %9338 = vst [vmem:[#allocation13_spill] sm:$0xff] %v6669_v53  ;;  %v376_v61 = vld [vmem:[%s6188_s8 + $0x128] sm:$0xff] }
  0x8d   : > { %2143 = vmatprep.subr.bf16.mxu1 %v5704_v27  ;;  %2336 = vmatprep.subr.bf16.mxu0 %v5707_v28  ;;  %v362_v27 = vld [vmem:[%s6188_s8 + $0xb8] sm:$0xff] }
  0x8e   : > { %5569 = vset.pattern.permute.xlu0 %v9241_v11  ;;  %9334 = vst [vmem:[#allocation9_spill] sm:$0xff] %v6634_v17  ;;  %v5722_v28 = vld [vmem:[%s9232_s1 + $0xcc] ss:$16 sps:$4 sm:$0xff]   ;;  %v399_v11 = vld [vmem:[%s6188_s8 + $0x1e0] sm:$0xff] }
  0x8f   : > { %2025 = vmatmul.mubr.bf16.gmra.mxu0 %v6582_v30  ;;  %2105 = vmatmul.mubr.bf16.gmra.mxu1 %v6584_v31  ;;  %v5728_v62 = vld [vmem:[%s9232_s1 + $0x8c] ss:$16 sps:$4 sm:$0xff]  }
  0x90   : > { %2144 = vmatpush2.bf16.msra.mxu1 %v5702_v39  ;;  %2337 = vmatpush2.bf16.msra.mxu0 %v5705_v40  ;;  %v372_v39 = vld [vmem:[%s6188_s8 + $0x108] sm:$0xff]  ;;  %v379_v40 = vld [vmem:[%s6188_s8 + $0x140] sm:$0xff] }
  0x91   : > { %2145 = vmatprep.subr.bf16.mxu1 %v5710_v41  ;;  %2338 = vmatprep.subr.bf16.mxu0 %v5713_v42  ;;  %v5720_v41 = vld [vmem:[%s9232_s1 + $0xc8] ss:$16 sps:$4 sm:$0xff]   ;;  %v5725_v42 = vld [vmem:[%s9232_s1 + $0xac] ss:$16 sps:$4 sm:$0xff]   ;;  %v6671_v54 = vpack.c.bf16 %v379_v40, %v372_v39  ;;  %v383_v39 = vld [vmem:[%s6188_s8 + $0x160] sm:$0xff] }
  0x92   : > { %2147 = vmatprep.mubr.bf16.mxu1 %v6607_v51  ;;  %2340 = vmatprep.mubr.bf16.mxu0 %v6609_v52  ;;  %v390_v40 = vld [vmem:[%s6188_s8 + $0x198] sm:$0xff] }
  0x93   : > { %9339 = vst [vmem:[#allocation14_spill] sm:$0xff] %v6671_v54 }
  0x94   : > { %2146 = vmatpush2.bf16.msra.mxu1 %v5708_v49  ;;  %2339 = vmatpush2.bf16.msra.mxu0 %v5711_v50  ;;  %v6665_v49 = vpack.c.bf16 %v362_v27, %v355_v26  ;;  %v6667_v50 = vpack.c.bf16 %v364_v34, %v357_v29  ;;  %v5726_v26 = vld [vmem:[%s9232_s1 + $0x88] ss:$16 sps:$4 sm:$0xff]   ;;  %v5731_v27 = vld [vmem:[%s9232_s1 + $0x6c] ss:$16 sps:$4 sm:$0xff]   ;;  %v6699_v29 = vpack.c.bf16 %v378_v4, %v371_v63  ;;  %v407_v63 = vld [vmem:[%s6188_s8 + $0x220] sm:$0xff] }
  0x95   : > { %2515 = vmatprep.subr.bf16.mxu1 %v5716_v5  ;;  %2694 = vmatprep.subr.bf16.mxu0 %v5719_v8  ;;  %v384_v5 = vld [vmem:[%s6188_s8 + $0x168] sm:$0xff]  ;;  %v391_v8 = vld [vmem:[%s6188_s8 + $0x1a0] sm:$0xff] }
  0x96   : > { %9336 = vst [vmem:[#allocation11_spill] sm:$0xff] %v6665_v49  ;;  %9337 = vst [vmem:[#allocation12_spill] sm:$0xff] %v6667_v50  ;;  %v6701_v34 = vpack.c.bf16 %v391_v8, %v384_v5  ;;  %v5732_v4 = vld [vmem:[%s9232_s1 + $0x48] ss:$16 sps:$4 sm:$0xff]   ;;  %v5737_v5 = vld [vmem:[%s9232_s1 + $0x2c] ss:$16 sps:$4 sm:$0xff]   ;;  %v6729_v8 = vpack.c.bf16 %v390_v40, %v383_v39 }
  0x97   : > { %2148 = vmatmul.mubr.bf16.vlgmr.msra.gmra.mxu1 %v6629_v9  ;;  %2341 = vmatmul.mubr.bf16.vlgmr.msra.gmra.mxu0 %v6631_v10  ;;  %9341 = vst [vmem:[#allocation16_spill] sm:$0xff] %v6699_v29  ;;  %v5740_v39 = vld [vmem:[%s9232_s1 + $0xc] ss:$16 sps:$4 sm:$0xff]  }
  0x98   : > { %2157 = vmatprep.mubr.bf16.mxu1 %v6634_v17  ;;  %2350 = vmatprep.mubr.bf16.mxu0 %v6636_v21  ;;  %9342 = vst [vmem:[#allocation17_spill] sm:$0xff] %v6701_v34  ;;  %9344 = vst [vmem:[#allocation19_spill] sm:$0xff] %v6729_v8  ;;  %v412_v40 = vld [vmem:[%s6188_s8 + $0x248] sm:$0xff] }
  0x99   : > { %2516 = vmatpush1.bf16.msra.mxu1 %v5714_v22  ;;  %2695 = vmatpush1.bf16.msra.mxu0 %v5717_v23  ;;  %v386_v22 = vld [vmem:[%s6188_s8 + $0x178] sm:$0xff]  ;;  %v393_v23 = vld [vmem:[%s6188_s8 + $0x1b0] sm:$0xff] }
  0x9a   : > { %2696 = vmatprep.subr.bf16.mxu0 %v5722_v28  ;;  %v6697_v28 = vpack.c.bf16 %v376_v61, %v369_v60  ;;  %v6703_v37 = vpack.c.bf16 %v393_v23, %v386_v22  ;;  %v398_v60 = vld [vmem:[%s6188_s8 + $0x1d8] sm:$0xff]  ;;  %v405_v61 = vld [vmem:[%s6188_s8 + $0x210] sm:$0xff] }
  0x9b   : > { %v6733_v23 = vpack.c.bf16 %v405_v61, %v398_v60  ;;  %v421_v60 = vld [vmem:[%s6188_s8 + $0x290] sm:$0xff]  ;;  %v5738_v61 = vld [vmem:[%s9232_s1 + $0x8] ss:$16 sps:$4 sm:$0xff]  }
  0x9c   : > { %9340 = vst [vmem:[#allocation15_spill] sm:$0xff] %v6697_v28  ;;  %9343 = vst [vmem:[#allocation18_spill] sm:$0xff] %v6703_v37 }
  0x9d   : > { %2697 = vmatpush1.bf16.msra.mxu0 %v5720_v41  ;;  %v5734_v41 = vld [vmem:[%s9232_s1 + $0x4c] ss:$16 sps:$4 sm:$0xff]   ;;  %9346 = vst [vmem:[#allocation21_spill] sm:$0xff] %v6733_v23 }
  0x9e   : > { %2698 = vmatprep.subr.bf16.mxu0 %v5725_v42  ;;  %v385_v42 = vld [vmem:[%s6188_s8 + $0x170] sm:$0xff] }
  0x9f   : > { %2158 = vmatmul.mubr.bf16.gmra.mxu1 %v6665_v49  ;;  %2351 = vmatmul.mubr.bf16.gmra.mxu0 %v6667_v50 }
  0xa0   : > { %2167 = vmatprep.mubr.bf16.mxu1 %v6669_v53  ;;  %2360 = vmatprep.mubr.bf16.mxu0 %v6671_v54 }
  0xa1   : > { %2699 = vmatpush1.bf16.msra.mxu0 %v5723_v59  ;;  %v392_v59 = vld [vmem:[%s6188_s8 + $0x1a8] sm:$0xff] }
  0xa2   : > { %2700 = vmatprep.subr.bf16.mxu0 %v5728_v62  ;;  %v400_v62 = vld [vmem:[%s6188_s8 + $0x1e8] sm:$0xff]  ;;  %v6731_v22 = vpack.c.bf16 %v392_v59, %v385_v42  ;;  %v419_v42 = vld [vmem:[%s6188_s8 + $0x280] sm:$0xff]  ;;  %v414_v59 = vld [vmem:[%s6188_s8 + $0x258] sm:$0xff] }
  0xa4   : > { %9345 = vst [vmem:[#allocation20_spill] sm:$0xff] %v6731_v22 }
  0xa5   : > { %2701 = vmatpush1.bf16.msra.mxu0 %v5726_v26  ;;  %v6735_v26 = vpack.c.bf16 %v407_v63, %v400_v62  ;;  %v5743_v62 = vld [vmem:[%s9232_s1 + $0x1ec] ss:$16 sps:$4 sm:$0xff]  }
  0xa6   : > { %2702 = vmatprep.subr.bf16.mxu0 %v5731_v27  ;;  %v5735_v27 = vld [vmem:[%s9232_s1 + $0x28] ss:$16 sps:$4 sm:$0xff]  }
  0xa7   : > { %2168 = vmatmul.mubr.bf16.gmra.mxu1 %v6697_v28  ;;  %2361 = vmatmul.mubr.bf16.gmra.mxu0 %v6699_v29  ;;  %9347 = vst [vmem:[#allocation22_spill] sm:$0xff] %v6735_v26 }
  0xa8   : > { %2177 = vmatprep.mubr.bf16.mxu1 %v6701_v34  ;;  %2370 = vmatprep.mubr.bf16.mxu0 %v6703_v37  ;;  %v406_v37 = vld [vmem:[%s6188_s8 + $0x218] sm:$0xff] }
  0xa9   : > { %2703 = vmatpush1.bf16.msra.mxu0 %v5729_v38  ;;  %v397_v38 = vld [vmem:[%s6188_s8 + $0x1d0] sm:$0xff] }
  0xaa   : > { %2704 = vmatprep.subr.bf16.mxu0 %v5734_v41  ;;  %v404_v41 = vld [vmem:[%s6188_s8 + $0x208] sm:$0xff] }
  0xab   : > { %v6761_v63 = vpack.c.bf16 %v404_v41, %v397_v38  ;;  %v418_v38 = vld [vmem:[%s6188_s8 + $0x278] sm:$0xff]  ;;  %v413_v41 = vld [vmem:[%s6188_s8 + $0x250] sm:$0xff] }
  0xad   : > { %2705 = vmatpush1.bf16.msra.mxu0 %v5732_v4  ;;  %9348 = vst [vmem:[#allocation23_spill] sm:$0xff] %v6761_v63  ;;  %v6763_v4 = vpack.c.bf16 %v406_v37, %v399_v11  ;;  %v426_v11 = vld [vmem:[%s6188_s8 + $0x2b8] sm:$0xff]  ;;  %v433_v37 = vld [vmem:[%s6188_s8 + $0x2f0] sm:$0xff] }
  0xae   : > { %2706 = vmatprep.subr.bf16.mxu0 %v5737_v5  ;;  %v6765_v5 = vpack.c.bf16 %v419_v42, %v412_v40  ;;  %v428_v40 = vld [vmem:[%s6188_s8 + $0x2c8] sm:$0xff]  ;;  %v435_v42 = vld [vmem:[%s6188_s8 + $0x300] sm:$0xff] }
  0xaf   : > { %2178 = vmatmul.mubr.bf16.gmra.mxu1 %v6729_v8  ;;  %2371 = vmatmul.mubr.bf16.gmra.mxu0 %v6731_v22  ;;  %9349 = vst [vmem:[#allocation24_spill] sm:$0xff] %v6763_v4  ;;  %v6767_v22 = vpack.c.bf16 %v421_v60, %v414_v59  ;;  %v5744_v59 = vld [vmem:[%s9232_s1 + $0x1c8] ss:$16 sps:$4 sm:$0xff]   ;;  %v5749_v60 = vld [vmem:[%s9232_s1 + $0x1ac] ss:$16 sps:$4 sm:$0xff]  }
  0xb0   : > { %2187 = vmatprep.mubr.bf16.mxu1 %v6733_v23  ;;  %2380 = vmatprep.mubr.bf16.mxu0 %v6735_v26  ;;  %9350 = vst [vmem:[#allocation25_spill] sm:$0xff] %v6765_v5  ;;  %v5741_v26 = vld [vmem:[%s9232_s1 + $0x1e8] ss:$16 sps:$4 sm:$0xff]  }
  0xb1   : > { %2707 = vmatpush1.bf16.msra.mxu0 %v5735_v27  ;;  %9351 = vst [vmem:[#allocation26_spill] sm:$0xff] %v6767_v22  ;;  %v5746_v27 = vld [vmem:[%s9232_s1 + $0x1cc] ss:$16 sps:$4 sm:$0xff]  }
  0xb2   : > { %2708 = vmatprep.subr.bf16.mxu0 %v5740_v39  ;;  %v411_v39 = vld [vmem:[%s6188_s8 + $0x240] sm:$0xff]  ;;  %v420_v23 = vld [vmem:[%s6188_s8 + $0x288] sm:$0xff] }
  0xb5   : > { %2709 = vmatpush1.bf16.msra.mxu0 %v5738_v61  ;;  %v6793_v61 = vpack.c.bf16 %v418_v38, %v411_v39  ;;  %v432_v39 = vld [vmem:[%s6188_s8 + $0x2e8] sm:$0xff]  ;;  %v427_v38 = vld [vmem:[%s6188_s8 + $0x2c0] sm:$0xff] }
  0xb6   : > { %2710 = vmatprep.subr.bf16.mxu0 %v5743_v62  ;;  %v6795_v62 = vpack.c.bf16 %v420_v23, %v413_v41  ;;  %v440_v23 = vld [vmem:[%s6188_s8 + $0x328] sm:$0xff]  ;;  %v447_v41 = vld [vmem:[%s6188_s8 + $0x360] sm:$0xff] }
  0xb7   : > { %2188 = vmatmul.mubr.bf16.gmra.mxu1 %v6761_v63  ;;  %2381 = vmatmul.mubr.bf16.gmra.mxu0 %v6763_v4  ;;  %9352 = vst [vmem:[#allocation27_spill] sm:$0xff] %v6793_v61  ;;  %v6797_v4 = vpack.c.bf16 %v433_v37, %v426_v11  ;;  %v6799_v63 = vpack.c.bf16 %v435_v42, %v428_v40  ;;  %v442_v11 = vld [vmem:[%s6188_s8 + $0x338] sm:$0xff]  ;;  %v449_v37 = vld [vmem:[%s6188_s8 + $0x370] sm:$0xff] }
  0xb8   : > { %2197 = vmatprep.mubr.bf16.mxu1 %v6765_v5  ;;  %2390 = vmatprep.mubr.bf16.mxu0 %v6767_v22  ;;  %9353 = vst [vmem:[#allocation28_spill] sm:$0xff] %v6795_v62  ;;  %v5747_v22 = vld [vmem:[%s9232_s1 + $0x1a8] ss:$16 sps:$4 sm:$0xff]   ;;  %v5755_v42 = vld [vmem:[%s9232_s1 + $0x16c] ss:$16 sps:$4 sm:$0xff]  }
  0xb9   : > { %2711 = vmatpush2.bf16.msra.mxu0 %v5741_v26  ;;  %9354 = vst [vmem:[#allocation29_spill] sm:$0xff] %v6797_v4  ;;  %9355 = vst [vmem:[#allocation30_spill] sm:$0xff] %v6799_v63  ;;  %v5752_v26 = vld [vmem:[%s9232_s1 + $0x18c] ss:$16 sps:$4 sm:$0xff]   ;;  %v5750_v40 = vld [vmem:[%s9232_s1 + $0x188] ss:$16 sps:$4 sm:$0xff]  }
  0xba   : > { %2712 = vmatprep.subr.bf16.mxu0 %v5746_v27  ;;  %v425_v27 = vld [vmem:[%s6188_s8 + $0x2b0] sm:$0xff]  ;;  %v434_v5 = vld [vmem:[%s6188_s8 + $0x2f8] sm:$0xff] }
  0xbd   : > { %2713 = vmatpush2.bf16.msra.mxu0 %v5744_v59  ;;  %v6825_v59 = vpack.c.bf16 %v432_v39, %v425_v27  ;;  %v446_v27 = vld [vmem:[%s6188_s8 + $0x358] sm:$0xff]  ;;  %v441_v39 = vld [vmem:[%s6188_s8 + $0x330] sm:$0xff] }
  0xbe   : > { %2714 = vmatprep.subr.bf16.mxu0 %v5749_v60  ;;  %v6827_v60 = vpack.c.bf16 %v434_v5, %v427_v38  ;;  %v454_v5 = vld [vmem:[%s6188_s8 + $0x398] sm:$0xff]  ;;  %v461_v38 = vld [vmem:[%s6188_s8 + $0x3d0] sm:$0xff] }
  0xbf   : > { %2198 = vmatmul.mubr.bf16.gmra.mxu1 %v6793_v61  ;;  %2391 = vmatmul.mubr.bf16.gmra.mxu0 %v6795_v62  ;;  %9356 = vst [vmem:[#allocation31_spill] sm:$0xff] %v6825_v59  ;;  %v6829_v62 = vpack.c.bf16 %v447_v41, %v440_v23  ;;  %v6831_v61 = vpack.c.bf16 %v449_v37, %v442_v11  ;;  %v456_v23 = vld [vmem:[%s6188_s8 + $0x3a8] sm:$0xff]  ;;  %v463_v41 = vld [vmem:[%s6188_s8 + $0x3e0] sm:$0xff] }
  0xc0   : > { %2207 = vmatprep.mubr.bf16.mxu1 %v6797_v4  ;;  %2400 = vmatprep.mubr.bf16.mxu0 %v6799_v63  ;;  %9357 = vst [vmem:[#allocation32_spill] sm:$0xff] %v6827_v60  ;;  %v5753_v63 = vld [vmem:[%s9232_s1 + $0x168] ss:$16 sps:$4 sm:$0xff]   ;;  %v5761_v37 = vld [vmem:[%s9232_s1 + $0x12c] ss:$16 sps:$4 sm:$0xff]  }
  0xc1   : > { %2715 = vmatpush2.bf16.msra.mxu0 %v5747_v22  ;;  %9358 = vst [vmem:[#allocation33_spill] sm:$0xff] %v6829_v62  ;;  %9359 = vst [vmem:[#allocation34_spill] sm:$0xff] %v6831_v61  ;;  %v5758_v22 = vld [vmem:[%s9232_s1 + $0x14c] ss:$16 sps:$4 sm:$0xff]   ;;  %v5756_v11 = vld [vmem:[%s9232_s1 + $0x148] ss:$16 sps:$4 sm:$0xff]  }
  0xc2   : > { %2716 = vmatprep.subr.bf16.mxu0 %v5752_v26  ;;  %v439_v26 = vld [vmem:[%s6188_s8 + $0x320] sm:$0xff]  ;;  %v448_v4 = vld [vmem:[%s6188_s8 + $0x368] sm:$0xff] }
  0xc5   : > { %2717 = vmatpush2.bf16.msra.mxu0 %v5750_v40  ;;  %v6857_v40 = vpack.c.bf16 %v446_v27, %v439_v26  ;;  %v460_v26 = vld [vmem:[%s6188_s8 + $0x3c8] sm:$0xff]  ;;  %v455_v27 = vld [vmem:[%s6188_s8 + $0x3a0] sm:$0xff] }
  0xc6   : > { %2718 = vmatprep.subr.bf16.mxu0 %v5755_v42  ;;  %v6859_v42 = vpack.c.bf16 %v448_v4, %v441_v39  ;;  %v468_v4 = vld [vmem:[%s6188_s8 + $0x408] sm:$0xff]  ;;  %v475_v39 = vld [vmem:[%s6188_s8 + $0x440] sm:$0xff] }
  0xc7   : > { %2208 = vmatmul.mubr.bf16.gmra.mxu1 %v6825_v59  ;;  %2401 = vmatmul.mubr.bf16.gmra.mxu0 %v6827_v60  ;;  %9360 = vst [vmem:[#allocation35_spill] sm:$0xff] %v6857_v40  ;;  %v6861_v60 = vpack.c.bf16 %v461_v38, %v454_v5  ;;  %v6863_v59 = vpack.c.bf16 %v463_v41, %v456_v23  ;;  %v470_v5 = vld [vmem:[%s6188_s8 + $0x418] sm:$0xff]  ;;  %v477_v38 = vld [vmem:[%s6188_s8 + $0x450] sm:$0xff] }
  0xc8   : > { %2217 = vmatprep.mubr.bf16.mxu1 %v6829_v62  ;;  %2410 = vmatprep.mubr.bf16.mxu0 %v6831_v61  ;;  %9361 = vst [vmem:[#allocation36_spill] sm:$0xff] %v6859_v42  ;;  %v5759_v61 = vld [vmem:[%s9232_s1 + $0x128] ss:$16 sps:$4 sm:$0xff]  }
  0xc9   : > { %2719 = vmatpush2.bf16.msra.mxu0 %v5753_v63  ;;  %9362 = vst [vmem:[#allocation37_spill] sm:$0xff] %v6861_v60  ;;  %9363 = vst [vmem:[#allocation38_spill] sm:$0xff] %v6863_v59  ;;  %v5764_v63 = vld [vmem:[%s9232_s1 + $0x10c] ss:$16 sps:$4 sm:$0xff]   ;;  %v5762_v23 = vld [vmem:[%s9232_s1 + $0x108] ss:$16 sps:$4 sm:$0xff]  }
  0xca   : > { %2720 = vmatprep.subr.bf16.mxu0 %v5758_v22  ;;  %v453_v22 = vld [vmem:[%s6188_s8 + $0x390] sm:$0xff]  ;;  %v462_v62 = vld [vmem:[%s6188_s8 + $0x3d8] sm:$0xff] }
  0xcb   : > { %v6886_v41 = vpack.c.bf16 %v460_v26, %v453_v22  ;;  %v474_v22 = vld [vmem:[%s6188_s8 + $0x438] sm:$0xff]  ;;  %v469_v26 = vld [vmem:[%s6188_s8 + $0x410] sm:$0xff] }
  0xcd   : > { %2721 = vmatpush2.bf16.msra.mxu0 %v5756_v11  ;;  %9364 = vst [vmem:[#allocation39_spill] sm:$0xff] %v6886_v41  ;;  %v6888_v11 = vpack.c.bf16 %v462_v62, %v455_v27  ;;  %v476_v62 = vld [vmem:[%s6188_s8 + $0x448] sm:$0xff]  ;;  %v482_v27 = vld [vmem:[%s6188_s8 + $0x478] sm:$0xff] }
  0xce   : > { %2722 = vmatprep.subr.bf16.mxu0 %v5761_v37  ;;  %v6890_v37 = vpack.c.bf16 %v475_v39, %v468_v4  ;;  %v489_v4 = vld [vmem:[%s6188_s8 + $0x4b0] sm:$0xff]  ;;  %v484_v39 = vld [vmem:[%s6188_s8 + $0x488] sm:$0xff] }
  0xcf   : > { %2218 = vmatmul.mubr.bf16.gmra.mxu1 %v6857_v40  ;;  %2411 = vmatmul.mubr.bf16.gmra.mxu0 %v6859_v42  ;;  %9365 = vst [vmem:[#allocation40_spill] sm:$0xff] %v6888_v11  ;;  %v6892_v42 = vpack.c.bf16 %v477_v38, %v470_v5  ;;  %v491_v5 = vld [vmem:[%s6188_s8 + $0x4c0] sm:$0xff]  ;;  %v490_v40 = vld [vmem:[%s6188_s8 + $0x4b8] sm:$0xff] }
  0xd0   : > { %2227 = vmatprep.mubr.bf16.mxu1 %v6861_v60  ;;  %2420 = vmatprep.mubr.bf16.mxu0 %v6863_v59  ;;  %9366 = vst [vmem:[#allocation41_spill] sm:$0xff] %v6890_v37  ;;  %v5767_v60 = vld [vmem:[%s9232_s1 + $0x2ec] ss:$16 sps:$4 sm:$0xff]   ;;  %v481_v59 = vld [vmem:[%s6188_s8 + $0x470] sm:$0xff] }
  0xd1   : > { %2723 = vmatpush2.bf16.msra.mxu0 %v5759_v61  ;;  %9367 = vst [vmem:[#allocation42_spill] sm:$0xff] %v6892_v42  ;;  %v5770_v61 = vld [vmem:[%s9232_s1 + $0x4ec] ss:$16 sps:$4 sm:$0xff]   ;;  %2887 = vmatprep.subr.bf16.mxu1 %v5767_v60 }
  0xd2   : > { %2724 = vmatprep.subr.bf16.mxu0 %v5764_v63  ;;  %v467_v63 = vld [vmem:[%s6188_s8 + $0x400] sm:$0xff]  ;;  %v496_v60 = vld [vmem:[%s6188_s8 + $0x4e8] sm:$0xff] }
  0xd3   : > { %v6912_v38 = vpack.c.bf16 %v474_v22, %v467_v63  ;;  %v498_v63 = vld [vmem:[%s6188_s8 + $0x4f8] sm:$0xff]  ;;  %v505_v22 = vld [vmem:[%s6188_s8 + $0x530] sm:$0xff] }
  0xd5   : > { %2725 = vmatpush2.bf16.msra.mxu0 %v5762_v23  ;;  %9368 = vst [vmem:[#allocation43_spill] sm:$0xff] %v6912_v38  ;;  %v6914_v23 = vpack.c.bf16 %v476_v62, %v469_v26 }
  0xd6   : > { %3080 = vmatprep.subr.bf16.mxu0 %v5770_v61  ;;  %v503_v61 = vld [vmem:[%s6188_s8 + $0x520] sm:$0xff] }
  0xd7   : > { %2228 = vmatmul.mubr.bf16.gmra.mxu1 %v6886_v41  ;;  %2421 = vmatmul.mubr.bf16.gmra.mxu0 %v6888_v11  ;;  %9369 = vst [vmem:[#allocation44_spill] sm:$0xff] %v6914_v23  ;;  %v6916_v11 = vpack.c.bf16 %v489_v4, %v482_v27  ;;  %v6918_v41 = vpack.c.bf16 %v491_v5, %v484_v39  ;;  %v495_v39 = vld [vmem:[%s6188_s8 + $0x4e0] sm:$0xff]  ;;  %v502_v5 = vld [vmem:[%s6188_s8 + $0x518] sm:$0xff] }
  0xd8   : > { %2237 = vmatprep.mubr.bf16.mxu1 %v6890_v37  ;;  %2430 = vmatprep.mubr.bf16.mxu0 %v6892_v42  ;;  %v488_v37 = vld [vmem:[%s6188_s8 + $0x4a8] sm:$0xff]  ;;  %v483_v42 = vld [vmem:[%s6188_s8 + $0x480] sm:$0xff]  ;;  %v6936_v27 = vpack.c.bf16 %v503_v61, %v496_v60  ;;  %v6938_v4 = vpack.c.bf16 %v505_v22, %v498_v63  ;;  %v6952_v60 = vpack.c.bf16 %v502_v5, %v495_v39 }
  0xd9   : > { %9370 = vst [vmem:[#allocation45_spill] sm:$0xff] %v6916_v11  ;;  %9371 = vst [vmem:[#allocation46_spill] sm:$0xff] %v6918_v41  ;;  %v6932_v26 = vpack.c.bf16 %v488_v37, %v481_v59  ;;  %v6934_v62 = vpack.c.bf16 %v490_v40, %v483_v42  ;;  %v510_v59 = vld [vmem:[%s6188_s8 + $0x558] sm:$0xff]  ;;  %v517_v40 = vld [vmem:[%s6188_s8 + $0x590] sm:$0xff] }
  0xda   : > { %9374 = vst [vmem:[#allocation49_spill] sm:$0xff] %v6936_v27  ;;  %9375 = vst [vmem:[#allocation50_spill] sm:$0xff] %v6938_v4  ;;  %v512_v42 = vld [vmem:[%s6188_s8 + $0x568] sm:$0xff]  ;;  %v519_v37 = vld [vmem:[%s6188_s8 + $0x5a0] sm:$0xff]  ;;  %v6956_v63 = vpack.c.bf16 %v517_v40, %v510_v59 }
  0xdb   : > { %9372 = vst [vmem:[#allocation47_spill] sm:$0xff] %v6932_v26  ;;  %9373 = vst [vmem:[#allocation48_spill] sm:$0xff] %v6934_v62  ;;  %v6958_v22 = vpack.c.bf16 %v519_v37, %v512_v42  ;;  %v531_v39 = vld [vmem:[%s6188_s8 + $0x600] sm:$0xff] }
  0xdc   : > { %9376 = vst [vmem:[#allocation51_spill] sm:$0xff] %v6952_v60  ;;  %9378 = vst [vmem:[#allocation53_spill] sm:$0xff] %v6956_v63  ;;  %v523_v37 = vld [vmem:[%s6188_s8 + $0x5c0] sm:$0xff] }
  0xdd   : > { %9379 = vst [vmem:[#allocation54_spill] sm:$0xff] %v6958_v22 }
  0xdf   : > { %2238 = vmatmul.mubr.bf16.gmra.mxu1 %v6912_v38  ;;  %2431 = vmatmul.mubr.bf16.gmra.mxu0 %v6914_v23  ;;  %v497_v23 = vld [vmem:[%s6188_s8 + $0x4f0] sm:$0xff]  ;;  %v518_v38 = vld [vmem:[%s6188_s8 + $0x598] sm:$0xff] }
  0xe0   : > { %2247 = vmatprep.mubr.bf16.mxu1 %v6916_v11  ;;  %2440 = vmatprep.mubr.bf16.mxu0 %v6918_v41  ;;  %v504_v11 = vld [vmem:[%s6188_s8 + $0x528] sm:$0xff]  ;;  %v511_v41 = vld [vmem:[%s6188_s8 + $0x560] sm:$0xff] }
  0xe1   : > { %v6954_v61 = vpack.c.bf16 %v504_v11, %v497_v23  ;;  %v526_v11 = vld [vmem:[%s6188_s8 + $0x5d8] sm:$0xff]  ;;  %v533_v23 = vld [vmem:[%s6188_s8 + $0x610] sm:$0xff]  ;;  %v6974_v59 = vpack.c.bf16 %v518_v38, %v511_v41  ;;  %v532_v41 = vld [vmem:[%s6188_s8 + $0x608] sm:$0xff] }
  0xe2   : > { %v6978_v42 = vpack.c.bf16 %v533_v23, %v526_v11  ;;  %v538_v38 = vld [vmem:[%s6188_s8 + $0x638] sm:$0xff] }
  0xe3   : > { %9377 = vst [vmem:[#allocation52_spill] sm:$0xff] %v6954_v61  ;;  %9381 = vst [vmem:[#allocation56_spill] sm:$0xff] %v6974_v59 }
  0xe4   : > { %9383 = vst [vmem:[#allocation58_spill] sm:$0xff] %v6978_v42 }
  0xe7   : > { %2248 = vmatmul.mubr.bf16.gmra.mxu1 %v6932_v26  ;;  %2441 = vmatmul.mubr.bf16.gmra.mxu0 %v6934_v62  ;;  %v509_v62 = vld [vmem:[%s6188_s8 + $0x550] sm:$0xff]  ;;  %v516_v26 = vld [vmem:[%s6188_s8 + $0x588] sm:$0xff] }
  0xe8   : > { %2257 = vmatprep.mubr.bf16.mxu1 %v6936_v27  ;;  %2450 = vmatprep.mubr.bf16.mxu0 %v6938_v4  ;;  %v524_v4 = vld [vmem:[%s6188_s8 + $0x5c8] sm:$0xff]  ;;  %v6972_v5 = vpack.c.bf16 %v516_v26, %v509_v62  ;;  %v525_v26 = vld [vmem:[%s6188_s8 + $0x5d0] sm:$0xff] }
  0xe9   : > { %v6976_v40 = vpack.c.bf16 %v531_v39, %v524_v4  ;;  %v545_v62 = vld [vmem:[%s6188_s8 + $0x670] sm:$0xff]  ;;  %v540_v4 = vld [vmem:[%s6188_s8 + $0x648] sm:$0xff]  ;;  %v547_v39 = vld [vmem:[%s6188_s8 + $0x680] sm:$0xff]  ;;  %v6994_v23 = vpack.c.bf16 %v532_v41, %v525_v26 }
  0xea   : > { %9380 = vst [vmem:[#allocation55_spill] sm:$0xff] %v6972_v5  ;;  %v552_v26 = vld [vmem:[%s6188_s8 + $0x6a8] sm:$0xff]  ;;  %v559_v41 = vld [vmem:[%s6188_s8 + $0x6e0] sm:$0xff] }
  0xeb   : > { %9382 = vst [vmem:[#allocation57_spill] sm:$0xff] %v6976_v40  ;;  %9385 = vst [vmem:[#allocation60_spill] sm:$0xff] %v6994_v23  ;;  %v5780_v27 = vld [vmem:[%s9232_s1 + $0x4a8] ss:$16 sps:$4 sm:$0xff]  }
  0xef   : > { %2258 = vmatmul.mubr.bf16.gmra.mxu1 %v6952_v60  ;;  %2451 = vmatmul.mubr.bf16.gmra.mxu0 %v6954_v61 }
  0xf0   : > { %2267 = vmatprep.mubr.bf16.mxu1 %v6956_v63  ;;  %2460 = vmatprep.mubr.bf16.mxu0 %v6958_v22  ;;  %v530_v22 = vld [vmem:[%s6188_s8 + $0x5f8] sm:$0xff] }
  0xf1   : > { %v6992_v11 = vpack.c.bf16 %v530_v22, %v523_v37  ;;  %v539_v22 = vld [vmem:[%s6188_s8 + $0x640] sm:$0xff]  ;;  %v546_v37 = vld [vmem:[%s6188_s8 + $0x678] sm:$0xff] }
  0xf3   : > { %9384 = vst [vmem:[#allocation59_spill] sm:$0xff] %v6992_v11 }
  0xf7   : > { %2268 = vmatmul.mubr.bf16.gmra.mxu1 %v6972_v5  ;;  %2461 = vmatmul.mubr.bf16.gmra.mxu0 %v6974_v59  ;;  %v6996_v59 = vpack.c.bf16 %v545_v62, %v538_v38  ;;  %v544_v5 = vld [vmem:[%s6188_s8 + $0x668] sm:$0xff]  ;;  %v554_v38 = vld [vmem:[%s6188_s8 + $0x6b8] sm:$0xff]  ;;  %v561_v62 = vld [vmem:[%s6188_s8 + $0x6f0] sm:$0xff] }
  0xf8   : > { %2277 = vmatprep.mubr.bf16.mxu1 %v6976_v40  ;;  %2470 = vmatprep.mubr.bf16.mxu0 %v6978_v42  ;;  %v6998_v40 = vpack.c.bf16 %v547_v39, %v540_v4  ;;  %v537_v42 = vld [vmem:[%s6188_s8 + $0x630] sm:$0xff]  ;;  %v7014_v39 = vpack.c.bf16 %v546_v37, %v539_v22  ;;  %v9285_v22 = vlaneseq }
  0xf9   : > { %9386 = vst [vmem:[#allocation61_spill] sm:$0xff] %v6996_v59  ;;  %v7012_v4 = vpack.c.bf16 %v544_v5, %v537_v42  ;;  %v553_v5 = vld [vmem:[%s6188_s8 + $0x6b0] sm:$0xff]  ;;  %v560_v42 = vld [vmem:[%s6188_s8 + $0x6e8] sm:$0xff] }
  0xfa   : > { %9387 = vst [vmem:[#allocation62_spill] sm:$0xff] %v6998_v40  ;;  %9389 = vst [vmem:[#allocation64_spill] sm:$0xff] %v7014_v39 }
  0xfb   : > { %9388 = vst [vmem:[#allocation63_spill] sm:$0xff] %v7012_v4 }
  0xff   : > { %2278 = vmatmul.mubr.bf16.gmra.mxu1 %v6992_v11  ;;  %2471 = vmatmul.mubr.bf16.gmra.mxu0 %v6994_v23  ;;  %v7016_v23 = vpack.c.bf16 %v559_v41, %v552_v26  ;;  %v7018_v11 = vpack.c.bf16 %v561_v62, %v554_v38  ;;  %v7030_v26 = vpack.c.bf16 %v560_v42, %v553_v5  ;;  %v7033_v41 = vshrl.u32 %v9285_v22, 7  ;;  %v5768_v22 = vld [vmem:[%s9232_s1 + $0x4e8] ss:$16 sps:$4 sm:$0xff]  }
 0x100   : > { %2287 = vmatprep.mubr.bf16.mxu1 %v6996_v59  ;;  %2480 = vmatprep.mubr.bf16.mxu0 %v6998_v40  ;;  %v551_v40 = vld [vmem:[%s6188_s8 + $0x6a0] sm:$0xff]  ;;  %v558_v59 = vld [vmem:[%s6188_s8 + $0x6d8] sm:$0xff]  ;;  %v9395_v38 = vmov 0  }
 0x101   : > { %9390 = vst [vmem:[#allocation65_spill] sm:$0xff] %v7016_v23  ;;  %9391 = vst [vmem:[#allocation66_spill] sm:$0xff] %v7018_v11  ;;  %v7028_v37 = vpack.c.bf16 %v558_v59, %v551_v40  ;;  %v7040_v62 = vsub.s32 0, %v7033_v41  ;;  %v871_v59 = vld [vmem:[%s9233_s2] sm:$0xf]  ;;  %v9292_v40 = vsub.s32 1, %v7033_v41 }
 0x102   : > { %9393 = vst [vmem:[#allocation68_spill] sm:$0xff] %v7030_v26  ;;  %9394 = vst [vmem:[#allocation69_spill] sm:$0xff] %v7033_v41 }
 0x103   : > { %9392 = vst [vmem:[#allocation67_spill] sm:$0xff] %v7028_v37  ;;  %9396 = vst [vmem:[#allocation70_spill] sm:$0xff] %v7040_v62  ;;  %v7051_v42 = vrot.slane %v871_v59, %v7040_v62 }
 0x107   : > { %2288 = vmatmul.mubr.bf16.gmra.mxu1 %v7012_v4  ;;  %2481 = vmatmul.mubr.bf16.gmra.mxu0 %v7014_v39 }
 0x108   : > { %2297 = vmatprep.mubr.bf16.mxu1 %v7016_v23  ;;  %2490 = vmatprep.mubr.bf16.mxu0 %v7018_v11  ;;  %v345_v11 = vld [vmem:[%s6188_s8 + $0x30] sm:$0xff]  ;;  %v352_v23 = vld [vmem:[%s6188_s8 + $0x68] sm:$0xff] }
 0x109   : > { %v7048_v5 = vpack.c.bf16 %v352_v23, %v345_v11  ;;  %v5773_v11 = vld [vmem:[%s9232_s1 + $0x2cc] ss:$16 sps:$4 sm:$0xff]  }
 0x10a   : > { %v5776_v23 = vld [vmem:[%s9232_s1 + $0x4cc] ss:$16 sps:$4 sm:$0xff]  }
 0x10b   : > { %9397 = vst [vmem:[#allocation71_spill] sm:$0xff] %v7048_v5 }
 0x10f   : > { %2298 = vmatmul.mubr.bf16.gmra.mxu1 %v7028_v37  ;;  %2491 = vmatmul.mubr.bf16.gmra.mxu0 %v7030_v26  ;;  %v7061_v26 = vrot.slane %v871_v59, %v9292_v40  ;;  %v359_v59 = vld [vmem:[%s6188_s8 + $0xa0] sm:$0xff]  ;;  %v366_v40 = vld [vmem:[%s6188_s8 + $0xd8] sm:$0xff] }
 0x110   : > { %2533 = vmatprep.mubr.bf16.mxu1 %v9395_v38  ;;  %2726 = vmatprep.mubr.bf16.mxu0 %v6198_v16  ;;  %v5765_v16 = vld [vmem:[%s9232_s1 + $0x2e8] ss:$16 sps:$4 sm:$0xff]   ;;  %v7100_v61 = vpack.c.bf16 %v366_v40, %v359_v59 }
 0x112   : > { %9400 = vst [vmem:[#allocation74_spill] sm:$0xff] %v7100_v61 }
 0x117   : > { %v7069_v62 = vpop.f32.mrf.mxu0  ;;  %v2036_v37 = vpop.f32.mrf.mxu1  ;;  %5244 = vmatmul.mubr.msk.bf16.vlgmr.msra.gmra.mxu1 %vm1873_vm0, %v7048_v5  ;;  %2727 = vmatmul.mubr.bf16.vlgmr.msra.gmra.mxu0 %v6274_v46  ;;  %v5771_v5 = vld [vmem:[%s9232_s1 + $0x2c8] ss:$16 sps:$4 sm:$0xff]  }
 0x118   : > { %v7075_v41 = vadd.f32 %v2036_v37, %v7051_v42  ;;  %2543 = vmatprep.mubr.bf16.mxu1 %v9395_v38  ;;  %2736 = vmatprep.mubr.bf16.mxu0 %v6299_v57  ;;  %v5774_v46 = vld [vmem:[%s9232_s1 + $0x4c8] ss:$16 sps:$4 sm:$0xff]   ;;  %v5779_v57 = vld [vmem:[%s9232_s1 + $0x2ac] ss:$16 sps:$4 sm:$0xff]  }
 0x119   : > { %v7081_v39 = vpop.f32.mrf.mxu0  ;;  %v2038_v4 = vpop.f32.mrf.mxu1  ;;  %2888 = vmatpush1.bf16.msra.mxu1 %v5765_v16  ;;  %3081 = vmatpush1.bf16.msra.mxu0 %v5768_v22  ;;  %v5782_v22 = vld [vmem:[%s9232_s1 + $0x4ac] ss:$16 sps:$4 sm:$0xff]  }
 0x11a   : > { %9398 = vst [vmem:[#allocation72_spill] sm:$0xff] %v7075_v41  ;;  %v7090_v37 = vadd.f32 %v2038_v4, %v7061_v26  ;;  %2889 = vmatprep.subr.bf16.mxu1 %v5773_v11  ;;  %3082 = vmatprep.subr.bf16.mxu0 %v5776_v23  ;;  %v5777_v23 = vld [vmem:[%s9232_s1 + $0x2a8] ss:$16 sps:$4 sm:$0xff]  }
 0x11b   : > { %v7098_v16 = vpop.f32.mrf.mxu0  ;;  %v2040_v63 = vpop.f32.mrf.mxu1 }
 0x11c   : > { %9399 = vst [vmem:[#allocation73_spill] sm:$0xff] %v7090_v37  ;;  %v7103_v60 = vadd.f32 %v2040_v63, %v7051_v42  ;;  %v5785_v63 = vld [vmem:[%s9232_s1 + $0x28c] ss:$16 sps:$4 sm:$0xff]  }
 0x11d   : > { %v7105_v4 = vpop.f32.mrf.mxu0  ;;  %v2042_v11 = vpop.f32.mrf.mxu1  ;;  %2890 = vmatpush1.bf16.msra.mxu1 %v5771_v5  ;;  %3083 = vmatpush1.bf16.msra.mxu0 %v5774_v46  ;;  %v5788_v5 = vld [vmem:[%s9232_s1 + $0x48c] ss:$16 sps:$4 sm:$0xff]  }
 0x11e   : > { %9401 = vst [vmem:[#allocation75_spill] sm:$0xff] %v7103_v60  ;;  %v7114_v40 = vadd.f32 %v2042_v11, %v7061_v26  ;;  %2891 = vmatprep.subr.bf16.mxu1 %v5779_v57  ;;  %3084 = vmatprep.subr.bf16.mxu0 %v5782_v22  ;;  %v373_v57 = vld [vmem:[%s6188_s8 + $0x110] sm:$0xff]  ;;  %v380_v22 = vld [vmem:[%s6188_s8 + $0x148] sm:$0xff] }
 0x11f   : > { %v7122_v59 = vpop.f32.mrf.mxu0  ;;  %v2046_v46 = vpop.f32.mrf.mxu1  ;;  %5245 = vmatmul.mubr.msk.bf16.gmra.mxu1 %vm1873_vm0, %v7100_v61  ;;  %2737 = vmatmul.mubr.bf16.gmra.mxu0 %v6318_v2  ;;  %v5783_v61 = vld [vmem:[%s9232_s1 + $0x288] ss:$16 sps:$4 sm:$0xff]   ;;  %v7153_v28 = vpack.c.bf16 %v380_v22, %v373_v57 }
 0x120   : > { %9402 = vst [vmem:[#allocation76_spill] sm:$0xff] %v7114_v40  ;;  %v7128_v11 = vadd.f32 %v2046_v46, %v7051_v42  ;;  %2553 = vmatprep.mubr.bf16.mxu1 %v9395_v38  ;;  %2746 = vmatprep.mubr.bf16.mxu0 %v6343_v13  ;;  %v5786_v2 = vld [vmem:[%s9232_s1 + $0x488] ss:$16 sps:$4 sm:$0xff]   ;;  %v5791_v13 = vld [vmem:[%s9232_s1 + $0x26c] ss:$16 sps:$4 sm:$0xff]  }
 0x121   : > { %v7134_v8 = vpop.f32.mrf.mxu0  ;;  %v2048_v34 = vpop.f32.mrf.mxu1  ;;  %2892 = vmatpush1.bf16.msra.mxu1 %v5777_v23  ;;  %3085 = vmatpush1.bf16.msra.mxu0 %v5780_v27  ;;  %v5794_v27 = vld [vmem:[%s9232_s1 + $0x46c] ss:$16 sps:$4 sm:$0xff]   ;;  %9405 = vst [vmem:[#allocation79_spill] sm:$0xff] %v7153_v28 }
 0x122   : > { %9403 = vst [vmem:[#allocation77_spill] sm:$0xff] %v7128_v11  ;;  %v7143_v46 = vadd.f32 %v2048_v34, %v7061_v26  ;;  %2893 = vmatprep.subr.bf16.mxu1 %v5785_v63  ;;  %3086 = vmatprep.subr.bf16.mxu0 %v5788_v5  ;;  %v5789_v5 = vld [vmem:[%s9232_s1 + $0x268] ss:$16 sps:$4 sm:$0xff]  }
 0x123   : > { %v7151_v23 = vpop.f32.mrf.mxu0  ;;  %v2050_v29 = vpop.f32.mrf.mxu1 }
 0x124   : > { %9404 = vst [vmem:[#allocation78_spill] sm:$0xff] %v7143_v46  ;;  %v7156_v54 = vadd.f32 %v2050_v29, %v7051_v42  ;;  %v5792_v46 = vld [vmem:[%s9232_s1 + $0x468] ss:$16 sps:$4 sm:$0xff]   ;;  %v5797_v29 = vld [vmem:[%s9232_s1 + $0x24c] ss:$16 sps:$4 sm:$0xff]  }
 0x125   : > { %v7158_v34 = vpop.f32.mrf.mxu0  ;;  %v2052_v63 = vpop.f32.mrf.mxu1  ;;  %2894 = vmatpush1.bf16.msra.mxu1 %v5783_v61  ;;  %3087 = vmatpush1.bf16.msra.mxu0 %v5786_v2  ;;  %v5800_v61 = vld [vmem:[%s9232_s1 + $0x44c] ss:$16 sps:$4 sm:$0xff]  }
 0x126   : > { %9406 = vst [vmem:[#allocation80_spill] sm:$0xff] %v7156_v54  ;;  %v7167_v57 = vadd.f32 %v2052_v63, %v7061_v26  ;;  %2895 = vmatprep.subr.bf16.mxu1 %v5791_v13  ;;  %3088 = vmatprep.subr.bf16.mxu0 %v5794_v27  ;;  %v387_v13 = vld [vmem:[%s6188_s8 + $0x180] sm:$0xff]  ;;  %v394_v27 = vld [vmem:[%s6188_s8 + $0x1b8] sm:$0xff] }
 0x127   : > { %v7175_v22 = vpop.f32.mrf.mxu0  ;;  %v2056_v2 = vpop.f32.mrf.mxu1  ;;  %5246 = vmatmul.mubr.msk.bf16.gmra.mxu1 %vm1873_vm0, %v7153_v28  ;;  %2747 = vmatmul.mubr.bf16.gmra.mxu0 %v6362_v24  ;;  %v5795_v28 = vld [vmem:[%s9232_s1 + $0x248] ss:$16 sps:$4 sm:$0xff]   ;;  %v7206_v53 = vpack.c.bf16 %v394_v27, %v387_v13 }
 0x128   : > { %9407 = vst [vmem:[#allocation81_spill] sm:$0xff] %v7167_v57  ;;  %v7181_v63 = vadd.f32 %v2056_v2, %v7051_v42  ;;  %2563 = vmatprep.mubr.bf16.mxu1 %v9395_v38  ;;  %2756 = vmatprep.mubr.bf16.mxu0 %v6387_v35  ;;  %v5798_v24 = vld [vmem:[%s9232_s1 + $0x448] ss:$16 sps:$4 sm:$0xff]   ;;  %v5803_v35 = vld [vmem:[%s9232_s1 + $0x22c] ss:$16 sps:$4 sm:$0xff]  }
 0x129   : > { %v7187_v57 = vpop.f32.mrf.mxu0  ;;  %v2058_v54 = vpop.f32.mrf.mxu1  ;;  %2896 = vmatpush1.bf16.msra.mxu1 %v5789_v5  ;;  %3089 = vmatpush1.bf16.msra.mxu0 %v5792_v46  ;;  %v5806_v46 = vld [vmem:[%s9232_s1 + $0x42c] ss:$16 sps:$4 sm:$0xff]   ;;  %9410 = vst [vmem:[#allocation84_spill] sm:$0xff] %v7206_v53 }
 0x12a   : > { %9408 = vst [vmem:[#allocation82_spill] sm:$0xff] %v7181_v63  ;;  %v7196_v2 = vadd.f32 %v2058_v54, %v7061_v26  ;;  %2897 = vmatprep.subr.bf16.mxu1 %v5797_v29  ;;  %3090 = vmatprep.subr.bf16.mxu0 %v5800_v61  ;;  %v5801_v61 = vld [vmem:[%s9232_s1 + $0x228] ss:$16 sps:$4 sm:$0xff]  }
 0x12b   : > { %v7204_v5 = vpop.f32.mrf.mxu0  ;;  %v2060_v63 = vpop.f32.mrf.mxu1 }
 0x12c   : > { %9409 = vst [vmem:[#allocation83_spill] sm:$0xff] %v7196_v2  ;;  %v7209_v11 = vadd.f32 %v2060_v63, %v7051_v42  ;;  %v5804_v2 = vld [vmem:[%s9232_s1 + $0x428] ss:$16 sps:$4 sm:$0xff]   ;;  %v5812_v63 = vld [vmem:[%s9232_s1 + $0x40c] ss:$16 sps:$4 sm:$0xff]  }
 0x12d   : > { %v7211_v54 = vpop.f32.mrf.mxu0  ;;  %v2062_v29 = vpop.f32.mrf.mxu1  ;;  %2898 = vmatpush1.bf16.msra.mxu1 %v5795_v28  ;;  %3091 = vmatpush1.bf16.msra.mxu0 %v5798_v24  ;;  %v5809_v28 = vld [vmem:[%s9232_s1 + $0x20c] ss:$16 sps:$4 sm:$0xff]  }
 0x12e   : > { %9411 = vst [vmem:[#allocation85_spill] sm:$0xff] %v7209_v11  ;;  %v7220_v13 = vadd.f32 %v2062_v29, %v7061_v26  ;;  %2899 = vmatprep.subr.bf16.mxu1 %v5803_v35  ;;  %3092 = vmatprep.subr.bf16.mxu0 %v5806_v46  ;;  %v401_v35 = vld [vmem:[%s6188_s8 + $0x1f0] sm:$0xff]  ;;  %v408_v46 = vld [vmem:[%s6188_s8 + $0x228] sm:$0xff] }
 0x12f   : > { %v7228_v27 = vpop.f32.mrf.mxu0  ;;  %v2066_v24 = vpop.f32.mrf.mxu1  ;;  %5247 = vmatmul.mubr.msk.bf16.gmra.mxu1 %vm1873_vm0, %v7206_v53  ;;  %2757 = vmatmul.mubr.bf16.gmra.mxu0 %v6406_v44  ;;  %v5807_v53 = vld [vmem:[%s9232_s1 + $0x208] ss:$16 sps:$4 sm:$0xff]   ;;  %v7259_v50 = vpack.c.bf16 %v408_v46, %v401_v35 }
 0x130   : > { %9412 = vst [vmem:[#allocation86_spill] sm:$0xff] %v7220_v13  ;;  %v7234_v29 = vadd.f32 %v2066_v24, %v7051_v42  ;;  %2573 = vmatprep.mubr.bf16.mxu1 %v9395_v38  ;;  %2766 = vmatprep.mubr.bf16.mxu0 %v6425_v55  ;;  %v5810_v44 = vld [vmem:[%s9232_s1 + $0x408] ss:$16 sps:$4 sm:$0xff]   ;;  %v5815_v55 = vld [vmem:[%s9232_s1 + $0x3ec] ss:$16 sps:$4 sm:$0xff]  }
 0x131   : > { %v7240_v13 = vpop.f32.mrf.mxu0  ;;  %v2068_v11 = vpop.f32.mrf.mxu1  ;;  %2900 = vmatpush1.bf16.msra.mxu1 %v5801_v61  ;;  %3093 = vmatpush1.bf16.msra.mxu0 %v5804_v2  ;;  %v5818_v2 = vld [vmem:[%s9232_s1 + $0x5ec] ss:$16 sps:$4 sm:$0xff]   ;;  %9415 = vst [vmem:[#allocation89_spill] sm:$0xff] %v7259_v50 }
 0x132   : > { %9413 = vst [vmem:[#allocation87_spill] sm:$0xff] %v7234_v29  ;;  %v7249_v24 = vadd.f32 %v2068_v11, %v7061_v26  ;;  %2901 = vmatprep.subr.bf16.mxu1 %v5809_v28  ;;  %3094 = vmatprep.subr.bf16.mxu0 %v5812_v63  ;;  %v5813_v63 = vld [vmem:[%s9232_s1 + $0x3e8] ss:$16 sps:$4 sm:$0xff]  }
 0x133   : > { %v7257_v61 = vpop.f32.mrf.mxu0  ;;  %v2070_v29 = vpop.f32.mrf.mxu1 }
 0x134   : > { %9414 = vst [vmem:[#allocation88_spill] sm:$0xff] %v7249_v24  ;;  %v7262_v49 = vadd.f32 %v2070_v29, %v7051_v42  ;;  %v5816_v24 = vld [vmem:[%s9232_s1 + $0x5e8] ss:$16 sps:$4 sm:$0xff]   ;;  %v5824_v29 = vld [vmem:[%s9232_s1 + $0x5cc] ss:$16 sps:$4 sm:$0xff]  }
 0x135   : > { %v7264_v11 = vpop.f32.mrf.mxu0  ;;  %v2072_v28 = vpop.f32.mrf.mxu1  ;;  %2902 = vmatpush1.bf16.msra.mxu1 %v5807_v53  ;;  %3095 = vmatpush1.bf16.msra.mxu0 %v5810_v44  ;;  %v5821_v53 = vld [vmem:[%s9232_s1 + $0x3cc] ss:$16 sps:$4 sm:$0xff]  }
 0x136   : > { %9416 = vst [vmem:[#allocation90_spill] sm:$0xff] %v7262_v49  ;;  %v7273_v35 = vadd.f32 %v2072_v28, %v7061_v26  ;;  %2903 = vmatprep.subr.bf16.mxu1 %v5815_v55  ;;  %3096 = vmatprep.subr.bf16.mxu0 %v5818_v2  ;;  %v415_v55 = vld [vmem:[%s6188_s8 + $0x260] sm:$0xff]  ;;  %v422_v2 = vld [vmem:[%s6188_s8 + $0x298] sm:$0xff] }
 0x137   : > { %v7281_v46 = vpop.f32.mrf.mxu0  ;;  %v2076_v44 = vpop.f32.mrf.mxu1  ;;  %5248 = vmatmul.mubr.msk.bf16.gmra.mxu1 %vm1873_vm0, %v7259_v50  ;;  %2767 = vmatmul.mubr.bf16.gmra.mxu0 %v6450_v6  ;;  %v5819_v50 = vld [vmem:[%s9232_s1 + $0x3c8] ss:$16 sps:$4 sm:$0xff]   ;;  %v7312_v40 = vpack.c.bf16 %v422_v2, %v415_v55 }
 0x138   : > { %9417 = vst [vmem:[#allocation91_spill] sm:$0xff] %v7273_v35  ;;  %v7287_v28 = vadd.f32 %v2076_v44, %v7051_v42  ;;  %2583 = vmatprep.mubr.bf16.mxu1 %v9395_v38  ;;  %2776 = vmatprep.mubr.bf16.mxu0 %v6469_v18  ;;  %v5822_v6 = vld [vmem:[%s9232_s1 + $0x5c8] ss:$16 sps:$4 sm:$0xff]   ;;  %v5827_v18 = vld [vmem:[%s9232_s1 + $0x3ac] ss:$16 sps:$4 sm:$0xff]  }
 0x139   : > { %v7293_v35 = vpop.f32.mrf.mxu0  ;;  %v2078_v49 = vpop.f32.mrf.mxu1  ;;  %2904 = vmatpush2.bf16.msra.mxu1 %v5813_v63  ;;  %3097 = vmatpush2.bf16.msra.mxu0 %v5816_v24  ;;  %v5830_v24 = vld [vmem:[%s9232_s1 + $0x5ac] ss:$16 sps:$4 sm:$0xff]   ;;  %9420 = vst [vmem:[#allocation94_spill] sm:$0xff] %v7312_v40 }
 0x13a   : > { %9418 = vst [vmem:[#allocation92_spill] sm:$0xff] %v7287_v28  ;;  %v7302_v44 = vadd.f32 %v2078_v49, %v7061_v26  ;;  %2905 = vmatprep.subr.bf16.mxu1 %v5821_v53  ;;  %3098 = vmatprep.subr.bf16.mxu0 %v5824_v29  ;;  %v5825_v29 = vld [vmem:[%s9232_s1 + $0x3a8] ss:$16 sps:$4 sm:$0xff]  }
 0x13b   : > { %v7310_v63 = vpop.f32.mrf.mxu0  ;;  %v2080_v28 = vpop.f32.mrf.mxu1 }
 0x13c   : > { %9419 = vst [vmem:[#allocation93_spill] sm:$0xff] %v7302_v44  ;;  %v7315_v60 = vadd.f32 %v2080_v28, %v7051_v42  ;;  %v5828_v44 = vld [vmem:[%s9232_s1 + $0x5a8] ss:$16 sps:$4 sm:$0xff]   ;;  %v5836_v28 = vld [vmem:[%s9232_s1 + $0x58c] ss:$16 sps:$4 sm:$0xff]  }
 0x13d   : > { %v7317_v49 = vpop.f32.mrf.mxu0  ;;  %v2082_v53 = vpop.f32.mrf.mxu1  ;;  %2906 = vmatpush2.bf16.msra.mxu1 %v5819_v50  ;;  %3099 = vmatpush2.bf16.msra.mxu0 %v5822_v6  ;;  %v5833_v50 = vld [vmem:[%s9232_s1 + $0x38c] ss:$16 sps:$4 sm:$0xff]  }
 0x13e   : > { %9421 = vst [vmem:[#allocation95_spill] sm:$0xff] %v7315_v60  ;;  %v7326_v55 = vadd.f32 %v2082_v53, %v7061_v26  ;;  %2907 = vmatprep.subr.bf16.mxu1 %v5827_v18  ;;  %3100 = vmatprep.subr.bf16.mxu0 %v5830_v24  ;;  %v429_v18 = vld [vmem:[%s6188_s8 + $0x2d0] sm:$0xff]  ;;  %v436_v24 = vld [vmem:[%s6188_s8 + $0x308] sm:$0xff] }
 0x13f   : > { %v7334_v2 = vpop.f32.mrf.mxu0  ;;  %v2086_v6 = vpop.f32.mrf.mxu1  ;;  %5249 = vmatmul.mubr.msk.bf16.gmra.mxu1 %vm1873_vm0, %v7312_v40  ;;  %2777 = vmatmul.mubr.bf16.gmra.mxu0 %v6494_v32  ;;  %v5831_v40 = vld [vmem:[%s9232_s1 + $0x388] ss:$16 sps:$4 sm:$0xff]   ;;  %v7365_v37 = vpack.c.bf16 %v436_v24, %v429_v18 }
 0x140   : > { %9422 = vst [vmem:[#allocation96_spill] sm:$0xff] %v7326_v55  ;;  %v7340_v53 = vadd.f32 %v2086_v6, %v7051_v42  ;;  %2593 = vmatprep.mubr.bf16.mxu1 %v9395_v38  ;;  %2786 = vmatprep.mubr.bf16.mxu0 %v6513_v43  ;;  %v5834_v32 = vld [vmem:[%s9232_s1 + $0x588] ss:$16 sps:$4 sm:$0xff]   ;;  %v5839_v43 = vld [vmem:[%s9232_s1 + $0x36c] ss:$16 sps:$4 sm:$0xff]  }
 0x141   : > { %v7346_v55 = vpop.f32.mrf.mxu0  ;;  %v2088_v60 = vpop.f32.mrf.mxu1  ;;  %2908 = vmatpush2.bf16.msra.mxu1 %v5825_v29  ;;  %3101 = vmatpush2.bf16.msra.mxu0 %v5828_v44  ;;  %v5842_v44 = vld [vmem:[%s9232_s1 + $0x56c] ss:$16 sps:$4 sm:$0xff]   ;;  %9425 = vst [vmem:[#allocation99_spill] sm:$0xff] %v7365_v37 }
 0x142   : > { %9423 = vst [vmem:[#allocation97_spill] sm:$0xff] %v7340_v53  ;;  %v7355_v6 = vadd.f32 %v2088_v60, %v7061_v26  ;;  %2909 = vmatprep.subr.bf16.mxu1 %v5833_v50  ;;  %3102 = vmatprep.subr.bf16.mxu0 %v5836_v28  ;;  %v5837_v28 = vld [vmem:[%s9232_s1 + $0x368] ss:$16 sps:$4 sm:$0xff]  }
 0x143   : > { %v7363_v29 = vpop.f32.mrf.mxu0  ;;  %v2090_v53 = vpop.f32.mrf.mxu1 }
 0x144   : > { %9424 = vst [vmem:[#allocation98_spill] sm:$0xff] %v7355_v6  ;;  %v7368_v21 = vadd.f32 %v2090_v53, %v7051_v42  ;;  %v5840_v6 = vld [vmem:[%s9232_s1 + $0x568] ss:$16 sps:$4 sm:$0xff]   ;;  %v5848_v53 = vld [vmem:[%s9232_s1 + $0x54c] ss:$16 sps:$4 sm:$0xff]  }
 0x145   : > { %v7370_v60 = vpop.f32.mrf.mxu0  ;;  %v2092_v50 = vpop.f32.mrf.mxu1  ;;  %2910 = vmatpush2.bf16.msra.mxu1 %v5831_v40  ;;  %3103 = vmatpush2.bf16.msra.mxu0 %v5834_v32  ;;  %v5845_v40 = vld [vmem:[%s9232_s1 + $0x34c] ss:$16 sps:$4 sm:$0xff]  }
 0x146   : > { %9426 = vst [vmem:[#allocation100_spill] sm:$0xff] %v7368_v21  ;;  %v7379_v18 = vadd.f32 %v2092_v50, %v7061_v26  ;;  %2911 = vmatprep.subr.bf16.mxu1 %v5839_v43  ;;  %3104 = vmatprep.subr.bf16.mxu0 %v5842_v44  ;;  %v443_v43 = vld [vmem:[%s6188_s8 + $0x340] sm:$0xff]  ;;  %v450_v44 = vld [vmem:[%s6188_s8 + $0x378] sm:$0xff] }
 0x147   : > { %v7387_v24 = vpop.f32.mrf.mxu0  ;;  %v2096_v32 = vpop.f32.mrf.mxu1  ;;  %5250 = vmatmul.mubr.msk.bf16.gmra.mxu1 %vm1873_vm0, %v7365_v37  ;;  %2787 = vmatmul.mubr.bf16.gmra.mxu0 %v6542_v0  ;;  %v5843_v37 = vld [vmem:[%s9232_s1 + $0x348] ss:$16 sps:$4 sm:$0xff]   ;;  %v7418_v17 = vpack.c.bf16 %v450_v44, %v443_v43 }
 0x148   : > { %9427 = vst [vmem:[#allocation101_spill] sm:$0xff] %v7379_v18  ;;  %v7393_v50 = vadd.f32 %v2096_v32, %v7051_v42  ;;  %2603 = vmatprep.mubr.bf16.mxu1 %v9395_v38  ;;  %2796 = vmatprep.mubr.bf16.mxu0 %v6560_v12  ;;  %v5846_v0 = vld [vmem:[%s9232_s1 + $0x548] ss:$16 sps:$4 sm:$0xff]   ;;  %v5851_v12 = vld [vmem:[%s9232_s1 + $0x32c] ss:$16 sps:$4 sm:$0xff]  }
 0x149   : > { %v7399_v18 = vpop.f32.mrf.mxu0  ;;  %v2098_v21 = vpop.f32.mrf.mxu1  ;;  %2912 = vmatpush2.bf16.msra.mxu1 %v5837_v28  ;;  %3105 = vmatpush2.bf16.msra.mxu0 %v5840_v6  ;;  %v5854_v6 = vld [vmem:[%s9232_s1 + $0x52c] ss:$16 sps:$4 sm:$0xff]   ;;  %9430 = vst [vmem:[#allocation104_spill] sm:$0xff] %v7418_v17 }
 0x14a   : > { %9428 = vst [vmem:[#allocation102_spill] sm:$0xff] %v7393_v50  ;;  %v7408_v32 = vadd.f32 %v2098_v21, %v7061_v26  ;;  %2913 = vmatprep.subr.bf16.mxu1 %v5845_v40  ;;  %3106 = vmatprep.subr.bf16.mxu0 %v5848_v53  ;;  %v5849_v53 = vld [vmem:[%s9232_s1 + $0x328] ss:$16 sps:$4 sm:$0xff]  }
 0x14b   : > { %v7416_v28 = vpop.f32.mrf.mxu0  ;;  %v2100_v50 = vpop.f32.mrf.mxu1 }
 0x14c   : > { %9429 = vst [vmem:[#allocation103_spill] sm:$0xff] %v7408_v32  ;;  %v7421_v41 = vadd.f32 %v2100_v50, %v7051_v42  ;;  %v5852_v32 = vld [vmem:[%s9232_s1 + $0x528] ss:$16 sps:$4 sm:$0xff]   ;;  %v5860_v50 = vld [vmem:[%s9232_s1 + $0x50c] ss:$16 sps:$4 sm:$0xff]  }
 0x14d   : > { %v7423_v21 = vpop.f32.mrf.mxu0  ;;  %v2102_v40 = vpop.f32.mrf.mxu1  ;;  %2914 = vmatpush2.bf16.msra.mxu1 %v5843_v37  ;;  %3107 = vmatpush2.bf16.msra.mxu0 %v5846_v0  ;;  %v5857_v37 = vld [vmem:[%s9232_s1 + $0x30c] ss:$16 sps:$4 sm:$0xff]  }
 0x14e   : > { %9431 = vst [vmem:[#allocation105_spill] sm:$0xff] %v7421_v41  ;;  %v7432_v43 = vadd.f32 %v2102_v40, %v7061_v26  ;;  %2915 = vmatprep.subr.bf16.mxu1 %v5851_v12  ;;  %3108 = vmatprep.subr.bf16.mxu0 %v5854_v6  ;;  %v457_v12 = vld [vmem:[%s6188_s8 + $0x3b0] sm:$0xff]  ;;  %v464_v6 = vld [vmem:[%s6188_s8 + $0x3e8] sm:$0xff] }
 0x14f   : > { %v7440_v44 = vpop.f32.mrf.mxu0  ;;  %v2106_v0 = vpop.f32.mrf.mxu1  ;;  %5251 = vmatmul.mubr.msk.bf16.gmra.mxu1 %vm1873_vm0, %v7418_v17  ;;  %2797 = vmatmul.mubr.bf16.gmra.mxu0 %v6582_v30  ;;  %v5855_v17 = vld [vmem:[%s9232_s1 + $0x308] ss:$16 sps:$4 sm:$0xff]   ;;  %v7465_v10 = vpack.c.bf16 %v464_v6, %v457_v12  ;;  %v471_v6 = vld [vmem:[%s6188_s8 + $0x420] sm:$0xff] }
 0x150   : > { %9432 = vst [vmem:[#allocation106_spill] sm:$0xff] %v7432_v43  ;;  %v7446_v40 = vadd.f32 %v2106_v0, %v7051_v42  ;;  %2613 = vmatprep.mubr.bf16.mxu1 %v9395_v38  ;;  %2806 = vmatprep.mubr.bf16.mxu0 %v6205_v20  ;;  %v5858_v30 = vld [vmem:[%s9232_s1 + $0x508] ss:$16 sps:$4 sm:$0xff]  }
 0x151   : > { %v7452_v43 = vpop.f32.mrf.mxu0  ;;  %v2108_v41 = vpop.f32.mrf.mxu1  ;;  %2916 = vmatpush2.bf16.msra.mxu1 %v5849_v53  ;;  %3109 = vmatpush2.bf16.msra.mxu0 %v5852_v32  ;;  %9435 = vst [vmem:[#allocation109_spill] sm:$0xff] %v7465_v10  ;;  %v1957_v32 = vadd.f32 %v7069_v62, %v7051_v42 }
 0x152   : > { %9433 = vst [vmem:[#allocation107_spill] sm:$0xff] %v7446_v40  ;;  %v7461_v0 = vadd.f32 %v2108_v41, %v7061_v26  ;;  %2917 = vmatprep.subr.bf16.mxu1 %v5857_v37  ;;  %3110 = vmatprep.subr.bf16.mxu0 %v5860_v50  ;;  %v5866_v41 = vld [vmem:[%s9234_s3 + $0x74] ss:$8 sps:$4 sm:$0xff]   ;;  %v1959_v37 = vadd.f32 %v7081_v39, %v7061_v26 }
 0x153   : > { %v7463_v20 = vpop.f32.mrf.mxu0  ;;  %v2110_v40 = vpop.f32.mrf.mxu1  ;;  %v478_v39 = vld [vmem:[%s6188_s8 + $0x458] sm:$0xff] }
 0x154   : > { %9434 = vst [vmem:[#allocation108_spill] sm:$0xff] %v7461_v0  ;;  %v7470_v53 = vadd.f32 %v2110_v40, %v7051_v42 }
 0x155   : > { %v7472_v9 = vpop.f32.mrf.mxu0  ;;  %v2112_v52 = vpop.f32.mrf.mxu1  ;;  %2918 = vmatpush2.bf16.msra.mxu1 %v5855_v17  ;;  %3111 = vmatpush2.bf16.msra.mxu0 %v5858_v30  ;;  %v1961_v17 = vadd.f32 %v7098_v16, %v7051_v42 }
 0x156   : > { %9436 = vst [vmem:[#allocation110_spill] sm:$0xff] %v7470_v53  ;;  %v7480_v50 = vadd.f32 %v2112_v52, %v7061_v26  ;;  %4054 = vmatprep.subr.bf16.mxu0 %v5866_v41 }
 0x157   : > { %v2149_v62 = vpop.f32.mrf.mxu1  ;;  %v2342_v40 = vpop.f32.mrf.mxu0  ;;  %5252 = vmatmul.mubr.msk.bf16.gmra.mxu1 %vm1873_vm0, %v7465_v10  ;;  %2807 = vmatmul.mubr.bf16.gmra.mxu0 %v6276_v47  ;;  %v5863_v47 = vld [vmem:[%s9232_s1 + $0x60c] ss:$16 sps:$4 sm:$0xff]  }
 0x158   : > { %9437 = vst [vmem:[#allocation111_spill] sm:$0xff] %v7480_v50  ;;  %v2150_v12 = vadd.f32 %v2149_v62, %v1957_v32  ;;  %2623 = vmatprep.mubr.bf16.mxu1 %v9395_v38  ;;  %2816 = vmatprep.mubr.bf16.mxu0 %v6301_v58  ;;  %v1963_v50 = vadd.f32 %v7105_v4, %v7061_v26 }
 0x159   : > { %v2151_v30 = vpop.f32.mrf.mxu1  ;;  %v2344_v52 = vpop.f32.mrf.mxu0  ;;  %v7498_v62 = vpack.c.bf16 %v478_v39, %v471_v6  ;;  %v1967_v58 = vadd.f32 %v7122_v59, %v7051_v42  ;;  %3287 = vmatprep.subr.bf16.mxu1 %v5863_v47  ;;  %v492_v39 = vld [vmem:[%s6188_s8 + $0x4c8] sm:$0xff]  ;;  %v1973_v47 = vadd.f32 %v7158_v34, %v7061_v26  ;;  %v1979_v34 = vadd.f32 %v7187_v57, %v7061_v26  ;;  %v499_v57 = vld [vmem:[%s6188_s8 + $0x500] sm:$0xff] }
 0x15a   : > { %v7493_v53 = vadd.f32 %v2342_v40, %v2150_v12  ;;  %v2152_v10 = vadd.f32 %v2151_v30, %v1959_v37  ;;  %v1969_v37 = vadd.f32 %v7134_v8, %v7061_v26  ;;  %v485_v8 = vld [vmem:[%s6188_s8 + $0x490] sm:$0xff] }
 0x15b   : > { %v2153_v16 = vpop.f32.mrf.mxu1  ;;  %v2346_v32 = vpop.f32.mrf.mxu0  ;;  %9439 = vst [vmem:[#allocation113_spill] sm:$0xff] %v7498_v62 }
 0x15c   : > { %9438 = vst [vmem:[#allocation112_spill] sm:$0xff] %v7493_v53  ;;  %v7502_v0 = vadd.f32 %v2344_v52, %v2152_v10  ;;  %v2154_v41 = vadd.f32 %v2153_v16, %v1961_v17  ;;  %v1971_v10 = vadd.f32 %v7151_v23, %v7051_v42  ;;  %v7523_v23 = vpack.c.bf16 %v492_v39, %v485_v8  ;;  %v506_v39 = vld [vmem:[%s6188_s8 + $0x538] sm:$0xff] }
 0x15d   : > { %v2155_v4 = vpop.f32.mrf.mxu1  ;;  %v2348_v40 = vpop.f32.mrf.mxu0 }
 0x15e   : > { %v7506_v12 = vadd.f32 %v2346_v32, %v2154_v41  ;;  %v2156_v30 = vadd.f32 %v2155_v4, %v1963_v50  ;;  %9440 = vst [vmem:[#allocation114_spill] sm:$0xff] %v7523_v23 }
 0x15f   : > { %v2159_v53 = vpop.f32.mrf.mxu1  ;;  %v2352_v6 = vpop.f32.mrf.mxu0  ;;  %5253 = vmatmul.mubr.msk.bf16.gmra.mxu1 %vm1873_vm0, %v7498_v62  ;;  %2817 = vmatmul.mubr.bf16.gmra.mxu0 %v6320_v3  ;;  %v9487_v62 = vld [vmem:[#allocation25_spill] sm:$0xff] }
 0x160   : > { %v7513_v59 = vadd.f32 %v2348_v40, %v2156_v30  ;;  %v2160_v17 = vadd.f32 %v2159_v53, %v1967_v58  ;;  %2633 = vmatprep.mubr.bf16.mxu1 %v9395_v38  ;;  %2826 = vmatprep.mubr.bf16.mxu0 %v6345_v14  ;;  %v1977_v53 = vadd.f32 %v7175_v22, %v7051_v42 }
 0x161   : > { %v2161_v50 = vpop.f32.mrf.mxu1  ;;  %v2354_v52 = vpop.f32.mrf.mxu0  ;;  %v1981_v22 = vadd.f32 %v7204_v5, %v7051_v42  ;;  %v7548_v5 = vpack.c.bf16 %v506_v39, %v499_v57  ;;  %v520_v57 = vld [vmem:[%s6188_s8 + $0x5a8] sm:$0xff] }
 0x162   : > { %v7521_v16 = vadd.f32 %v2352_v6, %v2160_v17  ;;  %v2162_v3 = vadd.f32 %v2161_v50, %v1969_v37 }
 0x163   : > { %v2163_v32 = vpop.f32.mrf.mxu1  ;;  %v2356_v41 = vpop.f32.mrf.mxu0  ;;  %9441 = vst [vmem:[#allocation115_spill] sm:$0xff] %v7548_v5 }
 0x164   : > { %v7527_v58 = vadd.f32 %v2354_v52, %v2162_v3  ;;  %v2164_v14 = vadd.f32 %v2163_v32, %v1971_v10 }
 0x165   : > { %v2165_v4 = vpop.f32.mrf.mxu1  ;;  %v2358_v40 = vpop.f32.mrf.mxu0 }
 0x166   : > { %v7531_v30 = vadd.f32 %v2356_v41, %v2164_v14  ;;  %v2166_v37 = vadd.f32 %v2165_v4, %v1973_v47  ;;  %v1983_v47 = vadd.f32 %v7211_v54, %v7061_v26  ;;  %v1989_v54 = vadd.f32 %v7240_v13, %v7061_v26  ;;  %v513_v13 = vld [vmem:[%s6188_s8 + $0x570] sm:$0xff] }
 0x167   : > { %v2169_v6 = vpop.f32.mrf.mxu1  ;;  %v2362_v17 = vpop.f32.mrf.mxu0  ;;  %5254 = vmatmul.mubr.msk.bf16.gmra.mxu1 %vm1873_vm0, %v7523_v23  ;;  %2827 = vmatmul.mubr.bf16.gmra.mxu0 %v6364_v25 }
 0x168   : > { %v7538_v10 = vadd.f32 %v2358_v40, %v2166_v37  ;;  %v2170_v8 = vadd.f32 %v2169_v6, %v1977_v53  ;;  %2643 = vmatprep.mubr.bf16.mxu1 %v9395_v38  ;;  %2836 = vmatprep.mubr.bf16.mxu0 %v6389_v36  ;;  %v1987_v53 = vadd.f32 %v7228_v27, %v7051_v42 }
 0x169   : > { %v2171_v50 = vpop.f32.mrf.mxu1  ;;  %v2364_v52 = vpop.f32.mrf.mxu0  ;;  %v1991_v27 = vadd.f32 %v7257_v61, %v7051_v42  ;;  %v7573_v61 = vpack.c.bf16 %v520_v57, %v513_v13 }
 0x16a   : > { %v7546_v3 = vadd.f32 %v2362_v17, %v2170_v8  ;;  %v2172_v25 = vadd.f32 %v2171_v50, %v1979_v34 }
 0x16b   : > { %v2173_v32 = vpop.f32.mrf.mxu1  ;;  %v2366_v41 = vpop.f32.mrf.mxu0  ;;  %9442 = vst [vmem:[#allocation116_spill] sm:$0xff] %v7573_v61 }
 0x16c   : > { %v7552_v14 = vadd.f32 %v2364_v52, %v2172_v25  ;;  %v2174_v36 = vadd.f32 %v2173_v32, %v1981_v22  ;;  %v1993_v52 = vadd.f32 %v7264_v11, %v7061_v26  ;;  %v1999_v11 = vadd.f32 %v7293_v35, %v7061_v26  ;;  %v527_v35 = vld [vmem:[%s6188_s8 + $0x5e0] sm:$0xff] }
 0x16d   : > { %v2175_v4 = vpop.f32.mrf.mxu1  ;;  %v2368_v40 = vpop.f32.mrf.mxu0 }
 0x16e   : > { %v7556_v37 = vadd.f32 %v2366_v41, %v2174_v36  ;;  %v2176_v34 = vadd.f32 %v2175_v4, %v1983_v47  ;;  %v1997_v41 = vadd.f32 %v7281_v46, %v7051_v42  ;;  %v2001_v46 = vadd.f32 %v7310_v63, %v7051_v42 }
 0x16f   : > { %v2179_v6 = vpop.f32.mrf.mxu1  ;;  %v2372_v17 = vpop.f32.mrf.mxu0  ;;  %5255 = vmatmul.mubr.msk.bf16.gmra.mxu1 %vm1873_vm0, %v7548_v5  ;;  %2837 = vmatmul.mubr.bf16.gmra.mxu0 %v6408_v45  ;;  %v9483_v5 = vld [vmem:[#allocation23_spill] sm:$0xff] }
 0x170   : > { %v7563_v22 = vadd.f32 %v2368_v40, %v2176_v34  ;;  %v2180_v8 = vadd.f32 %v2179_v6, %v1987_v53  ;;  %2653 = vmatprep.mubr.bf16.mxu1 %v9395_v38  ;;  %2846 = vmatprep.mubr.bf16.mxu0 %v6427_v56 }
 0x171   : > { %v2181_v39 = vpop.f32.mrf.mxu1  ;;  %v2374_v50 = vpop.f32.mrf.mxu0 }
 0x172   : > { %v7571_v47 = vadd.f32 %v2372_v17, %v2180_v8  ;;  %v2182_v45 = vadd.f32 %v2181_v39, %v1989_v54  ;;  %v534_v8 = vld [vmem:[%s6188_s8 + $0x618] sm:$0xff]  ;;  %v2003_v39 = vadd.f32 %v7317_v49, %v7061_v26  ;;  %v2009_v49 = vadd.f32 %v7346_v55, %v7061_v26  ;;  %v541_v55 = vld [vmem:[%s6188_s8 + $0x650] sm:$0xff] }
 0x173   : > { %v2183_v25 = vpop.f32.mrf.mxu1  ;;  %v2376_v32 = vpop.f32.mrf.mxu0  ;;  %v7598_v63 = vpack.c.bf16 %v534_v8, %v527_v35  ;;  %v2013_v8 = vadd.f32 %v7370_v60, %v7061_v26  ;;  %v2019_v60 = vadd.f32 %v7399_v18, %v7061_v26  ;;  %v555_v18 = vld [vmem:[%s6188_s8 + $0x6c0] sm:$0xff] }
 0x174   : > { %v7577_v53 = vadd.f32 %v2374_v50, %v2182_v45  ;;  %v2184_v56 = vadd.f32 %v2183_v25, %v1991_v27  ;;  %v2007_v25 = vadd.f32 %v7334_v2, %v7051_v42  ;;  %v2011_v2 = vadd.f32 %v7363_v29, %v7051_v42 }
 0x175   : > { %v2185_v36 = vpop.f32.mrf.mxu1  ;;  %v2378_v4 = vpop.f32.mrf.mxu0  ;;  %9443 = vst [vmem:[#allocation117_spill] sm:$0xff] %v7598_v63 }
 0x176   : > { %v7581_v40 = vadd.f32 %v2376_v32, %v2184_v56  ;;  %v2186_v54 = vadd.f32 %v2185_v36, %v1993_v52 }
 0x177   : > { %v2189_v34 = vpop.f32.mrf.mxu1  ;;  %v2382_v6 = vpop.f32.mrf.mxu0  ;;  %5256 = vmatmul.mubr.msk.bf16.gmra.mxu1 %vm1873_vm0, %v7573_v61  ;;  %2847 = vmatmul.mubr.bf16.gmra.mxu0 %v6452_v7 }
 0x178   : > { %v7588_v17 = vadd.f32 %v2378_v4, %v2186_v54  ;;  %v2190_v27 = vadd.f32 %v2189_v34, %v1997_v41  ;;  %2663 = vmatprep.mubr.bf16.mxu1 %v9395_v38  ;;  %2856 = vmatprep.mubr.bf16.mxu0 %v6471_v19 }
 0x179   : > { %v2191_v13 = vpop.f32.mrf.mxu1  ;;  %v2384_v57 = vpop.f32.mrf.mxu0 }
 0x17a   : > { %v7596_v50 = vadd.f32 %v2382_v6, %v2190_v27  ;;  %v2192_v7 = vadd.f32 %v2191_v13, %v1999_v11 }
 0x17b   : > { %v2193_v52 = vpop.f32.mrf.mxu1  ;;  %v2386_v45 = vpop.f32.mrf.mxu0 }
 0x17c   : > { %v7602_v32 = vadd.f32 %v2384_v57, %v2192_v7  ;;  %v2194_v19 = vadd.f32 %v2193_v52, %v2001_v46  ;;  %v548_v46 = vld [vmem:[%s6188_s8 + $0x688] sm:$0xff]  ;;  %v2017_v7 = vadd.f32 %v7387_v24, %v7051_v42  ;;  %v2021_v24 = vadd.f32 %v7416_v28, %v7051_v42 }
 0x17d   : > { %v2195_v41 = vpop.f32.mrf.mxu1  ;;  %v2388_v56 = vpop.f32.mrf.mxu0  ;;  %v7623_v29 = vpack.c.bf16 %v548_v46, %v541_v55  ;;  %v2023_v55 = vadd.f32 %v7423_v21, %v7061_v26 }
 0x17e   : > { %v7606_v36 = vadd.f32 %v2386_v45, %v2194_v19  ;;  %v2196_v4 = vadd.f32 %v2195_v41, %v2003_v39 }
 0x17f   : > { %v2199_v11 = vpop.f32.mrf.mxu1  ;;  %v2392_v54 = vpop.f32.mrf.mxu0  ;;  %5257 = vmatmul.mubr.msk.bf16.gmra.mxu1 %vm1873_vm0, %v7598_v63  ;;  %2857 = vmatmul.mubr.bf16.gmra.mxu0 %v6496_v33  ;;  %9444 = vst [vmem:[#allocation118_spill] sm:$0xff] %v7623_v29  ;;  %v9475_v63 = vld [vmem:[#allocation21_spill] sm:$0xff] }
 0x180   : > { %v7613_v34 = vadd.f32 %v2388_v56, %v2196_v4  ;;  %v2200_v6 = vadd.f32 %v2199_v11, %v2007_v25  ;;  %2673 = vmatprep.mubr.bf16.mxu1 %v9395_v38  ;;  %2866 = vmatprep.mubr.bf16.mxu0 %v6515_v48 }
 0x181   : > { %v2201_v27 = vpop.f32.mrf.mxu1  ;;  %v2394_v35 = vpop.f32.mrf.mxu0 }
 0x182   : > { %v7621_v13 = vadd.f32 %v2392_v54, %v2200_v6  ;;  %v2202_v33 = vadd.f32 %v2201_v27, %v2009_v49  ;;  %v562_v54 = vld [vmem:[%s6188_s8 + $0x6f8] sm:$0xff]  ;;  %s5045_s8 = sshll.u32 %s328_s22, 1 }
 0x183   : > { %v2203_v57 = vpop.f32.mrf.mxu1  ;;  %v2396_v39 = vpop.f32.mrf.mxu0  ;;  %v7648_v28 = vpack.c.bf16 %v562_v54, %v555_v18  ;;  %s330_s23 = scalar_lea.vmem [#allocation3], %s5045_s8 }
 0x184   : > { %v7627_v52 = vadd.f32 %v2394_v35, %v2202_v33  ;;  %v2204_v48 = vadd.f32 %v2203_v57, %v2011_v2  ;;  %s4982_s24 = sshll.u32 %s330_s23, 4  ;;  %s4983_s24 = int_to_ptr.vmem [resolvable:$true] %s4982_s24 }
 0x185   : > { %v2205_v45 = vpop.f32.mrf.mxu1  ;;  %v2398_v25 = vpop.f32.mrf.mxu0  ;;  %9445 = vst [vmem:[#allocation119_spill] sm:$0xff] %v7648_v28  ;;  %s5985_s29 = scalar_lea.vmem %s4983_s24, 32  ;;  %p5992_p0 = scmp.lt.s32.totalorder %s4983_s24, %s5990_s15 }
 0x186   : > { %v7631_v19 = vadd.f32 %v2396_v39, %v2204_v48  ;;  %v2206_v41 = vadd.f32 %v2205_v45, %v2013_v8  ;;  %v2027_v8 = vadd.f32 %v7440_v44, %v7051_v42  ;;  %v2031_v44 = vadd.f32 %v7463_v20, %v7051_v42  ;;  %p5986_p11 = scmp.ne.s32.totalorder %s4983_s24, %s5985_s29  ;;  %p5993_p1 = scmp.lt.s32.totalorder %s5991_s17, %s5985_s29 }
 0x187   : > { %v2209_v56 = vpop.f32.mrf.mxu1  ;;  %v2402_v49 = vpop.f32.mrf.mxu0  ;;  %5258 = vmatmul.mubr.msk.bf16.gmra.mxu1 %vm1873_vm0, %v7623_v29  ;;  %2867 = vmatmul.mubr.bf16.gmra.mxu0 %v6544_v1 }
 0x188   : > { %v7638_v4 = vadd.f32 %v2398_v25, %v2206_v41  ;;  %v2210_v11 = vadd.f32 %v2209_v56, %v2017_v7  ;;  %2683 = vmatprep.mubr.bf16.mxu1 %v9395_v38  ;;  %2876 = vmatprep.mubr.bf16.mxu0 %v6562_v15  ;;  %v2029_v7 = vadd.f32 %v7452_v43, %v7061_v26  ;;  %v9446_v56 = vld [vmem:[#allocation6_spill] sm:$0xff]  ;;  %p5987_p12 = pnand %p5986_p11, %p6138_p5  ;;  %p5994_p2 = por %p5993_p1, %p5992_p0 }
 0x189   : > { %v2211_v2 = vpop.f32.mrf.mxu1  ;;  %v2404_v6 = vpop.f32.mrf.mxu0 }
 0x18a   : > { %v7646_v46 = vadd.f32 %v2402_v49, %v2210_v11  ;;  %v2212_v1 = vadd.f32 %v2211_v2, %v2019_v60  ;;  %p5988_p13 = pneg %p5987_p12 }
 0x18b   : > { %v2213_v27 = vpop.f32.mrf.mxu1  ;;  %v2406_v35 = vpop.f32.mrf.mxu0 }
 0x18c   : > { %v7652_v33 = vadd.f32 %v2404_v6, %v2212_v1  ;;  %v2214_v15 = vadd.f32 %v2213_v27, %v2021_v24  ;;  %v2033_v24 = vadd.f32 %v7472_v9, %v7061_v26  ;;  %v5869_v26 = vld [vmem:[%s9234_s3 + $0x64] ss:$8 sps:$4 sm:$0xff]   ;;  %p5995_p3 = pnand %p5994_p2, %p5988_p13 }
 0x18d   : > { %v2215_v57 = vpop.f32.mrf.mxu1  ;;  %v2408_v39 = vpop.f32.mrf.mxu0 }
 0x18e   : > { %v7656_v48 = vadd.f32 %v2406_v35, %v2214_v15  ;;  %v2216_v21 = vadd.f32 %v2215_v57, %v2023_v55  ;;  %v5864_v55 = vld [vmem:[%s9234_s3 + $0x70] ss:$8 sps:$4 sm:$0xff]  }
 0x18f   : > { %v2219_v45 = vpop.f32.mrf.mxu1  ;;  %v2412_v25 = vpop.f32.mrf.mxu0  ;;  %5259 = vmatmul.mubr.msk.bf16.gmra.mxu1 %vm1873_vm0, %v7648_v28  ;;  %2877 = vmatmul.mubr.bf16.gmra.mxu0 %v6584_v31  ;;  %v9448_v15 = vld [vmem:[#allocation8_spill] sm:$0xff]  ;;  %v9471_v28 = vld [vmem:[#allocation19_spill] sm:$0xff] }
 0x190   : > { %v7663_v60 = vadd.f32 %v2408_v39, %v2216_v21  ;;  %v2220_v41 = vadd.f32 %v2219_v45, %v2027_v8  ;;  %2919 = vmatprep.mubr.bf16.mxu1 %v6607_v51  ;;  %3112 = vmatprep.mubr.bf16.mxu0 %v9446_v56  ;;  %v5861_v51 = vld [vmem:[%s9232_s1 + $0x608] ss:$16 sps:$4 sm:$0xff]   ;;  %v9447_v8 = vld [vmem:[#allocation7_spill] sm:$0xff]  ;;  %v9450_v21 = vld [vmem:[#allocation9_spill] sm:$0xff] }
 0x191   : > { %v2221_v43 = vpop.f32.mrf.mxu1  ;;  %v2414_v49 = vpop.f32.mrf.mxu0  ;;  %v9449_v39 = vld [vmem:[#allocation72_spill] sm:$0xff]  ;;  %v9451_v45 = vld [vmem:[#allocation10_spill] sm:$0xff] }
 0x192   : > { %v7669_v11 = vadd.f32 %v2412_v25, %v2220_v41  ;;  %v2222_v18 = vadd.f32 %v2221_v43, %v2029_v7  ;;  %v5867_v41 = vld [vmem:[%s9234_s3 + $0x60] ss:$8 sps:$4 sm:$0xff]  }
 0x193   : > { %v2223_v54 = vpop.f32.mrf.mxu1  ;;  %v2416_v31 = vpop.f32.mrf.mxu0  ;;  %v9452_v43 = vld [vmem:[#allocation73_spill] sm:$0xff] }
 0x194   : > { %v7671_v2 = vadd.f32 %v2414_v49, %v2222_v18  ;;  %v2224_v42 = vadd.f32 %v2223_v54, %v2031_v44 }
 0x195   : > { %v2225_v20 = vpop.f32.mrf.mxu1  ;;  %v2418_v6 = vpop.f32.mrf.mxu0 }
 0x196   : > { %v7679_v1 = vadd.f32 %v2416_v31, %v2224_v42  ;;  %v2226_v9 = vadd.f32 %v2225_v20, %v2033_v24  ;;  %v5872_v24 = vld [vmem:[%s9234_s3 + $0x54] ss:$8 sps:$4 sm:$0xff]  }
 0x197   : > { %v2229_v27 = vpop.f32.mrf.mxu1  ;;  %v2422_v35 = vpop.f32.mrf.mxu0  ;;  %2920 = vmatmul.mubr.bf16.vlgmr.msra.gmra.mxu1 %v9447_v8  ;;  %3113 = vmatmul.mubr.bf16.vlgmr.msra.gmra.mxu0 %v9448_v15  ;;  %v9453_v42 = vld [vmem:[#allocation75_spill] sm:$0xff] }
 0x198   : > { %v7686_v57 = vadd.f32 %v2418_v6, %v2226_v9  ;;  %v2230_v7 = vadd.f32 %v2229_v27, %v9449_v39  ;;  %2929 = vmatprep.mubr.bf16.mxu1 %v9450_v21  ;;  %3122 = vmatprep.mubr.bf16.mxu0 %v9451_v45  ;;  %v9455_v39 = vld [vmem:[#allocation11_spill] sm:$0xff]  ;;  %v9457_v45 = vld [vmem:[#allocation77_spill] sm:$0xff] }
 0x199   : > { %v2231_v25 = vpop.f32.mrf.mxu1  ;;  %v2424_v44 = vpop.f32.mrf.mxu0  ;;  %3288 = vmatpush1.bf16.msra.mxu1 %v5861_v51  ;;  %4055 = vmatpush1.bf16.msra.mxu0 %v5864_v55  ;;  %v5870_v55 = vld [vmem:[%s9234_s3 + $0x50] ss:$8 sps:$4 sm:$0xff]  }
 0x19a   : > { %v7694_v56 = vadd.f32 %v2422_v35, %v2230_v7  ;;  %v2232_v49 = vadd.f32 %v2231_v25, %v9452_v43  ;;  %4056 = vmatprep.subr.bf16.mxu0 %v5869_v26  ;;  %v9454_v26 = vld [vmem:[#allocation76_spill] sm:$0xff]  ;;  %v5875_v35 = vld [vmem:[%s9234_s3 + $0x44] ss:$8 sps:$4 sm:$0xff]  }
 0x19b   : > { %v2233_v18 = vpop.f32.mrf.mxu1  ;;  %v2426_v54 = vpop.f32.mrf.mxu0  ;;  %v9456_v7 = vld [vmem:[#allocation12_spill] sm:$0xff] }
 0x19c   : > { %v7700_v31 = vadd.f32 %v2424_v44, %v2232_v49  ;;  %v2234_v20 = vadd.f32 %v2233_v18, %v9453_v42  ;;  %v9458_v44 = vld [vmem:[#allocation13_spill] sm:$0xff] }
 0x19d   : > { %v2235_v6 = vpop.f32.mrf.mxu1  ;;  %v2428_v51 = vpop.f32.mrf.mxu0  ;;  %4057 = vmatpush1.bf16.msra.mxu0 %v5867_v41  ;;  %v9459_v41 = vld [vmem:[#allocation14_spill] sm:$0xff] }
 0x19e   : > { %v7706_v9 = vadd.f32 %v2426_v54, %v2234_v20  ;;  %v2236_v27 = vadd.f32 %v2235_v6, %v9454_v26  ;;  %4058 = vmatprep.subr.bf16.mxu0 %v5872_v24  ;;  %v5873_v24 = vld [vmem:[%s9234_s3 + $0x40] ss:$8 sps:$4 sm:$0xff]   ;;  %v5878_v20 = vld [vmem:[%s9234_s3 + $0x34] ss:$8 sps:$4 sm:$0xff]  }
 0x19f   : > { %v2239_v8 = vpop.f32.mrf.mxu1  ;;  %v2432_v15 = vpop.f32.mrf.mxu0  ;;  %2930 = vmatmul.mubr.bf16.gmra.mxu1 %v9455_v39  ;;  %3123 = vmatmul.mubr.bf16.gmra.mxu0 %v9456_v7  ;;  %v9460_v54 = vld [vmem:[#allocation78_spill] sm:$0xff] }
 0x1a0   : > { %v7714_v21 = vadd.f32 %v2428_v51, %v2236_v27  ;;  %v2240_v25 = vadd.f32 %v2239_v8, %v9457_v45  ;;  %2939 = vmatprep.mubr.bf16.mxu1 %v9458_v44  ;;  %3132 = vmatprep.mubr.bf16.mxu0 %v9459_v41  ;;  %v9461_v27 = vld [vmem:[#allocation80_spill] sm:$0xff] }
 0x1a1   : > { %v2241_v43 = vpop.f32.mrf.mxu1  ;;  %v2434_v49 = vpop.f32.mrf.mxu0  ;;  %4059 = vmatpush1.bf16.msra.mxu0 %v5870_v55 }
 0x1a2   : > { %v7722_v18 = vadd.f32 %v2432_v15, %v2240_v25  ;;  %v2242_v42 = vadd.f32 %v2241_v43, %v9460_v54  ;;  %4060 = vmatprep.subr.bf16.mxu0 %v5875_v35  ;;  %v5876_v15 = vld [vmem:[%s9234_s3 + $0x30] ss:$8 sps:$4 sm:$0xff]   ;;  %v9462_v35 = vld [vmem:[#allocation81_spill] sm:$0xff]  ;;  %v9465_v54 = vld [vmem:[#allocation82_spill] sm:$0xff] }
 0x1a3   : > { %v2243_v6 = vpop.f32.mrf.mxu1  ;;  %v2436_v51 = vpop.f32.mrf.mxu0  ;;  %v5881_v25 = vld [vmem:[%s9234_s3 + $0x24] ss:$8 sps:$4 sm:$0xff]  }
 0x1a4   : > { %v7728_v26 = vadd.f32 %v2434_v49, %v2242_v42  ;;  %v2244_v8 = vadd.f32 %v2243_v6, %v9461_v27  ;;  %v9463_v43 = vld [vmem:[#allocation15_spill] sm:$0xff]  ;;  %v9464_v49 = vld [vmem:[#allocation16_spill] sm:$0xff]  ;;  %v9466_v6 = vld [vmem:[#allocation17_spill] sm:$0xff] }
 0x1a5   : > { %v2245_v55 = vpop.f32.mrf.mxu1  ;;  %v2438_v39 = vpop.f32.mrf.mxu0  ;;  %4061 = vmatpush1.bf16.msra.mxu0 %v5873_v24 }
 0x1a6   : > { %v7734_v7 = vadd.f32 %v2436_v51, %v2244_v8  ;;  %v2246_v45 = vadd.f32 %v2245_v55, %v9462_v35  ;;  %4062 = vmatprep.subr.bf16.mxu0 %v5878_v20  ;;  %v9467_v51 = vld [vmem:[#allocation18_spill] sm:$0xff]  ;;  %v9468_v35 = vld [vmem:[#allocation83_spill] sm:$0xff] }
 0x1a7   : > { %v2249_v44 = vpop.f32.mrf.mxu1  ;;  %v2442_v41 = vpop.f32.mrf.mxu0  ;;  %2940 = vmatmul.mubr.bf16.gmra.mxu1 %v9463_v43  ;;  %3133 = vmatmul.mubr.bf16.gmra.mxu0 %v9464_v49  ;;  %v5879_v8 = vld [vmem:[%s9234_s3 + $0x20] ss:$8 sps:$4 sm:$0xff]  }
 0x1a8   : > { %v7742_v24 = vadd.f32 %v2438_v39, %v2246_v45  ;;  %v2250_v42 = vadd.f32 %v2249_v44, %v9465_v54  ;;  %2949 = vmatprep.mubr.bf16.mxu1 %v9466_v6  ;;  %3142 = vmatprep.mubr.bf16.mxu0 %v9467_v51  ;;  %v5884_v39 = vld [vmem:[%s9234_s3 + $0x14] ss:$8 sps:$4 sm:$0xff]  }
 0x1a9   : > { %v2251_v27 = vpop.f32.mrf.mxu1  ;;  %v2444_v20 = vpop.f32.mrf.mxu0  ;;  %4063 = vmatpush1.bf16.msra.mxu0 %v5876_v15  ;;  %v9469_v54 = vld [vmem:[#allocation85_spill] sm:$0xff] }
 0x1aa   : > { %v7750_v55 = vadd.f32 %v2442_v41, %v2250_v42  ;;  %v2252_v43 = vadd.f32 %v2251_v27, %v9468_v35  ;;  %4064 = vmatprep.subr.bf16.mxu0 %v5881_v25  ;;  %v5882_v41 = vld [vmem:[%s9234_s3 + $0x10] ss:$8 sps:$4 sm:$0xff]   ;;  %v9470_v25 = vld [vmem:[#allocation86_spill] sm:$0xff] }
 0x1ab   : > { %v2253_v45 = vpop.f32.mrf.mxu1  ;;  %v2446_v44 = vpop.f32.mrf.mxu0  ;;  %v5887_v35 = vld [vmem:[%s9234_s3 + $0x4] ss:$8 sps:$4 sm:$0xff]  }
 0x1ac   : > { %v7756_v49 = vadd.f32 %v2444_v20, %v2252_v43  ;;  %v2254_v6 = vadd.f32 %v2253_v45, %v9469_v54  ;;  %v9472_v45 = vld [vmem:[#allocation20_spill] sm:$0xff]  ;;  %v9474_v54 = vld [vmem:[#allocation87_spill] sm:$0xff] }
 0x1ad   : > { %v2255_v15 = vpop.f32.mrf.mxu1  ;;  %v2448_v51 = vpop.f32.mrf.mxu0  ;;  %4065 = vmatpush1.bf16.msra.mxu0 %v5879_v8 }
 0x1ae   : > { %v7762_v42 = vadd.f32 %v2446_v44, %v2254_v6  ;;  %v2256_v27 = vadd.f32 %v2255_v15, %v9470_v25  ;;  %4066 = vmatprep.subr.bf16.mxu0 %v5884_v39  ;;  %v9476_v44 = vld [vmem:[#allocation22_spill] sm:$0xff] }
 0x1af   : > { %v2259_v20 = vpop.f32.mrf.mxu1  ;;  %v2452_v43 = vpop.f32.mrf.mxu0  ;;  %2950 = vmatmul.mubr.bf16.gmra.mxu1 %v9471_v28  ;;  %3143 = vmatmul.mubr.bf16.gmra.mxu0 %v9472_v45  ;;  %v5885_v15 = vld [vmem:[%s9234_s3] ss:$8 sps:$4 sm:$0xff]   ;;  %v9478_v28 = vld [vmem:[#allocation88_spill] sm:$0xff] }
 0x1b0   : > { %v7770_v8 = vadd.f32 %v2448_v51, %v2256_v27  ;;  %v2260_v29 = vadd.f32 %v2259_v20, %v9474_v54  ;;  %2959 = vmatprep.mubr.bf16.mxu1 %v9475_v63  ;;  %3152 = vmatprep.mubr.bf16.mxu0 %v9476_v44  ;;  %v5890_v51 = vld [vmem:[%s9234_s3 + $0xf4] ss:$8 sps:$4 sm:$0xff]   ;;  %v9480_v45 = vld [vmem:[#allocation90_spill] sm:$0xff] }
 0x1b1   : > { %v2261_v6 = vpop.f32.mrf.mxu1  ;;  %v2454_v39 = vpop.f32.mrf.mxu0  ;;  %4067 = vmatpush1.bf16.msra.mxu0 %v5882_v41 }
 0x1b2   : > { %9473 = vst [vmem:[#allocation6_spill] sm:$0xff] %v7770_v8  ;;  %v7778_v25 = vadd.f32 %v2452_v43, %v2260_v29  ;;  %v2262_v61 = vadd.f32 %v2261_v6, %v9478_v28  ;;  %4068 = vmatprep.subr.bf16.mxu0 %v5887_v35  ;;  %v5888_v29 = vld [vmem:[%s9234_s3 + $0xf0] ss:$8 sps:$4 sm:$0xff]   ;;  %v5893_v28 = vld [vmem:[%s9234_s3 + $0xe4] ss:$8 sps:$4 sm:$0xff]  }
 0x1b3   : > { %v2263_v27 = vpop.f32.mrf.mxu1  ;;  %v2456_v63 = vpop.f32.mrf.mxu0  ;;  %v9482_v35 = vld [vmem:[#allocation91_spill] sm:$0xff] }
 0x1b4   : > { %9477 = vst [vmem:[#allocation7_spill] sm:$0xff] %v7778_v25  ;;  %v7784_v20 = vadd.f32 %v2454_v39, %v2262_v61  ;;  %v2264_v54 = vadd.f32 %v2263_v27, %v9480_v45  ;;  %v9484_v27 = vld [vmem:[#allocation24_spill] sm:$0xff] }
 0x1b5   : > { %v2265_v41 = vpop.f32.mrf.mxu1  ;;  %v2458_v44 = vpop.f32.mrf.mxu0  ;;  %4069 = vmatpush1.bf16.msra.mxu0 %v5885_v15  ;;  %v9486_v45 = vld [vmem:[#allocation92_spill] sm:$0xff] }
 0x1b6   : > { %9479 = vst [vmem:[#allocation8_spill] sm:$0xff] %v7784_v20  ;;  %v7790_v43 = vadd.f32 %v2456_v63, %v2264_v54  ;;  %v2266_v6 = vadd.f32 %v2265_v41, %v9482_v35  ;;  %4070 = vmatprep.subr.bf16.mxu0 %v5890_v51  ;;  %v9488_v63 = vld [vmem:[#allocation26_spill] sm:$0xff] }
 0x1b7   : > { %v2269_v61 = vpop.f32.mrf.mxu1  ;;  %v2462_v39 = vpop.f32.mrf.mxu0  ;;  %2960 = vmatmul.mubr.bf16.gmra.mxu1 %v9483_v5  ;;  %3153 = vmatmul.mubr.bf16.gmra.mxu0 %v9484_v27  ;;  %v5891_v41 = vld [vmem:[%s9234_s3 + $0xe0] ss:$8 sps:$4 sm:$0xff]   ;;  %v9492_v27 = vld [vmem:[#allocation95_spill] sm:$0xff] }
 0x1b8   : > { %9481 = vst [vmem:[#allocation72_spill] sm:$0xff] %v7790_v43  ;;  %v7798_v15 = vadd.f32 %v2458_v44, %v2266_v6  ;;  %v2270_v23 = vadd.f32 %v2269_v61, %v9486_v45  ;;  %2969 = vmatprep.mubr.bf16.mxu1 %v9487_v62  ;;  %3162 = vmatprep.mubr.bf16.mxu0 %v9488_v63  ;;  %v9490_v5 = vld [vmem:[#allocation93_spill] sm:$0xff] }
 0x1b9   : > { %v2271_v54 = vpop.f32.mrf.mxu1  ;;  %v2464_v51 = vpop.f32.mrf.mxu0  ;;  %4071 = vmatpush2.bf16.msra.mxu0 %v5888_v29  ;;  %v5896_v44 = vld [vmem:[%s9234_s3 + $0xd4] ss:$8 sps:$4 sm:$0xff]  }
 0x1ba   : > { %9485 = vst [vmem:[#allocation9_spill] sm:$0xff] %v7798_v15  ;;  %v7806_v35 = vadd.f32 %v2462_v39, %v2270_v23  ;;  %v2272_v43 = vadd.f32 %v2271_v54, %v9490_v5  ;;  %4072 = vmatprep.subr.bf16.mxu0 %v5893_v28  ;;  %v5894_v23 = vld [vmem:[%s9234_s3 + $0xd0] ss:$8 sps:$4 sm:$0xff]   ;;  %v5899_v5 = vld [vmem:[%s9234_s3 + $0xc4] ss:$8 sps:$4 sm:$0xff]  }
 0x1bb   : > { %v2273_v6 = vpop.f32.mrf.mxu1  ;;  %v2466_v62 = vpop.f32.mrf.mxu0  ;;  %v9494_v28 = vld [vmem:[#allocation96_spill] sm:$0xff]  ;;  %v9499_v15 = vld [vmem:[#allocation29_spill] sm:$0xff] }
 0x1bc   : > { %9489 = vst [vmem:[#allocation10_spill] sm:$0xff] %v7806_v35  ;;  %v7812_v61 = vadd.f32 %v2464_v51, %v2272_v43  ;;  %v2274_v45 = vadd.f32 %v2273_v6, %v9492_v27  ;;  %v9496_v6 = vld [vmem:[#allocation28_spill] sm:$0xff]  ;;  %v9498_v27 = vld [vmem:[#allocation97_spill] sm:$0xff] }
 0x1bd   : > { %v2275_v29 = vpop.f32.mrf.mxu1  ;;  %v2468_v63 = vpop.f32.mrf.mxu0  ;;  %4073 = vmatpush2.bf16.msra.mxu0 %v5891_v41 }
 0x1be   : > { %9491 = vst [vmem:[#allocation73_spill] sm:$0xff] %v7812_v61  ;;  %v7818_v39 = vadd.f32 %v2466_v62, %v2274_v45  ;;  %v2276_v54 = vadd.f32 %v2275_v29, %v9494_v28  ;;  %4074 = vmatprep.subr.bf16.mxu0 %v5896_v44  ;;  %v9495_v61 = vld [vmem:[#allocation27_spill] sm:$0xff]  ;;  %v9500_v62 = vld [vmem:[#allocation30_spill] sm:$0xff] }
 0x1bf   : > { %v2279_v43 = vpop.f32.mrf.mxu1  ;;  %v2472_v51 = vpop.f32.mrf.mxu0  ;;  %2970 = vmatmul.mubr.bf16.gmra.mxu1 %v9495_v61  ;;  %3163 = vmatmul.mubr.bf16.gmra.mxu0 %v9496_v6  ;;  %v5897_v29 = vld [vmem:[%s9234_s3 + $0xc0] ss:$8 sps:$4 sm:$0xff]   ;;  %v9504_v6 = vld [vmem:[#allocation100_spill] sm:$0xff] }
 0x1c0   : > { %9493 = vst [vmem:[#allocation75_spill] sm:$0xff] %v7818_v39  ;;  %v7826_v41 = vadd.f32 %v2468_v63, %v2276_v54  ;;  %v2280_v35 = vadd.f32 %v2279_v43, %v9498_v27  ;;  %2979 = vmatprep.mubr.bf16.mxu1 %v9499_v15  ;;  %3172 = vmatprep.mubr.bf16.mxu0 %v9500_v62  ;;  %v9502_v61 = vld [vmem:[#allocation98_spill] sm:$0xff]  ;;  %v5902_v63 = vld [vmem:[%s9234_s3 + $0xb4] ss:$8 sps:$4 sm:$0xff]  }
 0x1c1   : > { %v2281_v45 = vpop.f32.mrf.mxu1  ;;  %v2474_v44 = vpop.f32.mrf.mxu0  ;;  %4075 = vmatpush2.bf16.msra.mxu0 %v5894_v23 }
 0x1c2   : > { %9497 = vst [vmem:[#allocation76_spill] sm:$0xff] %v7826_v41  ;;  %v7834_v28 = vadd.f32 %v2472_v51, %v2280_v35  ;;  %v2282_v39 = vadd.f32 %v2281_v45, %v9502_v61  ;;  %4076 = vmatprep.subr.bf16.mxu0 %v5899_v5  ;;  %v5900_v35 = vld [vmem:[%s9234_s3 + $0xb0] ss:$8 sps:$4 sm:$0xff]   ;;  %v9506_v5 = vld [vmem:[#allocation101_spill] sm:$0xff] }
 0x1c3   : > { %v2283_v54 = vpop.f32.mrf.mxu1  ;;  %v2476_v15 = vpop.f32.mrf.mxu0  ;;  %v5905_v61 = vld [vmem:[%s9234_s3 + $0xa4] ss:$8 sps:$4 sm:$0xff]  }
 0x1c4   : > { %9501 = vst [vmem:[#allocation11_spill] sm:$0xff] %v7834_v28  ;;  %v7840_v43 = vadd.f32 %v2474_v44, %v2282_v39  ;;  %v2284_v27 = vadd.f32 %v2283_v54, %v9504_v6  ;;  %v9508_v54 = vld [vmem:[#allocation32_spill] sm:$0xff]  ;;  %v9510_v6 = vld [vmem:[#allocation102_spill] sm:$0xff]  ;;  %v9511_v41 = vld [vmem:[#allocation33_spill] sm:$0xff] }
 0x1c5   : > { %v2285_v23 = vpop.f32.mrf.mxu1  ;;  %v2478_v62 = vpop.f32.mrf.mxu0  ;;  %4077 = vmatpush2.bf16.msra.mxu0 %v5897_v29 }
 0x1c6   : > { %9503 = vst [vmem:[#allocation12_spill] sm:$0xff] %v7840_v43  ;;  %v7846_v51 = vadd.f32 %v2476_v15, %v2284_v27  ;;  %v2286_v45 = vadd.f32 %v2285_v23, %v9506_v5  ;;  %4078 = vmatprep.subr.bf16.mxu0 %v5902_v63  ;;  %v9507_v43 = vld [vmem:[#allocation31_spill] sm:$0xff]  ;;  %v9512_v15 = vld [vmem:[#allocation34_spill] sm:$0xff] }
 0x1c7   : > { %v2289_v39 = vpop.f32.mrf.mxu1  ;;  %v2482_v44 = vpop.f32.mrf.mxu0  ;;  %2980 = vmatmul.mubr.bf16.gmra.mxu1 %v9507_v43  ;;  %3173 = vmatmul.mubr.bf16.gmra.mxu0 %v9508_v54  ;;  %v5903_v23 = vld [vmem:[%s9234_s3 + $0xa0] ss:$8 sps:$4 sm:$0xff]   ;;  %v9514_v43 = vld [vmem:[#allocation103_spill] sm:$0xff] }
 0x1c8   : > { %9505 = vst [vmem:[#allocation77_spill] sm:$0xff] %v7846_v51  ;;  %v7854_v29 = vadd.f32 %v2478_v62, %v2286_v45  ;;  %v2290_v28 = vadd.f32 %v2289_v39, %v9510_v6  ;;  %2989 = vmatprep.mubr.bf16.mxu1 %v9511_v41  ;;  %3182 = vmatprep.mubr.bf16.mxu0 %v9512_v15  ;;  %v5908_v62 = vld [vmem:[%s9234_s3 + $0x94] ss:$8 sps:$4 sm:$0xff]  }
 0x1c9   : > { %v2291_v27 = vpop.f32.mrf.mxu1  ;;  %v2484_v63 = vpop.f32.mrf.mxu0  ;;  %4079 = vmatpush2.bf16.msra.mxu0 %v5900_v35  ;;  %v9516_v54 = vld [vmem:[#allocation105_spill] sm:$0xff] }
 0x1ca   : > { %9509 = vst [vmem:[#allocation13_spill] sm:$0xff] %v7854_v29  ;;  %v7862_v5 = vadd.f32 %v2482_v44, %v2290_v28  ;;  %v2292_v51 = vadd.f32 %v2291_v27, %v9514_v43  ;;  %4080 = vmatprep.subr.bf16.mxu0 %v5905_v61  ;;  %v5906_v28 = vld [vmem:[%s9234_s3 + $0x90] ss:$8 sps:$4 sm:$0xff]   ;;  %v9518_v61 = vld [vmem:[#allocation106_spill] sm:$0xff]  ;;  %v9523_v29 = vld [vmem:[#allocation37_spill] sm:$0xff] }
 0x1cb   : > { %v2293_v45 = vpop.f32.mrf.mxu1  ;;  %v2486_v41 = vpop.f32.mrf.mxu0  ;;  %v5911_v43 = vld [vmem:[%s9234_s3 + $0x84] ss:$8 sps:$4 sm:$0xff]  }
 0x1cc   : > { %9513 = vst [vmem:[#allocation14_spill] sm:$0xff] %v7862_v5  ;;  %v7868_v39 = vadd.f32 %v2484_v63, %v2292_v51  ;;  %v2294_v6 = vadd.f32 %v2293_v45, %v9516_v54  ;;  %v9520_v45 = vld [vmem:[#allocation36_spill] sm:$0xff]  ;;  %v9522_v54 = vld [vmem:[#allocation107_spill] sm:$0xff] }
 0x1cd   : > { %v2295_v35 = vpop.f32.mrf.mxu1  ;;  %v2488_v15 = vpop.f32.mrf.mxu0  ;;  %4081 = vmatpush2.bf16.msra.mxu0 %v5903_v23 }
 0x1ce   : > { %9515 = vst [vmem:[#allocation78_spill] sm:$0xff] %v7868_v39  ;;  %v7874_v44 = vadd.f32 %v2486_v41, %v2294_v6  ;;  %v2296_v27 = vadd.f32 %v2295_v35, %v9518_v61  ;;  %4082 = vmatprep.subr.bf16.mxu0 %v5908_v62  ;;  %v9519_v39 = vld [vmem:[#allocation35_spill] sm:$0xff]  ;;  %v9524_v41 = vld [vmem:[#allocation38_spill] sm:$0xff] }
 0x1cf   : > { %v2299_v51 = vpop.f32.mrf.mxu1  ;;  %v2492_v63 = vpop.f32.mrf.mxu0  ;;  %2990 = vmatmul.mubr.bf16.gmra.mxu1 %v9519_v39  ;;  %3183 = vmatmul.mubr.bf16.gmra.mxu0 %v9520_v45  ;;  %v5909_v35 = vld [vmem:[%s9234_s3 + $0x80] ss:$8 sps:$4 sm:$0xff]   ;;  %v9525_v39 = vld [vmem:[#allocation108_spill] sm:$0xff] }
 0x1d0   : > { %9517 = vst [vmem:[#allocation80_spill] sm:$0xff] %v7874_v44  ;;  %v7882_v23 = vadd.f32 %v2488_v15, %v2296_v27  ;;  %v2300_v5 = vadd.f32 %v2299_v51, %v9522_v54  ;;  %2999 = vmatprep.mubr.bf16.mxu1 %v9523_v29  ;;  %3192 = vmatprep.mubr.bf16.mxu0 %v9524_v41  ;;  %v9526_v51 = vld [vmem:[#allocation110_spill] sm:$0xff] }
 0x1d1   : > { %v2301_v6 = vpop.f32.mrf.mxu1  ;;  %v2494_v62 = vpop.f32.mrf.mxu0  ;;  %4083 = vmatpush2.bf16.msra.mxu0 %v5906_v28  ;;  %v9527_v28 = vld [vmem:[#allocation111_spill] sm:$0xff] }
 0x1d2   : > { %9521 = vst [vmem:[#allocation81_spill] sm:$0xff] %v7882_v23  ;;  %v7890_v61 = vadd.f32 %v2492_v63, %v2300_v5  ;;  %v2302_v44 = vadd.f32 %v2301_v6, %v9525_v39  ;;  %4084 = vmatprep.subr.bf16.mxu0 %v5911_v43  ;;  %v9528_v5 = vld [vmem:[#allocation39_spill] sm:$0xff]  ;;  %v9529_v63 = vld [vmem:[#allocation40_spill] sm:$0xff]  ;;  %v9531_v6 = vld [vmem:[#allocation42_spill] sm:$0xff] }
 0x1d3   : > { %v2303_v15 = vpop.f32.mrf.mxu1  ;;  %v2496_v27 = vpop.f32.mrf.mxu0 }
 0x1d4   : > { %v7893_v45 = vadd.f32 %v2494_v62, %v2302_v44  ;;  %v2304_v29 = vadd.f32 %v2303_v15, %v9526_v51  ;;  %v9530_v44 = vld [vmem:[#allocation41_spill] sm:$0xff] }
 0x1d5   : > { %v2305_v54 = vpop.f32.mrf.mxu1  ;;  %v2498_v41 = vpop.f32.mrf.mxu0  ;;  %4085 = vmatpush2.bf16.msra.mxu0 %v5909_v35  ;;  %v9533_v35 = vld [vmem:[#allocation112_spill] sm:$0xff] }
 0x1d6   : > { %v7896_v23 = vadd.f32 %v2496_v27, %v2304_v29  ;;  %v2306_v20 = vadd.f32 %v2305_v54, %v9527_v28 }
 0x1d7   : > { %v2535_v25 = vpop.f32.mrf.mxu1  ;;  %v7899_v8 = vpop.f32.mrf.mxu0  ;;  %3000 = vmatmul.mubr.bf16.gmra.mxu1 %v9528_v5  ;;  %3193 = vmatmul.mubr.bf16.gmra.mxu0 %v9529_v63 }
 0x1d8   : > { %v7903_v43 = vadd.f32 %v2498_v41, %v2306_v20  ;;  %3009 = vmatprep.mubr.bf16.mxu1 %v9530_v44  ;;  %3202 = vmatprep.mubr.bf16.mxu0 %v9531_v6  ;;  %v2536_v15 = vadd.f32 %v2535_v25, %v9533_v35  ;;  %v9537_v25 = vld [vmem:[#allocation44_spill] sm:$0xff] }
 0x1d9   : > { %v2537_v62 = vpop.f32.mrf.mxu1  ;;  %v7907_v39 = vpop.f32.mrf.mxu0 }
 0x1da   : > { %9532 = vst [vmem:[#allocation15_spill] sm:$0xff] %v7907_v39  ;;  %v2538_v29 = vadd.f32 %v2537_v62, %v7502_v0  ;;  %v3466_v20 = vmax.f32 %v2536_v15, 0.0  ;;  %v9536_v39 = vld [vmem:[#allocation43_spill] sm:$0xff]  ;;  %v9538_v62 = vld [vmem:[#allocation45_spill] sm:$0xff] }
 0x1db   : > { %v2539_v27 = vpop.f32.mrf.mxu1  ;;  %v7910_v51 = vpop.f32.mrf.mxu0 }
 0x1dc   : > { %9534 = vst [vmem:[#allocation16_spill] sm:$0xff] %v7910_v51  ;;  %v2540_v54 = vadd.f32 %v2539_v27, %v7506_v12  ;;  %v3467_v35 = vmax.f32 %v2538_v29, 0.0  ;;  %v9539_v12 = vld [vmem:[#allocation46_spill] sm:$0xff] }
 0x1dd   : > { %v2541_v28 = vpop.f32.mrf.mxu1  ;;  %v7914_v5 = vpop.f32.mrf.mxu0 }
 0x1de   : > { %v3470_v41 = vmax.f32 %v2540_v54, 0.0  ;;  %v2542_v63 = vadd.f32 %v2541_v28, %v7513_v59 }
 0x1df   : > { %v2545_v44 = vpop.f32.mrf.mxu1  ;;  %v7917_v6 = vpop.f32.mrf.mxu0  ;;  %3010 = vmatmul.mubr.bf16.gmra.mxu1 %v9536_v39  ;;  %3203 = vmatmul.mubr.bf16.gmra.mxu0 %v9537_v25 }
 0x1e0   : > { %9535 = vst [vmem:[#allocation82_spill] sm:$0xff] %v7917_v6  ;;  %v7921_v51 = vpack.c.bf16 %v3470_v41, %v3466_v20  ;;  %v3471_v0 = vmax.f32 %v2542_v63, 0.0  ;;  %3019 = vmatprep.mubr.bf16.mxu1 %v9538_v62  ;;  %3212 = vmatprep.mubr.bf16.mxu0 %v9539_v12  ;;  %v2546_v59 = vadd.f32 %v2545_v44, %v7521_v16  ;;  %v9542_v16 = vld [vmem:[#allocation47_spill] sm:$0xff]  ;;  %v9543_v44 = vld [vmem:[#allocation48_spill] sm:$0xff] }
 0x1e1   : > { %v2547_v27 = vpop.f32.mrf.mxu1  ;;  %v7925_v15 = vpop.f32.mrf.mxu0 }
 0x1e2   : > { %9540 = vst [vmem:[#allocation17_spill] sm:$0xff] %v7925_v15  ;;  %v7928_v54 = vpack.c.bf16 %v3471_v0, %v3467_v35  ;;  %v2548_v39 = vadd.f32 %v2547_v27, %v7527_v58  ;;  %v3474_v63 = vmax.f32 %v2546_v59, 0.0  ;;  %v9544_v27 = vld [vmem:[#allocation49_spill] sm:$0xff] }
 0x1e3   : > { %v2549_v28 = vpop.f32.mrf.mxu1  ;;  %v7930_v6 = vpop.f32.mrf.mxu0 }
 0x1e4   : > { %v2550_v29 = vadd.f32 %v2549_v28, %v7531_v30  ;;  %v3475_v35 = vmax.f32 %v2548_v39, 0.0  ;;  %v9545_v30 = vld [vmem:[#allocation50_spill] sm:$0xff] }
 0x1e5   : > { %v2551_v20 = vpop.f32.mrf.mxu1  ;;  %v7934_v41 = vpop.f32.mrf.mxu0 }
 0x1e6   : > { %v3478_v25 = vmax.f32 %v2550_v29, 0.0  ;;  %v2552_v62 = vadd.f32 %v2551_v20, %v7538_v10 }
 0x1e7   : > { %v2555_v12 = vpop.f32.mrf.mxu1  ;;  %v7937_v15 = vpop.f32.mrf.mxu0  ;;  %3020 = vmatmul.mubr.bf16.gmra.mxu1 %v9542_v16  ;;  %3213 = vmatmul.mubr.bf16.gmra.mxu0 %v9543_v44 }
 0x1e8   : > { %9541 = vst [vmem:[#allocation18_spill] sm:$0xff] %v7937_v15  ;;  %v7941_v0 = vpack.c.bf16 %v3478_v25, %v3474_v63  ;;  %v3479_v58 = vmax.f32 %v2552_v62, 0.0  ;;  %3029 = vmatprep.mubr.bf16.mxu1 %v9544_v27  ;;  %3222 = vmatprep.mubr.bf16.mxu0 %v9545_v30  ;;  %v2556_v10 = vadd.f32 %v2555_v12, %v7546_v3  ;;  %v9548_v3 = vld [vmem:[#allocation51_spill] sm:$0xff]  ;;  %v9549_v12 = vld [vmem:[#allocation52_spill] sm:$0xff] }
 0x1e9   : > { %v2557_v28 = vpop.f32.mrf.mxu1  ;;  %v7945_v59 = vpop.f32.mrf.mxu0 }
 0x1ea   : > { %9546 = vst [vmem:[#allocation83_spill] sm:$0xff] %v7945_v59  ;;  %v7948_v29 = vpack.c.bf16 %v3479_v58, %v3475_v35  ;;  %v2558_v16 = vadd.f32 %v2557_v28, %v7552_v14  ;;  %v3482_v62 = vmax.f32 %v2556_v10, 0.0  ;;  %v9550_v28 = vld [vmem:[#allocation53_spill] sm:$0xff] }
 0x1eb   : > { %v2559_v20 = vpop.f32.mrf.mxu1  ;;  %v7950_v15 = vpop.f32.mrf.mxu0 }
 0x1ec   : > { %v2560_v39 = vadd.f32 %v2559_v20, %v7556_v37  ;;  %v3483_v35 = vmax.f32 %v2558_v16, 0.0  ;;  %v9551_v37 = vld [vmem:[#allocation54_spill] sm:$0xff] }
 0x1ed   : > { %v2561_v63 = vpop.f32.mrf.mxu1  ;;  %v7954_v25 = vpop.f32.mrf.mxu0 }
 0x1ee   : > { %v3486_v44 = vmax.f32 %v2560_v39, 0.0  ;;  %v2562_v27 = vadd.f32 %v2561_v63, %v7563_v22 }
 0x1ef   : > { %v2565_v30 = vpop.f32.mrf.mxu1  ;;  %v7957_v59 = vpop.f32.mrf.mxu0  ;;  %3030 = vmatmul.mubr.bf16.gmra.mxu1 %v9548_v3  ;;  %3223 = vmatmul.mubr.bf16.gmra.mxu0 %v9549_v12 }
 0x1f0   : > { %9547 = vst [vmem:[#allocation85_spill] sm:$0xff] %v7957_v59  ;;  %v7961_v58 = vpack.c.bf16 %v3486_v44, %v3482_v62  ;;  %v3487_v14 = vmax.f32 %v2562_v27, 0.0  ;;  %3039 = vmatprep.mubr.bf16.mxu1 %v9550_v28  ;;  %3232 = vmatprep.mubr.bf16.mxu0 %v9551_v37  ;;  %v2566_v22 = vadd.f32 %v2565_v30, %v7571_v47  ;;  %v9554_v47 = vld [vmem:[#allocation55_spill] sm:$0xff]  ;;  %v9555_v30 = vld [vmem:[#allocation56_spill] sm:$0xff] }
 0x1f1   : > { %v2567_v20 = vpop.f32.mrf.mxu1  ;;  %v7965_v10 = vpop.f32.mrf.mxu0 }
 0x1f2   : > { %9552 = vst [vmem:[#allocation86_spill] sm:$0xff] %v7965_v10  ;;  %v7968_v39 = vpack.c.bf16 %v3487_v14, %v3483_v35  ;;  %v2568_v3 = vadd.f32 %v2567_v20, %v7577_v53  ;;  %v3490_v27 = vmax.f32 %v2566_v22, 0.0  ;;  %v9556_v20 = vld [vmem:[#allocation57_spill] sm:$0xff] }
 0x1f3   : > { %v2569_v63 = vpop.f32.mrf.mxu1  ;;  %v7970_v59 = vpop.f32.mrf.mxu0 }
 0x1f4   : > { %v2570_v16 = vadd.f32 %v2569_v63, %v7581_v40  ;;  %v3491_v35 = vmax.f32 %v2568_v3, 0.0  ;;  %v9557_v40 = vld [vmem:[#allocation58_spill] sm:$0xff] }
 0x1f5   : > { %v2571_v62 = vpop.f32.mrf.mxu1  ;;  %v7974_v44 = vpop.f32.mrf.mxu0 }
 0x1f6   : > { %v3494_v12 = vmax.f32 %v2570_v16, 0.0  ;;  %v2572_v28 = vadd.f32 %v2571_v62, %v7588_v17 }
 0x1f7   : > { %v2575_v37 = vpop.f32.mrf.mxu1  ;;  %v7977_v10 = vpop.f32.mrf.mxu0  ;;  %3040 = vmatmul.mubr.bf16.gmra.mxu1 %v9554_v47  ;;  %3233 = vmatmul.mubr.bf16.gmra.mxu0 %v9555_v30 }
 0x1f8   : > { %9553 = vst [vmem:[#allocation19_spill] sm:$0xff] %v7977_v10  ;;  %v7981_v14 = vpack.c.bf16 %v3494_v12, %v3490_v27  ;;  %v3495_v53 = vmax.f32 %v2572_v28, 0.0  ;;  %3049 = vmatprep.mubr.bf16.mxu1 %v9556_v20  ;;  %3242 = vmatprep.mubr.bf16.mxu0 %v9557_v40  ;;  %v2576_v17 = vadd.f32 %v2575_v37, %v7596_v50  ;;  %v9560_v50 = vld [vmem:[#allocation59_spill] sm:$0xff]  ;;  %v9561_v37 = vld [vmem:[#allocation60_spill] sm:$0xff] }
 0x1f9   : > { %v2577_v63 = vpop.f32.mrf.mxu1  ;;  %v7985_v22 = vpop.f32.mrf.mxu0 }
 0x1fa   : > { %9558 = vst [vmem:[#allocation20_spill] sm:$0xff] %v7985_v22  ;;  %v7988_v16 = vpack.c.bf16 %v3495_v53, %v3491_v35  ;;  %v2578_v47 = vadd.f32 %v2577_v63, %v7602_v32  ;;  %v3498_v28 = vmax.f32 %v2576_v17, 0.0  ;;  %v9562_v63 = vld [vmem:[#allocation61_spill] sm:$0xff] }
 0x1fb   : > { %v2579_v62 = vpop.f32.mrf.mxu1  ;;  %v7990_v10 = vpop.f32.mrf.mxu0 }
 0x1fc   : > { %v2580_v3 = vadd.f32 %v2579_v62, %v7606_v36  ;;  %v3499_v35 = vmax.f32 %v2578_v47, 0.0  ;;  %v9563_v36 = vld [vmem:[#allocation62_spill] sm:$0xff] }
 0x1fd   : > { %v2581_v27 = vpop.f32.mrf.mxu1  ;;  %v7994_v12 = vpop.f32.mrf.mxu0 }
 0x1fe   : > { %9559 = vst [vmem:[#allocation87_spill] sm:$0xff] %v7994_v12  ;;  %v3502_v30 = vmax.f32 %v2580_v3, 0.0  ;;  %v2582_v20 = vadd.f32 %v2581_v27, %v7613_v34 }
 0x1ff   : > { %v2585_v40 = vpop.f32.mrf.mxu1  ;;  %v7997_v22 = vpop.f32.mrf.mxu0  ;;  %3050 = vmatmul.mubr.bf16.gmra.mxu1 %v9560_v50  ;;  %3243 = vmatmul.mubr.bf16.gmra.mxu0 %v9561_v37 }
 0x200   : > { %v8001_v53 = vpack.c.bf16 %v3502_v30, %v3498_v28  ;;  %v3503_v32 = vmax.f32 %v2582_v20, 0.0  ;;  %3059 = vmatprep.mubr.bf16.mxu1 %v9562_v63  ;;  %3252 = vmatprep.mubr.bf16.mxu0 %v9563_v36  ;;  %v2586_v34 = vadd.f32 %v2585_v40, %v7621_v13  ;;  %v9566_v13 = vld [vmem:[#allocation63_spill] sm:$0xff]  ;;  %v9567_v40 = vld [vmem:[#allocation64_spill] sm:$0xff] }
 0x201   : > { %v2587_v62 = vpop.f32.mrf.mxu1  ;;  %v8005_v17 = vpop.f32.mrf.mxu0 }
 0x202   : > { %9564 = vst [vmem:[#allocation21_spill] sm:$0xff] %v8005_v17  ;;  %v8008_v3 = vpack.c.bf16 %v3503_v32, %v3499_v35  ;;  %v2588_v50 = vadd.f32 %v2587_v62, %v7627_v52  ;;  %v3506_v20 = vmax.f32 %v2586_v34, 0.0  ;;  %v9568_v62 = vld [vmem:[#allocation65_spill] sm:$0xff] }
 0x203   : > { %v2589_v27 = vpop.f32.mrf.mxu1  ;;  %v8010_v12 = vpop.f32.mrf.mxu0 }
 0x204   : > { %v2590_v47 = vadd.f32 %v2589_v27, %v7631_v19  ;;  %v3507_v35 = vmax.f32 %v2588_v50, 0.0  ;;  %v9569_v19 = vld [vmem:[#allocation66_spill] sm:$0xff] }
 0x205   : > { %v2591_v28 = vpop.f32.mrf.mxu1  ;;  %v8014_v30 = vpop.f32.mrf.mxu0 }
 0x206   : > { %9565 = vst [vmem:[#allocation22_spill] sm:$0xff] %v8014_v30  ;;  %v3510_v37 = vmax.f32 %v2590_v47, 0.0  ;;  %v2592_v63 = vadd.f32 %v2591_v28, %v7638_v4 }
 0x207   : > { %v2595_v36 = vpop.f32.mrf.mxu1  ;;  %v8017_v17 = vpop.f32.mrf.mxu0  ;;  %3060 = vmatmul.mubr.bf16.gmra.mxu1 %v9566_v13  ;;  %3253 = vmatmul.mubr.bf16.gmra.mxu0 %v9567_v40 }
 0x208   : > { %v8021_v32 = vpack.c.bf16 %v3510_v37, %v3506_v20  ;;  %v3511_v52 = vmax.f32 %v2592_v63, 0.0  ;;  %3069 = vmatprep.mubr.bf16.mxu1 %v9568_v62  ;;  %3262 = vmatprep.mubr.bf16.mxu0 %v9569_v19  ;;  %v2596_v4 = vadd.f32 %v2595_v36, %v7646_v46  ;;  %v9572_v46 = vld [vmem:[#allocation67_spill] sm:$0xff]  ;;  %v9573_v36 = vld [vmem:[#allocation68_spill] sm:$0xff] }
 0x209   : > { %v2597_v27 = vpop.f32.mrf.mxu1  ;;  %v8025_v34 = vpop.f32.mrf.mxu0 }
 0x20a   : > { %9570 = vst [vmem:[#allocation88_spill] sm:$0xff] %v8025_v34  ;;  %v8028_v47 = vpack.c.bf16 %v3511_v52, %v3507_v35  ;;  %v2598_v13 = vadd.f32 %v2597_v27, %v7652_v33  ;;  %v3514_v63 = vmax.f32 %v2596_v4, 0.0 }
 0x20b   : > { %v2599_v28 = vpop.f32.mrf.mxu1  ;;  %v8030_v30 = vpop.f32.mrf.mxu0 }
 0x20c   : > { %v2600_v50 = vadd.f32 %v2599_v28, %v7656_v48  ;;  %v3515_v35 = vmax.f32 %v2598_v13, 0.0 }
 0x20d   : > { %v2601_v20 = vpop.f32.mrf.mxu1  ;;  %v8034_v37 = vpop.f32.mrf.mxu0 }
 0x20e   : > { %9571 = vst [vmem:[#allocation90_spill] sm:$0xff] %v8034_v37  ;;  %v3518_v40 = vmax.f32 %v2600_v50, 0.0  ;;  %v2602_v62 = vadd.f32 %v2601_v20, %v7663_v60 }
 0x20f   : > { %v2605_v19 = vpop.f32.mrf.mxu1  ;;  %v8037_v34 = vpop.f32.mrf.mxu0  ;;  %3070 = vmatmul.mubr.bf16.gmra.mxu1 %v9572_v46  ;;  %3263 = vmatmul.mubr.bf16.gmra.mxu0 %v9573_v36 }
 0x210   : > { %v8041_v52 = vpack.c.bf16 %v3518_v40, %v3514_v63  ;;  %v3519_v33 = vmax.f32 %v2602_v62, 0.0  ;;  %4086 = vmatprep.mubr.bf16.mxu0 %v7928_v54  ;;  %3305 = vmatprep.mubr.bf16.mxu1 %v9395_v38  ;;  %v2606_v60 = vadd.f32 %v2605_v19, %v7669_v11  ;;  %v9575_v11 = vld [vmem:[#allocation71_spill] sm:$0xff] }
 0x211   : > { %v2607_v48 = vpop.f32.mrf.mxu1  ;;  %v8045_v27 = vpop.f32.mrf.mxu0 }
 0x212   : > { %v8048_v4 = vpack.c.bf16 %v3519_v33, %v3515_v35  ;;  %v2608_v20 = vadd.f32 %v2607_v48, %v7671_v2  ;;  %v3522_v54 = vmax.f32 %v2606_v60, 0.0 }
 0x213   : > { %v2609_v28 = vpop.f32.mrf.mxu1  ;;  %v8050_v50 = vpop.f32.mrf.mxu0 }
 0x214   : > { %v2610_v13 = vadd.f32 %v2609_v28, %v7679_v1  ;;  %v3523_v19 = vmax.f32 %v2608_v20, 0.0 }
 0x215   : > { %v2611_v63 = vpop.f32.mrf.mxu1  ;;  %v8054_v40 = vpop.f32.mrf.mxu0 }
 0x216   : > { %9574 = vst [vmem:[#allocation91_spill] sm:$0xff] %v8054_v40  ;;  %v3526_v62 = vmax.f32 %v2610_v13, 0.0  ;;  %v2612_v46 = vadd.f32 %v2611_v63, %v7686_v57  ;;  %v9591_v40 = vld [vmem:[#allocation89_spill] sm:$0xff] }
 0x217   : > { %v2615_v36 = vpop.f32.mrf.mxu1  ;;  %v8057_v37 = vpop.f32.mrf.mxu0  ;;  %5260 = vmatmul.mubr.msk.bf16.vlgmr.msra.gmra.mxu1 %vm1873_vm0, %v9575_v11  ;;  %4087 = vmatmul.mubr.bf16.vlgmr.msra.gmra.mxu0 %v7921_v51 }
 0x218   : > { %v8062_v35 = vpack.c.bf16 %v3526_v62, %v3522_v54  ;;  %v3527_v2 = vmax.f32 %v2612_v46, 0.0  ;;  %4096 = vmatprep.mubr.bf16.mxu0 %v7948_v29  ;;  %3315 = vmatprep.mubr.bf16.mxu1 %v9395_v38  ;;  %v2616_v57 = vadd.f32 %v2615_v36, %v7694_v56  ;;  %v9577_v56 = vld [vmem:[#allocation74_spill] sm:$0xff] }
 0x219   : > { %v2617_v1 = vpop.f32.mrf.mxu1  ;;  %v8066_v33 = vpop.f32.mrf.mxu0 }
 0x21a   : > { %v8069_v48 = vpack.c.bf16 %v3527_v2, %v3523_v19  ;;  %v2618_v51 = vadd.f32 %v2617_v1, %v7700_v31  ;;  %v3530_v29 = vmax.f32 %v2616_v57, 0.0 }
 0x21b   : > { %v2619_v60 = vpop.f32.mrf.mxu1  ;;  %v8071_v28 = vpop.f32.mrf.mxu0 }
 0x21c   : > { %v2620_v20 = vadd.f32 %v2619_v60, %v7706_v9  ;;  %v3531_v36 = vmax.f32 %v2618_v51, 0.0 }
 0x21d   : > { %v2621_v13 = vpop.f32.mrf.mxu1  ;;  %v8075_v63 = vpop.f32.mrf.mxu0 }
 0x21e   : > { %9576 = vst [vmem:[#allocation23_spill] sm:$0xff] %v8075_v63  ;;  %v3534_v54 = vmax.f32 %v2620_v20, 0.0  ;;  %v2622_v62 = vadd.f32 %v2621_v13, %v7714_v21  ;;  %v5912_v20 = vld [vmem:[%s9234_s3 + $0x170] ss:$8 sps:$4 sm:$0xff]  }
 0x21f   : > { %v2625_v46 = vpop.f32.mrf.mxu1  ;;  %v8078_v11 = vpop.f32.mrf.mxu0  ;;  %5261 = vmatmul.mubr.msk.bf16.gmra.mxu1 %vm1873_vm0, %v9577_v56  ;;  %4097 = vmatmul.mubr.bf16.gmra.mxu0 %v7941_v0  ;;  %v5914_v0 = vld [vmem:[%s9234_s3 + $0x174] ss:$8 sps:$4 sm:$0xff]  }
 0x220   : > { %v8083_v19 = vpack.c.bf16 %v3534_v54, %v3530_v29  ;;  %v3535_v31 = vmax.f32 %v2622_v62, 0.0  ;;  %4106 = vmatprep.mubr.bf16.mxu0 %v7968_v39  ;;  %3325 = vmatprep.mubr.bf16.mxu1 %v9395_v38  ;;  %v2626_v21 = vadd.f32 %v2625_v46, %v7722_v18 }
 0x221   : > { %v2627_v9 = vpop.f32.mrf.mxu1  ;;  %v8087_v2 = vpop.f32.mrf.mxu0  ;;  %4247 = vmatprep.subr.bf16.mxu1 %v5914_v0 }
 0x222   : > { %v8090_v1 = vpack.c.bf16 %v3535_v31, %v3531_v36  ;;  %v2628_v51 = vadd.f32 %v2627_v9, %v7728_v26  ;;  %v3538_v18 = vmax.f32 %v2626_v21, 0.0  ;;  %4248 = vmatpush1.bf16.msra.mxu1 %v5912_v20  ;;  %v9579_v36 = vld [vmem:[#allocation79_spill] sm:$0xff] }
 0x223   : > { %v2629_v57 = vpop.f32.mrf.mxu1  ;;  %v8092_v60 = vpop.f32.mrf.mxu0  ;;  %v5917_v26 = vld [vmem:[%s9234_s3 + $0x164] ss:$8 sps:$4 sm:$0xff]  }
 0x224   : > { %v2630_v39 = vadd.f32 %v2629_v57, %v7734_v7  ;;  %v3539_v7 = vmax.f32 %v2628_v51, 0.0  ;;  %4249 = vmatprep.subr.bf16.mxu1 %v5917_v26 }
 0x225   : > { %v2631_v13 = vpop.f32.mrf.mxu1  ;;  %v8102_v29 = vpop.f32.mrf.mxu0 }
 0x226   : > { %9578 = vst [vmem:[#allocation24_spill] sm:$0xff] %v8102_v29  ;;  %v3542_v54 = vmax.f32 %v2630_v39, 0.0  ;;  %v2632_v62 = vadd.f32 %v2631_v13, %v7742_v24  ;;  %v5915_v24 = vld [vmem:[%s9234_s3 + $0x160] ss:$8 sps:$4 sm:$0xff]  }
 0x227   : > { %v2635_v46 = vpop.f32.mrf.mxu1  ;;  %v8105_v56 = vpop.f32.mrf.mxu0  ;;  %5262 = vmatmul.mubr.msk.bf16.gmra.mxu1 %vm1873_vm0, %v9579_v36  ;;  %4107 = vmatmul.mubr.bf16.gmra.mxu0 %v7961_v58  ;;  %v9581_v36 = vld [vmem:[#allocation6_spill] sm:$0xff] }
 0x228   : > { %v8113_v31 = vpack.c.bf16 %v3542_v54, %v3538_v18  ;;  %v3543_v9 = vmax.f32 %v2632_v62, 0.0  ;;  %4116 = vmatprep.mubr.bf16.mxu0 %v7988_v16  ;;  %3335 = vmatprep.mubr.bf16.mxu1 %v9395_v38  ;;  %v2636_v58 = vadd.f32 %v2635_v46, %v7750_v55  ;;  %v5920_v16 = vld [vmem:[%s9234_s3 + $0x154] ss:$8 sps:$4 sm:$0xff]   ;;  %v5918_v18 = vld [vmem:[%s9234_s3 + $0x150] ss:$8 sps:$4 sm:$0xff]  }
 0x229   : > { %v2637_v21 = vpop.f32.mrf.mxu1  ;;  %v8120_v57 = vpop.f32.mrf.mxu0  ;;  %4250 = vmatpush1.bf16.msra.mxu1 %v5915_v24  ;;  %v9582_v24 = vld [vmem:[#allocation84_spill] sm:$0xff] }
 0x22a   : > { %v8123_v0 = vpack.c.bf16 %v3543_v9, %v3539_v7  ;;  %v2638_v20 = vadd.f32 %v2637_v21, %v7756_v49  ;;  %4251 = vmatprep.subr.bf16.mxu1 %v5920_v16  ;;  %v3546_v62 = vmax.f32 %v2636_v58, 0.0  ;;  %v5923_v49 = vld [vmem:[%s9234_s3 + $0x144] ss:$8 sps:$4 sm:$0xff]  }
 0x22b   : > { %v2639_v51 = vpop.f32.mrf.mxu1  ;;  %v8125_v39 = vpop.f32.mrf.mxu0 }
 0x22c   : > { %v2640_v13 = vadd.f32 %v2639_v51, %v7762_v42  ;;  %v3547_v42 = vmax.f32 %v2638_v20, 0.0  ;;  %v5921_v51 = vld [vmem:[%s9234_s3 + $0x140] ss:$8 sps:$4 sm:$0xff]  }
 0x22d   : > { %v2641_v54 = vpop.f32.mrf.mxu1  ;;  %v8135_v55 = vpop.f32.mrf.mxu0  ;;  %4252 = vmatpush1.bf16.msra.mxu1 %v5918_v18 }
 0x22e   : > { %9580 = vst [vmem:[#allocation92_spill] sm:$0xff] %v8135_v55  ;;  %v3550_v46 = vmax.f32 %v2640_v13, 0.0  ;;  %v2642_v26 = vadd.f32 %v2641_v54, %v9581_v36  ;;  %4253 = vmatprep.subr.bf16.mxu1 %v5923_v49  ;;  %v5924_v49 = vld [vmem:[%s9234_s3 + $0x130] ss:$8 sps:$4 sm:$0xff]  }
 0x22f   : > { %v2645_v7 = vpop.f32.mrf.mxu1  ;;  %v8138_v9 = vpop.f32.mrf.mxu0  ;;  %5263 = vmatmul.mubr.msk.bf16.gmra.mxu1 %vm1873_vm0, %v9582_v24  ;;  %4117 = vmatmul.mubr.bf16.gmra.mxu0 %v7981_v14  ;;  %v9584_v14 = vld [vmem:[#allocation7_spill] sm:$0xff] }
 0x230   : > { %v8146_v21 = vpack.c.bf16 %v3550_v46, %v3546_v62  ;;  %v3551_v58 = vmax.f32 %v2642_v26, 0.0  ;;  %4126 = vmatprep.mubr.bf16.mxu0 %v8008_v3  ;;  %3345 = vmatprep.mubr.bf16.mxu1 %v9395_v38  ;;  %v2646_v18 = vadd.f32 %v2645_v7, %v9584_v14  ;;  %v5926_v3 = vld [vmem:[%s9234_s3 + $0x134] ss:$8 sps:$4 sm:$0xff]  }
 0x231   : > { %v2647_v16 = vpop.f32.mrf.mxu1  ;;  %v8153_v13 = vpop.f32.mrf.mxu0  ;;  %4254 = vmatpush1.bf16.msra.mxu1 %v5921_v51  ;;  %v9586_v46 = vld [vmem:[#allocation8_spill] sm:$0xff]  ;;  %v9589_v51 = vld [vmem:[#allocation9_spill] sm:$0xff] }
 0x232   : > { %9583 = vst [vmem:[#allocation25_spill] sm:$0xff] %v8153_v13  ;;  %v8156_v54 = vpack.c.bf16 %v3551_v58, %v3547_v42  ;;  %v2648_v36 = vadd.f32 %v2647_v16, %v9586_v46  ;;  %v9587_v26 = vld [vmem:[#allocation72_spill] sm:$0xff]  ;;  %4255 = vmatprep.subr.bf16.mxu1 %v5926_v3  ;;  %v3554_v42 = vmax.f32 %v2646_v18, 0.0  ;;  %v5929_v16 = vld [vmem:[%s9234_s3 + $0x124] ss:$8 sps:$4 sm:$0xff]  }
 0x233   : > { %v2649_v20 = vpop.f32.mrf.mxu1  ;;  %v8158_v62 = vpop.f32.mrf.mxu0 }
 0x234   : > { %9585 = vst [vmem:[#allocation26_spill] sm:$0xff] %v8158_v62  ;;  %v2650_v24 = vadd.f32 %v2649_v20, %v9587_v26  ;;  %v3555_v20 = vmax.f32 %v2648_v36, 0.0 }
 0x235   : > { %v2651_v55 = vpop.f32.mrf.mxu1  ;;  %v8168_v7 = vpop.f32.mrf.mxu0  ;;  %4256 = vmatpush1.bf16.msra.mxu1 %v5924_v49 }
 0x236   : > { %9588 = vst [vmem:[#allocation93_spill] sm:$0xff] %v8168_v7  ;;  %v3558_v58 = vmax.f32 %v2650_v24, 0.0  ;;  %v2652_v14 = vadd.f32 %v2651_v55, %v9589_v51  ;;  %v5927_v55 = vld [vmem:[%s9234_s3 + $0x120] ss:$8 sps:$4 sm:$0xff]   ;;  %4257 = vmatprep.subr.bf16.mxu1 %v5929_v16  ;;  %v9596_v51 = vld [vmem:[#allocation75_spill] sm:$0xff] }
 0x237   : > { %v2655_v29 = vpop.f32.mrf.mxu1  ;;  %v8171_v63 = vpop.f32.mrf.mxu0  ;;  %5264 = vmatmul.mubr.msk.bf16.gmra.mxu1 %vm1873_vm0, %v9591_v40  ;;  %4127 = vmatmul.mubr.bf16.gmra.mxu0 %v8001_v53  ;;  %v9593_v53 = vld [vmem:[#allocation10_spill] sm:$0xff]  ;;  %v5930_v16 = vld [vmem:[%s9234_s3 + $0x110] ss:$8 sps:$4 sm:$0xff]  }
 0x238   : > { %9590 = vst [vmem:[#allocation95_spill] sm:$0xff] %v8171_v63  ;;  %v8179_v46 = vpack.c.bf16 %v3558_v58, %v3554_v42  ;;  %v3559_v18 = vmax.f32 %v2652_v14, 0.0  ;;  %4136 = vmatprep.mubr.bf16.mxu0 %v8028_v47  ;;  %3355 = vmatprep.mubr.bf16.mxu1 %v9395_v38  ;;  %v2656_v26 = vadd.f32 %v2655_v29, %v9593_v53  ;;  %v5932_v47 = vld [vmem:[%s9234_s3 + $0x114] ss:$8 sps:$4 sm:$0xff]   ;;  %v9600_v63 = vld [vmem:[#allocation94_spill] sm:$0xff] }
 0x239   : > { %v2657_v3 = vpop.f32.mrf.mxu1  ;;  %v8186_v40 = vpop.f32.mrf.mxu0  ;;  %4258 = vmatpush1.bf16.msra.mxu1 %v5927_v55  ;;  %v9595_v42 = vld [vmem:[#allocation73_spill] sm:$0xff]  ;;  %v9598_v55 = vld [vmem:[#allocation76_spill] sm:$0xff] }
 0x23a   : > { %9592 = vst [vmem:[#allocation96_spill] sm:$0xff] %v8186_v40  ;;  %v8189_v24 = vpack.c.bf16 %v3559_v18, %v3555_v20  ;;  %v2658_v58 = vadd.f32 %v2657_v3, %v9595_v42  ;;  %4259 = vmatprep.subr.bf16.mxu1 %v5932_v47  ;;  %v3562_v20 = vmax.f32 %v2656_v26, 0.0  ;;  %v5935_v3 = vld [vmem:[%s9234_s3 + $0x104] ss:$8 sps:$4 sm:$0xff]  }
 0x23b   : > { %v2659_v36 = vpop.f32.mrf.mxu1  ;;  %v8191_v49 = vpop.f32.mrf.mxu0 }
 0x23c   : > { %9594 = vst [vmem:[#allocation27_spill] sm:$0xff] %v8191_v49  ;;  %v2660_v14 = vadd.f32 %v2659_v36, %v9596_v51  ;;  %v3563_v36 = vmax.f32 %v2658_v58, 0.0 }
 0x23d   : > { %v2661_v7 = vpop.f32.mrf.mxu1  ;;  %v8201_v29 = vpop.f32.mrf.mxu0  ;;  %4260 = vmatpush1.bf16.msra.mxu1 %v5930_v16 }
 0x23e   : > { %9597 = vst [vmem:[#allocation28_spill] sm:$0xff] %v8201_v29  ;;  %v3566_v18 = vmax.f32 %v2660_v14, 0.0  ;;  %v2662_v53 = vadd.f32 %v2661_v7, %v9598_v55  ;;  %v5933_v7 = vld [vmem:[%s9234_s3 + $0x100] ss:$8 sps:$4 sm:$0xff]   ;;  %4261 = vmatprep.subr.bf16.mxu1 %v5935_v3  ;;  %v5936_v3 = vld [vmem:[%s9234_s3 + $0x1f0] ss:$8 sps:$4 sm:$0xff]  }
 0x23f   : > { %v2665_v49 = vpop.f32.mrf.mxu1  ;;  %v8204_v40 = vpop.f32.mrf.mxu0  ;;  %5265 = vmatmul.mubr.msk.bf16.gmra.mxu1 %vm1873_vm0, %v9600_v63  ;;  %4137 = vmatmul.mubr.bf16.gmra.mxu0 %v8021_v32  ;;  %v9602_v32 = vld [vmem:[#allocation11_spill] sm:$0xff]  ;;  %v9605_v55 = vld [vmem:[#allocation77_spill] sm:$0xff] }
 0x240   : > { %9599 = vst [vmem:[#allocation97_spill] sm:$0xff] %v8204_v40  ;;  %v8212_v42 = vpack.c.bf16 %v3566_v18, %v3562_v20  ;;  %v3567_v26 = vmax.f32 %v2662_v53, 0.0  ;;  %4146 = vmatprep.mubr.bf16.mxu0 %v8048_v4  ;;  %3365 = vmatprep.mubr.bf16.mxu1 %v9395_v38  ;;  %v2666_v51 = vadd.f32 %v2665_v49, %v9602_v32  ;;  %v5938_v4 = vld [vmem:[%s9234_s3 + $0x1f4] ss:$8 sps:$4 sm:$0xff]  }
 0x241   : > { %v2667_v47 = vpop.f32.mrf.mxu1  ;;  %v8219_v63 = vpop.f32.mrf.mxu0  ;;  %4262 = vmatpush1.bf16.msra.mxu1 %v5933_v7  ;;  %v9604_v20 = vld [vmem:[#allocation12_spill] sm:$0xff]  ;;  %v9607_v7 = vld [vmem:[#allocation13_spill] sm:$0xff]  ;;  %v9609_v40 = vld [vmem:[#allocation99_spill] sm:$0xff] }
 0x242   : > { %9601 = vst [vmem:[#allocation29_spill] sm:$0xff] %v8219_v63  ;;  %v8222_v14 = vpack.c.bf16 %v3567_v26, %v3563_v36  ;;  %v2668_v18 = vadd.f32 %v2667_v47, %v9604_v20  ;;  %4263 = vmatprep.subr.bf16.mxu1 %v5938_v4  ;;  %v3570_v36 = vmax.f32 %v2666_v51, 0.0  ;;  %v5941_v47 = vld [vmem:[%s9234_s3 + $0x1e4] ss:$8 sps:$4 sm:$0xff]  }
 0x243   : > { %v2669_v58 = vpop.f32.mrf.mxu1  ;;  %v8224_v16 = vpop.f32.mrf.mxu0 }
 0x244   : > { %9603 = vst [vmem:[#allocation30_spill] sm:$0xff] %v8224_v16  ;;  %v2670_v53 = vadd.f32 %v2669_v58, %v9605_v55  ;;  %v3571_v58 = vmax.f32 %v2668_v18, 0.0 }
 0x245   : > { %v2671_v29 = vpop.f32.mrf.mxu1  ;;  %v8234_v49 = vpop.f32.mrf.mxu0  ;;  %4264 = vmatpush2.bf16.msra.mxu1 %v5936_v3 }
 0x246   : > { %9606 = vst [vmem:[#allocation98_spill] sm:$0xff] %v8234_v49  ;;  %v3574_v26 = vmax.f32 %v2670_v53, 0.0  ;;  %v2672_v32 = vadd.f32 %v2671_v29, %v9607_v7  ;;  %v5939_v29 = vld [vmem:[%s9234_s3 + $0x1e0] ss:$8 sps:$4 sm:$0xff]   ;;  %4265 = vmatprep.subr.bf16.mxu1 %v5941_v47  ;;  %v9615_v49 = vld [vmem:[#allocation80_spill] sm:$0xff] }
 0x247   : > { %v2675_v16 = vpop.f32.mrf.mxu1  ;;  %v8237_v63 = vpop.f32.mrf.mxu0  ;;  %5266 = vmatmul.mubr.msk.bf16.gmra.mxu1 %vm1873_vm0, %v9609_v40  ;;  %4147 = vmatmul.mubr.bf16.gmra.mxu0 %v8041_v52  ;;  %v9611_v52 = vld [vmem:[#allocation14_spill] sm:$0xff] }
 0x248   : > { %9608 = vst [vmem:[#allocation100_spill] sm:$0xff] %v8237_v63  ;;  %v8245_v20 = vpack.c.bf16 %v3574_v26, %v3570_v36  ;;  %v3575_v51 = vmax.f32 %v2672_v32, 0.0  ;;  %4156 = vmatprep.mubr.bf16.mxu0 %v8069_v48  ;;  %3375 = vmatprep.mubr.bf16.mxu1 %v9395_v38  ;;  %v2676_v55 = vadd.f32 %v2675_v16, %v9611_v52  ;;  %v5944_v48 = vld [vmem:[%s9234_s3 + $0x1d4] ss:$8 sps:$4 sm:$0xff]   ;;  %v9614_v7 = vld [vmem:[#allocation78_spill] sm:$0xff] }
 0x249   : > { %v2677_v4 = vpop.f32.mrf.mxu1  ;;  %v8252_v40 = vpop.f32.mrf.mxu0  ;;  %4266 = vmatpush2.bf16.msra.mxu1 %v5939_v29  ;;  %v9613_v36 = vld [vmem:[#allocation69_spill] sm:$0xff]  ;;  %v5942_v16 = vld [vmem:[%s9234_s3 + $0x1d0] ss:$8 sps:$4 sm:$0xff]  }
 0x24a   : > { %9610 = vst [vmem:[#allocation101_spill] sm:$0xff] %v8252_v40  ;;  %v8255_v53 = vpack.c.bf16 %v3575_v51, %v3571_v58  ;;  %v883_v26 = vsub.s32 2, %v9613_v36  ;;  %v2678_v32 = vadd.f32 %v2677_v4, %v9614_v7  ;;  %4267 = vmatprep.subr.bf16.mxu1 %v5944_v48  ;;  %v3578_v51 = vmax.f32 %v2676_v55, 0.0  ;;  %v9617_v52 = vld [vmem:[#allocation81_spill] sm:$0xff]  ;;  %v9618_v4 = vld [vmem:[#allocation104_spill] sm:$0xff] }
 0x24b   : > { %v2679_v18 = vpop.f32.mrf.mxu1  ;;  %v8257_v3 = vpop.f32.mrf.mxu0  ;;  %v887_v40 = vsub.s32 3, %v9613_v36 }
 0x24c   : > { %9612 = vst [vmem:[#allocation31_spill] sm:$0xff] %v8257_v3  ;;  %v2680_v63 = vadd.f32 %v2679_v18, %v9615_v49  ;;  %v5947_v49 = vld [vmem:[%s9234_s3 + $0x1c4] ss:$8 sps:$4 sm:$0xff]   ;;  %v3579_v18 = vmax.f32 %v2678_v32, 0.0 }
 0x24d   : > { %v2681_v47 = vpop.f32.mrf.mxu1  ;;  %v8268_v58 = vpop.f32.mrf.mxu0  ;;  %4268 = vmatpush2.bf16.msra.mxu1 %v5942_v16 }
 0x24e   : > { %9616 = vst [vmem:[#allocation32_spill] sm:$0xff] %v8268_v58  ;;  %v3582_v29 = vmax.f32 %v2680_v63, 0.0  ;;  %v2682_v3 = vadd.f32 %v2681_v47, %v9617_v52  ;;  %v5984_v63 = vld [vmem:[%s9233_s2] sm:$0xf]  ;;  %4269 = vmatprep.subr.bf16.mxu1 %v5947_v49 }
 0x24f   : > { %v2685_v62 = vpop.f32.mrf.mxu1  ;;  %v8272_v13 = vpop.f32.mrf.mxu0  ;;  %5267 = vmatmul.mubr.msk.bf16.gmra.mxu1 %vm1873_vm0, %v9618_v4  ;;  %4157 = vmatmul.mubr.bf16.gmra.mxu0 %v8062_v35  ;;  %v8283_v55 = vrot.slane %v5984_v63, %v883_v26  ;;  %v5945_v35 = vld [vmem:[%s9234_s3 + $0x1c0] ss:$8 sps:$4 sm:$0xff]   ;;  %v8297_v32 = vrot.slane %v5984_v63, %v887_v40 }
 0x250   : > { %v8285_v48 = vpack.c.bf16 %v3582_v29, %v3578_v51  ;;  %v3583_v7 = vmax.f32 %v2682_v3, 0.0  ;;  %4166 = vmatprep.mubr.bf16.mxu0 %v8090_v1  ;;  %3385 = vmatprep.mubr.bf16.mxu1 %v9395_v38  ;;  %v2686_v52 = vadd.f32 %v2685_v62, %v7890_v61  ;;  %v5950_v1 = vld [vmem:[%s9234_s3 + $0x1b4] ss:$8 sps:$4 sm:$0xff]   ;;  %v5948_v61 = vld [vmem:[%s9234_s3 + $0x1b0] ss:$8 sps:$4 sm:$0xff]  }
 0x251   : > { %v2687_v16 = vpop.f32.mrf.mxu1  ;;  %v8292_v47 = vpop.f32.mrf.mxu0  ;;  %4270 = vmatpush2.bf16.msra.mxu1 %v5945_v35  ;;  %v2729_v29 = vadd.f32 %v7899_v8, %v8283_v55  ;;  %v9620_v35 = vld [vmem:[#allocation15_spill] sm:$0xff] }
 0x252   : > { %v8295_v26 = vpack.c.bf16 %v3583_v7, %v3579_v18  ;;  %v2688_v4 = vadd.f32 %v2687_v16, %v7893_v45  ;;  %4271 = vmatprep.subr.bf16.mxu1 %v5950_v1  ;;  %v3586_v63 = vmax.f32 %v2686_v52, 0.0  ;;  %v2731_v8 = vadd.f32 %v9620_v35, %v8297_v32  ;;  %v9621_v16 = vld [vmem:[#allocation109_spill] sm:$0xff] }
 0x253   : > { %v2689_v3 = vpop.f32.mrf.mxu1  ;;  %v8299_v51 = vpop.f32.mrf.mxu0 }
 0x254   : > { %v2690_v49 = vadd.f32 %v2689_v3, %v7896_v23  ;;  %v5953_v23 = vld [vmem:[%s9234_s3 + $0x1a4] ss:$8 sps:$4 sm:$0xff]   ;;  %v3587_v3 = vmax.f32 %v2688_v4, 0.0 }
 0x255   : > { %v2691_v62 = vpop.f32.mrf.mxu1  ;;  %v8311_v40 = vpop.f32.mrf.mxu0  ;;  %4272 = vmatpush2.bf16.msra.mxu1 %v5948_v61 }
 0x256   : > { %9619 = vst [vmem:[#allocation102_spill] sm:$0xff] %v8311_v40  ;;  %v3590_v18 = vmax.f32 %v2690_v49, 0.0  ;;  %v2692_v7 = vadd.f32 %v2691_v62, %v7903_v43  ;;  %v5951_v49 = vld [vmem:[%s9234_s3 + $0x1a0] ss:$8 sps:$4 sm:$0xff]   ;;  %4273 = vmatprep.subr.bf16.mxu1 %v5953_v23 }
 0x257   : > { %v2921_v36 = vpop.f32.mrf.mxu1  ;;  %v3114_v45 = vpop.f32.mrf.mxu0  ;;  %5268 = vmatmul.mubr.msk.bf16.gmra.mxu1 %vm1873_vm0, %v9621_v16  ;;  %4167 = vmatmul.mubr.bf16.gmra.mxu0 %v8083_v19  ;;  %v9622_v19 = vld [vmem:[#allocation16_spill] sm:$0xff] }
 0x258   : > { %v8322_v52 = vpack.c.bf16 %v3590_v18, %v3586_v63  ;;  %v3591_v1 = vmax.f32 %v2692_v7, 0.0  ;;  %v2922_v43 = vadd.f32 %v2921_v36, %v2729_v29  ;;  %4176 = vmatprep.mubr.bf16.mxu0 %v8123_v0  ;;  %3395 = vmatprep.mubr.bf16.mxu1 %v9395_v38  ;;  %v2733_v35 = vadd.f32 %v9622_v19, %v8283_v55  ;;  %v5956_v29 = vld [vmem:[%s9234_s3 + $0x194] ss:$8 sps:$4 sm:$0xff]   ;;  %v9623_v7 = vld [vmem:[#allocation82_spill] sm:$0xff] }
 0x259   : > { %v2923_v61 = vpop.f32.mrf.mxu1  ;;  %v3116_v62 = vpop.f32.mrf.mxu0  ;;  %4274 = vmatpush2.bf16.msra.mxu1 %v5951_v49  ;;  %v2735_v18 = vadd.f32 %v7914_v5, %v8297_v32  ;;  %v2739_v23 = vadd.f32 %v9623_v7, %v8283_v55  ;;  %v9624_v5 = vld [vmem:[#allocation113_spill] sm:$0xff]  ;;  %v2743_v7 = vadd.f32 %v7930_v6, %v8283_v55 }
 0x25a   : > { %v8331_v16 = vadd.f32 %v3114_v45, %v2922_v43  ;;  %v2924_v4 = vadd.f32 %v2923_v61, %v2731_v8  ;;  %v8333_v63 = vpack.c.bf16 %v3591_v1, %v3587_v3  ;;  %v5954_v8 = vld [vmem:[%s9234_s3 + $0x190] ss:$8 sps:$4 sm:$0xff]   ;;  %4275 = vmatprep.subr.bf16.mxu1 %v5956_v29  ;;  %v5957_v29 = vld [vmem:[%s9234_s3 + $0x180] ss:$8 sps:$4 sm:$0xff]  }
 0x25b   : > { %v2925_v36 = vpop.f32.mrf.mxu1  ;;  %v3118_v0 = vpop.f32.mrf.mxu0 }
 0x25c   : > { %v8342_v40 = vadd.f32 %v3116_v62, %v2924_v4  ;;  %v2926_v45 = vadd.f32 %v2925_v36, %v2733_v35  ;;  %v5959_v62 = vld [vmem:[%s9234_s3 + $0x184] ss:$8 sps:$4 sm:$0xff]  }
 0x25d   : > { %v2927_v3 = vpop.f32.mrf.mxu1  ;;  %v3120_v1 = vpop.f32.mrf.mxu0  ;;  %4276 = vmatpush2.bf16.msra.mxu1 %v5954_v8  ;;  %v9625_v35 = vld [vmem:[#allocation17_spill] sm:$0xff] }
 0x25e   : > { %v8347_v43 = vadd.f32 %v3118_v0, %v2926_v45  ;;  %v2928_v49 = vadd.f32 %v2927_v3, %v2735_v18  ;;  %v2741_v4 = vadd.f32 %v9625_v35, %v8297_v32  ;;  %4277 = vmatprep.subr.bf16.mxu1 %v5959_v62 }
 0x25f   : > { %v2931_v61 = vpop.f32.mrf.mxu1  ;;  %v3124_v19 = vpop.f32.mrf.mxu0  ;;  %5269 = vmatmul.mubr.msk.bf16.gmra.mxu1 %vm1873_vm0, %v9624_v5  ;;  %4177 = vmatmul.mubr.bf16.gmra.mxu0 %v8113_v31 }
 0x260   : > { %v8357_v36 = vadd.f32 %v3120_v1, %v2928_v49  ;;  %v2932_v0 = vadd.f32 %v2931_v61, %v2739_v23  ;;  %4186 = vmatprep.mubr.bf16.mxu0 %v8156_v54  ;;  %3405 = vmatprep.mubr.bf16.mxu1 %v9395_v38  ;;  %v2745_v54 = vadd.f32 %v7934_v41, %v8297_v32  ;;  %v9626_v1 = vld [vmem:[#allocation18_spill] sm:$0xff]  ;;  %v9628_v41 = vld [vmem:[#allocation83_spill] sm:$0xff] }
 0x261   : > { %v2933_v18 = vpop.f32.mrf.mxu1  ;;  %v3126_v31 = vpop.f32.mrf.mxu0  ;;  %4278 = vmatpush2.bf16.msra.mxu1 %v5957_v29  ;;  %v2749_v49 = vadd.f32 %v9626_v1, %v8283_v55  ;;  %v2751_v29 = vadd.f32 %v9628_v41, %v8297_v32 }
 0x262   : > { %v8366_v45 = vadd.f32 %v3124_v19, %v2932_v0  ;;  %v2934_v8 = vadd.f32 %v2933_v18, %v2741_v4  ;;  %v9627_v4 = vld [vmem:[#allocation114_spill] sm:$0xff] }
 0x263   : > { %v2935_v3 = vpop.f32.mrf.mxu1  ;;  %v3128_v23 = vpop.f32.mrf.mxu0 }
 0x264   : > { %v8372_v61 = vadd.f32 %v3126_v31, %v2934_v8  ;;  %v2936_v5 = vadd.f32 %v2935_v3, %v2743_v7  ;;  %v2753_v3 = vadd.f32 %v7950_v15, %v8283_v55 }
 0x265   : > { %v2937_v35 = vpop.f32.mrf.mxu1  ;;  %v3130_v62 = vpop.f32.mrf.mxu0 }
 0x266   : > { %v8374_v58 = vadd.f32 %v3128_v23, %v2936_v5  ;;  %v2938_v6 = vadd.f32 %v2937_v35, %v2745_v54  ;;  %v2755_v5 = vadd.f32 %v7954_v25, %v8297_v32  ;;  %v9629_v35 = vld [vmem:[#allocation85_spill] sm:$0xff]  ;;  %v9631_v25 = vld [vmem:[#allocation86_spill] sm:$0xff] }
 0x267   : > { %v2941_v19 = vpop.f32.mrf.mxu1  ;;  %v3134_v0 = vpop.f32.mrf.mxu0  ;;  %5270 = vmatmul.mubr.msk.bf16.gmra.mxu1 %vm1873_vm0, %v9627_v4  ;;  %4187 = vmatmul.mubr.bf16.gmra.mxu0 %v8146_v21 }
 0x268   : > { %v8381_v18 = vadd.f32 %v3130_v62, %v2938_v6  ;;  %v2942_v31 = vadd.f32 %v2941_v19, %v2749_v49  ;;  %4196 = vmatprep.mubr.bf16.mxu0 %v8189_v24  ;;  %3415 = vmatprep.mubr.bf16.mxu1 %v9395_v38  ;;  %v2759_v49 = vadd.f32 %v9629_v35, %v8283_v55 }
 0x269   : > { %v2943_v7 = vpop.f32.mrf.mxu1  ;;  %v3136_v8 = vpop.f32.mrf.mxu0 }
 0x26a   : > { %v8387_v23 = vadd.f32 %v3134_v0, %v2942_v31  ;;  %v2944_v54 = vadd.f32 %v2943_v7, %v2751_v29  ;;  %v9630_v31 = vld [vmem:[#allocation115_spill] sm:$0xff]  ;;  %v2761_v29 = vadd.f32 %v9631_v25, %v8297_v32 }
 0x26b   : > { %v2945_v1 = vpop.f32.mrf.mxu1  ;;  %v3138_v21 = vpop.f32.mrf.mxu0 }
 0x26c   : > { %v8393_v62 = vadd.f32 %v3136_v8, %v2944_v54  ;;  %v2946_v24 = vadd.f32 %v2945_v1, %v2753_v3  ;;  %v2763_v1 = vadd.f32 %v7970_v59, %v8283_v55 }
 0x26d   : > { %v2947_v6 = vpop.f32.mrf.mxu1  ;;  %v3140_v19 = vpop.f32.mrf.mxu0 }
 0x26e   : > { %v8395_v4 = vadd.f32 %v3138_v21, %v2946_v24  ;;  %v2948_v41 = vadd.f32 %v2947_v6, %v2755_v5  ;;  %v2765_v24 = vadd.f32 %v7974_v44, %v8297_v32  ;;  %v9632_v6 = vld [vmem:[#allocation19_spill] sm:$0xff]  ;;  %v9634_v44 = vld [vmem:[#allocation20_spill] sm:$0xff] }
 0x26f   : > { %v2951_v15 = vpop.f32.mrf.mxu1  ;;  %v3144_v0 = vpop.f32.mrf.mxu0  ;;  %5271 = vmatmul.mubr.msk.bf16.gmra.mxu1 %vm1873_vm0, %v9630_v31  ;;  %4197 = vmatmul.mubr.bf16.gmra.mxu0 %v8179_v46 }
 0x270   : > { %v8402_v7 = vadd.f32 %v3140_v19, %v2948_v41  ;;  %v2952_v8 = vadd.f32 %v2951_v15, %v2759_v49  ;;  %4206 = vmatprep.mubr.bf16.mxu0 %v8222_v14  ;;  %3425 = vmatprep.mubr.bf16.mxu1 %v9395_v38  ;;  %v2769_v49 = vadd.f32 %v9632_v6, %v8283_v55 }
 0x271   : > { %v2953_v3 = vpop.f32.mrf.mxu1  ;;  %v3146_v54 = vpop.f32.mrf.mxu0  ;;  %v2779_v6 = vadd.f32 %v7997_v22, %v8283_v55 }
 0x272   : > { %v8408_v21 = vadd.f32 %v3144_v0, %v2952_v8  ;;  %v2954_v5 = vadd.f32 %v2953_v3, %v2761_v29  ;;  %v9633_v29 = vld [vmem:[#allocation116_spill] sm:$0xff]  ;;  %v2771_v8 = vadd.f32 %v9634_v44, %v8297_v32 }
 0x273   : > { %v2955_v35 = vpop.f32.mrf.mxu1  ;;  %v3148_v46 = vpop.f32.mrf.mxu0 }
 0x274   : > { %v8414_v19 = vadd.f32 %v3146_v54, %v2954_v5  ;;  %v2956_v14 = vadd.f32 %v2955_v35, %v2763_v1  ;;  %v2773_v35 = vadd.f32 %v7990_v10, %v8283_v55  ;;  %v9636_v10 = vld [vmem:[#allocation21_spill] sm:$0xff] }
 0x275   : > { %v2957_v41 = vpop.f32.mrf.mxu1  ;;  %v3150_v15 = vpop.f32.mrf.mxu0 }
 0x276   : > { %v8416_v31 = vadd.f32 %v3148_v46, %v2956_v14  ;;  %v2958_v25 = vadd.f32 %v2957_v41, %v2765_v24 }
 0x277   : > { %v2961_v59 = vpop.f32.mrf.mxu1  ;;  %v8418_v0 = vpop.f32.mrf.mxu0  ;;  %5272 = vmatmul.mubr.msk.bf16.gmra.mxu1 %vm1873_vm0, %v9633_v29  ;;  %4207 = vmatmul.mubr.bf16.gmra.mxu0 %v8212_v42 }
 0x278   : > { %v8425_v3 = vadd.f32 %v3150_v15, %v2958_v25  ;;  %v8427_v54 = vadd.f32 %v2961_v59, %v2769_v49  ;;  %4216 = vmatprep.mubr.bf16.mxu0 %v8255_v53  ;;  %3435 = vmatprep.mubr.bf16.mxu1 %v9395_v38  ;;  %v9635_v25 = vld [vmem:[#allocation117_spill] sm:$0xff]  ;;  %v2781_v59 = vadd.f32 %v9636_v10, %v8297_v32 }
 0x279   : > { %v2963_v1 = vpop.f32.mrf.mxu1  ;;  %v8431_v5 = vpop.f32.mrf.mxu0 }
 0x27a   : > { %v8435_v46 = vadd.f32 %v2963_v1, %v2771_v8  ;;  %v2783_v8 = vadd.f32 %v8010_v12, %v8283_v55  ;;  %v9641_v12 = vld [vmem:[#allocation88_spill] sm:$0xff] }
 0x27b   : > { %v2965_v42 = vpop.f32.mrf.mxu1  ;;  %v8437_v24 = vpop.f32.mrf.mxu0 }
 0x27c   : > { %v8441_v49 = vadd.f32 %v2965_v42, %v2773_v35 }
 0x27d   : > { %v8443_v14 = vpop.f32.mrf.mxu1  ;;  %v8445_v53 = vpop.f32.mrf.mxu0 }
 0x27f   : > { %v2971_v41 = vpop.f32.mrf.mxu1  ;;  %v8447_v15 = vpop.f32.mrf.mxu0  ;;  %5273 = vmatmul.mubr.msk.bf16.gmra.mxu1 %vm1873_vm0, %v9635_v25  ;;  %4217 = vmatmul.mubr.bf16.gmra.mxu0 %v8245_v20  ;;  %v2789_v20 = vadd.f32 %v8017_v17, %v8283_v55 }
 0x280   : > { %v8454_v29 = vadd.f32 %v2971_v41, %v2779_v6  ;;  %4226 = vmatprep.mubr.bf16.mxu0 %v8295_v26  ;;  %3445 = vmatprep.mubr.bf16.mxu1 %v9395_v38 }
 0x281   : > { %v2973_v22 = vpop.f32.mrf.mxu1  ;;  %v8458_v44 = vpop.f32.mrf.mxu0 }
 0x282   : > { %9637 = vst [vmem:[#allocation33_spill] sm:$0xff] %v8458_v44  ;;  %v8462_v1 = vadd.f32 %v2973_v22, %v2781_v59  ;;  %v9640_v44 = vld [vmem:[#allocation118_spill] sm:$0xff]  ;;  %v2791_v59 = vadd.f32 %v9641_v12, %v8297_v32  ;;  %v9645_v12 = vld [vmem:[#allocation119_spill] sm:$0xff] }
 0x283   : > { %v2975_v35 = vpop.f32.mrf.mxu1  ;;  %v8464_v42 = vpop.f32.mrf.mxu0 }
 0x284   : > { %v8468_v6 = vadd.f32 %v2975_v35, %v2783_v8  ;;  %v2793_v35 = vadd.f32 %v8030_v30, %v8283_v55  ;;  %v2801_v30 = vadd.f32 %v8045_v27, %v8297_v32 }
 0x285   : > { %v8470_v41 = vpop.f32.mrf.mxu1  ;;  %v8472_v26 = vpop.f32.mrf.mxu0 }
 0x286   : > { %9638 = vst [vmem:[#allocation34_spill] sm:$0xff] %v8472_v26 }
 0x287   : > { %v2981_v25 = vpop.f32.mrf.mxu1  ;;  %v8474_v10 = vpop.f32.mrf.mxu0  ;;  %5274 = vmatmul.mubr.msk.bf16.gmra.mxu1 %vm1873_vm0, %v9640_v44  ;;  %4227 = vmatmul.mubr.bf16.gmra.mxu0 %v8285_v48  ;;  %v2799_v48 = vadd.f32 %v8037_v34, %v8283_v55  ;;  %v2803_v34 = vadd.f32 %v8050_v50, %v8283_v55 }
 0x288   : > { %9639 = vst [vmem:[#allocation103_spill] sm:$0xff] %v8474_v10  ;;  %v8481_v22 = vadd.f32 %v2981_v25, %v2789_v20  ;;  %4236 = vmatprep.mubr.bf16.mxu0 %v8333_v63  ;;  %3455 = vmatprep.mubr.bf16.mxu1 %v9395_v38 }
 0x289   : > { %v2983_v17 = vpop.f32.mrf.mxu1  ;;  %v8485_v8 = vpop.f32.mrf.mxu0 }
 0x28a   : > { %v8489_v10 = vadd.f32 %v2983_v17, %v2791_v59 }
 0x28b   : > { %v2985_v44 = vpop.f32.mrf.mxu1  ;;  %v8491_v26 = vpop.f32.mrf.mxu0 }
 0x28c   : > { %9642 = vst [vmem:[#allocation105_spill] sm:$0xff] %v8491_v26  ;;  %v8495_v20 = vadd.f32 %v2985_v44, %v2793_v35  ;;  %v2809_v26 = vadd.f32 %v8057_v37, %v8283_v55 }
 0x28d   : > { %v8497_v25 = vpop.f32.mrf.mxu1  ;;  %v8499_v63 = vpop.f32.mrf.mxu0 }
 0x28e   : > { %9643 = vst [vmem:[#allocation106_spill] sm:$0xff] %v8495_v20  ;;  %9644 = vst [vmem:[#allocation35_spill] sm:$0xff] %v8499_v63 }
 0x28f   : > { %v2991_v38 = vpop.f32.mrf.mxu1  ;;  %5275 = vmatmul.mubr.msk.bf16.gmra.mxu1 %vm1873_vm0, %v9645_v12  ;;  %4237 = vmatmul.mubr.bf16.gmra.mxu0 %v8322_v52  ;;  %v8512_v44 = vpop.f32.mrf.mxu0 }
 0x290   : > { %v8506_v59 = vadd.f32 %v2991_v38, %v2799_v48  ;;  %v2811_v48 = vadd.f32 %v8066_v33, %v8297_v32 }
 0x291   : > { %v2993_v17 = vpop.f32.mrf.mxu1  ;;  %v8520_v20 = vpop.f32.mrf.mxu0 }
 0x292   : > { %v8510_v35 = vadd.f32 %v2993_v17, %v2801_v30  ;;  %9648 = vst [vmem:[#allocation37_spill] sm:$0xff] %v8520_v20  ;;  %v2813_v30 = vadd.f32 %v8071_v28, %v8283_v55 }
 0x293   : > { %v2995_v63 = vpop.f32.mrf.mxu1 }
 0x294   : > { %9646 = vst [vmem:[#allocation36_spill] sm:$0xff] %v8510_v35  ;;  %v8516_v12 = vadd.f32 %v2995_v63, %v2803_v34  ;;  %v8530_v35 = vpop.f32.mrf.mxu0  ;;  %v2819_v63 = vadd.f32 %v8078_v11, %v8283_v55 }
 0x295   : > { %v8518_v52 = vpop.f32.mrf.mxu1 }
 0x296   : > { %9647 = vst [vmem:[#allocation107_spill] sm:$0xff] %v8516_v12  ;;  %v8538_v20 = vpop.f32.mrf.mxu0 }
 0x297   : > { %v3001_v27 = vpop.f32.mrf.mxu1 }
 0x298   : > { %v8524_v38 = vadd.f32 %v3001_v27, %v2809_v26  ;;  %v2821_v26 = vadd.f32 %v8087_v2, %v8297_v32 }
 0x299   : > { %v3003_v50 = vpop.f32.mrf.mxu1 }
 0x29a   : > { %v8528_v17 = vadd.f32 %v3003_v50, %v2811_v48  ;;  %v2823_v48 = vadd.f32 %v8092_v60, %v8283_v55 }
 0x29b   : > { %v3005_v37 = vpop.f32.mrf.mxu1 }
 0x29c   : > { %9649 = vst [vmem:[#allocation38_spill] sm:$0xff] %v8528_v17  ;;  %v8534_v34 = vadd.f32 %v3005_v37, %v2813_v30  ;;  %v8548_v17 = vpop.f32.mrf.mxu0  ;;  %v2829_v30 = vadd.f32 %v8105_v56, %v8283_v55 }
 0x29d   : > { %v8536_v12 = vpop.f32.mrf.mxu1 }
 0x29e   : > { %9650 = vst [vmem:[#allocation108_spill] sm:$0xff] %v8534_v34  ;;  %9651 = vst [vmem:[#allocation110_spill] sm:$0xff] %v8536_v12  ;;  %v8556_v12 = vpop.f32.mrf.mxu0 }
 0x29f   : > { %v3011_v33 = vpop.f32.mrf.mxu1 }
 0x2a0   : > { %v8542_v27 = vadd.f32 %v3011_v33, %v2819_v63  ;;  %v2831_v63 = vadd.f32 %v8120_v57, %v8297_v32 }
 0x2a1   : > { %v3013_v28 = vpop.f32.mrf.mxu1 }
 0x2a2   : > { %9652 = vst [vmem:[#allocation111_spill] sm:$0xff] %v8542_v27  ;;  %v8546_v50 = vadd.f32 %v3013_v28, %v2821_v26  ;;  %v2833_v26 = vadd.f32 %v8125_v39, %v8283_v55 }
 0x2a3   : > { %v3015_v11 = vpop.f32.mrf.mxu1 }
 0x2a4   : > { %9653 = vst [vmem:[#allocation39_spill] sm:$0xff] %v8546_v50  ;;  %v8552_v37 = vadd.f32 %v3015_v11, %v2823_v48  ;;  %v8566_v50 = vpop.f32.mrf.mxu0  ;;  %v2839_v48 = vadd.f32 %v8138_v9, %v8283_v55 }
 0x2a5   : > { %v8554_v34 = vpop.f32.mrf.mxu1 }
 0x2a6   : > { %9654 = vst [vmem:[#allocation40_spill] sm:$0xff] %v8552_v37  ;;  %9655 = vst [vmem:[#allocation41_spill] sm:$0xff] %v8554_v34  ;;  %v8574_v34 = vpop.f32.mrf.mxu0 }
 0x2a7   : > { %v3021_v2 = vpop.f32.mrf.mxu1  ;;  %9660 = vst [vmem:[#allocation45_spill] sm:$0xff] %v8574_v34 }
 0x2a8   : > { %v8560_v33 = vadd.f32 %v3021_v2, %v2829_v30  ;;  %v9661_v30 = vld [vmem:[#allocation25_spill] sm:$0xff]  ;;  %v8584_v27 = vpop.f32.mrf.mxu0 }
 0x2a9   : > { %v3023_v60 = vpop.f32.mrf.mxu1  ;;  %v2841_v2 = vadd.f32 %v9661_v30, %v8297_v32  ;;  %9665 = vst [vmem:[#allocation48_spill] sm:$0xff] %v8584_v27 }
 0x2aa   : > { %9656 = vst [vmem:[#allocation42_spill] sm:$0xff] %v8560_v33  ;;  %v8564_v28 = vadd.f32 %v3023_v60, %v2831_v63  ;;  %v9663_v63 = vld [vmem:[#allocation26_spill] sm:$0xff]  ;;  %v8592_v34 = vpop.f32.mrf.mxu0 }
 0x2ab   : > { %v3025_v56 = vpop.f32.mrf.mxu1  ;;  %v2843_v60 = vadd.f32 %v9663_v63, %v8283_v55  ;;  %9669 = vst [vmem:[#allocation51_spill] sm:$0xff] %v8592_v34 }
 0x2ac   : > { %9657 = vst [vmem:[#allocation112_spill] sm:$0xff] %v8564_v28  ;;  %v8570_v11 = vadd.f32 %v3025_v56, %v2833_v26  ;;  %v9666_v26 = vld [vmem:[#allocation95_spill] sm:$0xff]  ;;  %v8602_v27 = vpop.f32.mrf.mxu0 }
 0x2ad   : > { %v8572_v37 = vpop.f32.mrf.mxu1  ;;  %v2849_v56 = vadd.f32 %v9666_v26, %v8283_v55  ;;  %9674 = vst [vmem:[#allocation54_spill] sm:$0xff] %v8602_v27 }
 0x2ae   : > { %9658 = vst [vmem:[#allocation43_spill] sm:$0xff] %v8570_v11  ;;  %9659 = vst [vmem:[#allocation44_spill] sm:$0xff] %v8572_v37  ;;  %v8610_v34 = vpop.f32.mrf.mxu0 }
 0x2af   : > { %v3031_v57 = vpop.f32.mrf.mxu1  ;;  %9678 = vst [vmem:[#allocation57_spill] sm:$0xff] %v8610_v34 }
 0x2b0   : > { %v8578_v33 = vadd.f32 %v3031_v57, %v2839_v48  ;;  %v9670_v57 = vld [vmem:[#allocation96_spill] sm:$0xff]  ;;  %v8620_v27 = vpop.f32.mrf.mxu0 }
 0x2b1   : > { %v3033_v39 = vpop.f32.mrf.mxu1  ;;  %v2851_v30 = vadd.f32 %v9670_v57, %v8297_v32  ;;  %9683 = vst [vmem:[#allocation60_spill] sm:$0xff] %v8620_v27 }
 0x2b2   : > { %9662 = vst [vmem:[#allocation46_spill] sm:$0xff] %v8578_v33  ;;  %v8582_v28 = vadd.f32 %v3033_v39, %v2841_v2  ;;  %v9672_v39 = vld [vmem:[#allocation27_spill] sm:$0xff]  ;;  %v8628_v34 = vpop.f32.mrf.mxu0 }
 0x2b3   : > { %v3035_v9 = vpop.f32.mrf.mxu1  ;;  %v2853_v63 = vadd.f32 %v9672_v39, %v8283_v55 }
 0x2b4   : > { %9664 = vst [vmem:[#allocation47_spill] sm:$0xff] %v8582_v28  ;;  %v8588_v11 = vadd.f32 %v3035_v9, %v2843_v60  ;;  %v9675_v9 = vld [vmem:[#allocation97_spill] sm:$0xff]  ;;  %v8638_v27 = vpop.f32.mrf.mxu0 }
 0x2b5   : > { %v8590_v37 = vpop.f32.mrf.mxu1  ;;  %v2859_v26 = vadd.f32 %v9675_v9, %v8283_v55 }
 0x2b6   : > { %9667 = vst [vmem:[#allocation49_spill] sm:$0xff] %v8588_v11  ;;  %9668 = vst [vmem:[#allocation50_spill] sm:$0xff] %v8590_v37 }
 0x2b7   : > { %v3041_v48 = vpop.f32.mrf.mxu1 }
 0x2b8   : > { %v8596_v33 = vadd.f32 %v3041_v48, %v2849_v56  ;;  %v9679_v48 = vld [vmem:[#allocation29_spill] sm:$0xff] }
 0x2b9   : > { %v3043_v2 = vpop.f32.mrf.mxu1  ;;  %v2861_v57 = vadd.f32 %v9679_v48, %v8297_v32 }
 0x2ba   : > { %9671 = vst [vmem:[#allocation52_spill] sm:$0xff] %v8596_v33  ;;  %v8600_v28 = vadd.f32 %v3043_v2, %v2851_v30  ;;  %v9681_v2 = vld [vmem:[#allocation30_spill] sm:$0xff] }
 0x2bb   : > { %v3045_v60 = vpop.f32.mrf.mxu1  ;;  %v2863_v39 = vadd.f32 %v9681_v2, %v8283_v55 }
 0x2bc   : > { %9673 = vst [vmem:[#allocation53_spill] sm:$0xff] %v8600_v28  ;;  %v8606_v11 = vadd.f32 %v3045_v60, %v2853_v63  ;;  %v9684_v60 = vld [vmem:[#allocation100_spill] sm:$0xff] }
 0x2bd   : > { %v8608_v37 = vpop.f32.mrf.mxu1  ;;  %v2869_v9 = vadd.f32 %v9684_v60, %v8283_v55 }
 0x2be   : > { %9676 = vst [vmem:[#allocation55_spill] sm:$0xff] %v8606_v11  ;;  %9677 = vst [vmem:[#allocation56_spill] sm:$0xff] %v8608_v37 }
 0x2bf   : > { %v3051_v56 = vpop.f32.mrf.mxu1 }
 0x2c0   : > { %v8614_v33 = vadd.f32 %v3051_v56, %v2859_v26  ;;  %v9687_v56 = vld [vmem:[#allocation101_spill] sm:$0xff] }
 0x2c1   : > { %v3053_v30 = vpop.f32.mrf.mxu1  ;;  %v2871_v48 = vadd.f32 %v9687_v56, %v8297_v32 }
 0x2c2   : > { %9680 = vst [vmem:[#allocation58_spill] sm:$0xff] %v8614_v33  ;;  %v8618_v28 = vadd.f32 %v3053_v30, %v2861_v57  ;;  %v9689_v30 = vld [vmem:[#allocation31_spill] sm:$0xff] }
 0x2c3   : > { %v3055_v63 = vpop.f32.mrf.mxu1  ;;  %v2873_v2 = vadd.f32 %v9689_v30, %v8283_v55 }
 0x2c4   : > { %9682 = vst [vmem:[#allocation59_spill] sm:$0xff] %v8618_v28  ;;  %v8624_v11 = vadd.f32 %v3055_v63, %v2863_v39  ;;  %v2879_v63 = vadd.f32 %v8272_v13, %v8283_v55 }
 0x2c5   : > { %v8626_v37 = vpop.f32.mrf.mxu1 }
 0x2c6   : > { %9685 = vst [vmem:[#allocation61_spill] sm:$0xff] %v8624_v11  ;;  %9686 = vst [vmem:[#allocation62_spill] sm:$0xff] %v8626_v37  ;;  %v8646_v37 = vpop.f32.mrf.mxu0 }
 0x2c7   : > { %v3061_v26 = vpop.f32.mrf.mxu1 }
 0x2c8   : > { %v8632_v33 = vadd.f32 %v3061_v26, %v2869_v9  ;;  %v2881_v26 = vadd.f32 %v8292_v47, %v8297_v32 }
 0x2c9   : > { %v3063_v57 = vpop.f32.mrf.mxu1 }
 0x2ca   : > { %9688 = vst [vmem:[#allocation63_spill] sm:$0xff] %v8632_v33  ;;  %v8636_v28 = vadd.f32 %v3063_v57, %v2871_v48  ;;  %v2883_v57 = vadd.f32 %v8299_v51, %v8283_v55 }
 0x2cb   : > { %v3065_v39 = vpop.f32.mrf.mxu1 }
 0x2cc   : > { %9690 = vst [vmem:[#allocation64_spill] sm:$0xff] %v8636_v28  ;;  %v8642_v60 = vadd.f32 %v3065_v39, %v2873_v2  ;;  %v8656_v28 = vpop.f32.mrf.mxu0 }
 0x2cd   : > { %v8644_v11 = vpop.f32.mrf.mxu1 }
 0x2ce   : > { %9691 = vst [vmem:[#allocation65_spill] sm:$0xff] %v8642_v60  ;;  %9692 = vst [vmem:[#allocation66_spill] sm:$0xff] %v8644_v11  ;;  %v8662_v60 = vpop.f32.mrf.mxu0 }
 0x2cf   : > { %v3071_v9 = vpop.f32.mrf.mxu1 }
 0x2d0   : > { %v8650_v56 = vadd.f32 %v3071_v9, %v2879_v63  ;;  %v8665_v63 = vpop.f32.mrf.mxu0 }
 0x2d1   : > { %v3073_v48 = vpop.f32.mrf.mxu1 }
 0x2d2   : > { %9693 = vst [vmem:[#allocation67_spill] sm:$0xff] %v8650_v56  ;;  %v8654_v30 = vadd.f32 %v3073_v48, %v2881_v26  ;;  %v5960_v48 = vld [vmem:[%s9236_s5 + $0x78] sm:$0xff]  }
 0x2d3   : > { %v3075_v13 = vpop.f32.mrf.mxu1  ;;  %5365 = vmatprep.subr.bf16.mxu0 %v5960_v48 }
 0x2d4   : > { %9694 = vst [vmem:[#allocation68_spill] sm:$0xff] %v8654_v30  ;;  %v8658_v2 = vadd.f32 %v3075_v13, %v2883_v57  ;;  %v5961_v57 = vld [vmem:[%s9236_s5 + $0x38] sm:$0xff]  }
 0x2d5   : > { %v8660_v39 = vpop.f32.mrf.mxu1  ;;  %5366 = vmatpush3.bf16.msra.mxu0 %v5961_v57  ;;  %v5965_v57 = vld [vmem:[%s9236_s5 + $0x28] sm:$0xff]  }
 0x2d6   : > { %9695 = vst [vmem:[#allocation71_spill] sm:$0xff] %v8658_v2  ;;  %9696 = vst [vmem:[#allocation74_spill] sm:$0xff] %v8660_v39  ;;  %v5963_v39 = vld [vmem:[%s9236_s5 + $0x30] sm:$0xff]  }
 0x2d7   : > { %v3307_v11 = vpop.f32.mrf.mxu1 }
 0x2d8   : > { %v3308_v47 = vadd.f32 %v3307_v11, %v8331_v16  ;;  %v5962_v16 = vld [vmem:[%s9236_s5 + $0x70] sm:$0xff]  }
 0x2d9   : > { %v3309_v33 = vpop.f32.mrf.mxu1  ;;  %5367 = vmatprep.subr.bf16.mxu0 %v5962_v16 }
 0x2da   : > { %v3310_v55 = vadd.f32 %v3309_v33, %v8342_v40  ;;  %v3468_v11 = vmax.f32 %v3308_v47, 0.0  ;;  %v8679_v40 = vpop.f32.mrf.mxu0  ;;  %v5964_v47 = vld [vmem:[%s9236_s5 + $0x68] sm:$0xff]   ;;  %5368 = vmatpush3.bf16.msra.mxu0 %v5963_v39 }
 0x2db   : > { %v3311_v9 = vpop.f32.mrf.mxu1  ;;  %5369 = vmatprep.subr.bf16.mxu0 %v5964_v47  ;;  %v5968_v47 = vld [vmem:[%s9236_s5 + $0x58] sm:$0xff]  }
 0x2dc   : > { %v3312_v51 = vadd.f32 %v3311_v9, %v8347_v43  ;;  %v3469_v33 = vmax.f32 %v3310_v55, 0.0 }
 0x2dd   : > { %v3313_v26 = vpop.f32.mrf.mxu1 }
 0x2de   : > { %v3472_v13 = vmax.f32 %v3312_v51, 0.0  ;;  %v3314_v2 = vadd.f32 %v3313_v26, %v8357_v36  ;;  %v8688_v26 = vpop.f32.mrf.mxu0  ;;  %5370 = vmatpush3.bf16.msra.mxu0 %v5965_v57  ;;  %v5969_v57 = vld [vmem:[%s9236_s5 + $0x18] sm:$0xff]  }
 0x2df   : > { %v3317_v43 = vpop.f32.mrf.mxu1 }
 0x2e0   : > { %v3596_v9 = vpack.c.bf16 %v3472_v13, %v3468_v11  ;;  %v3473_v30 = vmax.f32 %v3314_v2, 0.0  ;;  %v3318_v36 = vadd.f32 %v3317_v43, %v8366_v45  ;;  %v5966_v45 = vld [vmem:[%s9236_s5 + $0x60] sm:$0xff]  }
 0x2e1   : > { %v3319_v56 = vpop.f32.mrf.mxu1  ;;  %5371 = vmatprep.subr.bf16.mxu0 %v5966_v45 }
 0x2e2   : > { %v3597_v51 = vpack.c.bf16 %v3473_v30, %v3469_v33  ;;  %v3320_v55 = vadd.f32 %v3319_v56, %v8372_v61  ;;  %v3476_v30 = vmax.f32 %v3318_v36, 0.0  ;;  %v8699_v61 = vpop.f32.mrf.mxu0  ;;  %v5967_v33 = vld [vmem:[%s9236_s5 + $0x20] sm:$0xff]  }
 0x2e3   : > { %v3321_v48 = vpop.f32.mrf.mxu1  ;;  %5372 = vmatpush3.bf16.msra.mxu0 %v5967_v33 }
 0x2e4   : > { %v3322_v2 = vadd.f32 %v3321_v48, %v8374_v58  ;;  %4279 = vmatprep.mubr.bf16.mxu1 %v3597_v51  ;;  %v3477_v56 = vmax.f32 %v3320_v55, 0.0  ;;  %v8708_v51 = vpop.f32.mrf.mxu0  ;;  %5373 = vmatprep.subr.bf16.mxu0 %v5968_v47 }
 0x2e5   : > { %v3323_v16 = vpop.f32.mrf.mxu1  ;;  %4280 = vmatmul.mubr.bf16.vlgmr.msra.gmra.mxu1 %v3596_v9 }
 0x2e6   : > { %v3480_v11 = vmax.f32 %v3322_v2, 0.0  ;;  %v3324_v13 = vadd.f32 %v3323_v16, %v8381_v18 }
 0x2e7   : > { %v3327_v58 = vpop.f32.mrf.mxu1  ;;  %5374 = vmatpush3.bf16.msra.mxu0 %v5969_v57 }
 0x2e8   : > { %v3600_v39 = vpack.c.bf16 %v3480_v11, %v3476_v30  ;;  %v3481_v43 = vmax.f32 %v3324_v13, 0.0  ;;  %v3328_v36 = vadd.f32 %v3327_v58, %v8387_v23  ;;  %v8716_v11 = vpop.f32.mrf.mxu0 }
 0x2e9   : > { %v3329_v9 = vpop.f32.mrf.mxu1 }
 0x2ea   : > { %v3601_v18 = vpack.c.bf16 %v3481_v43, %v3477_v56  ;;  %v3330_v55 = vadd.f32 %v3329_v9, %v8393_v62  ;;  %v3484_v45 = vmax.f32 %v3328_v36, 0.0  ;;  %v8719_v9 = vpop.f32.mrf.mxu0  ;;  %v9697_v36 = vld [vmem:[#allocation87_spill] sm:$0xff] }
 0x2eb   : > { %v3331_v48 = vpop.f32.mrf.mxu1 }
 0x2ec   : > { %v3332_v2 = vadd.f32 %v3331_v48, %v8395_v4  ;;  %4289 = vmatprep.mubr.bf16.mxu1 %v3601_v18  ;;  %v3485_v58 = vmax.f32 %v3330_v55, 0.0  ;;  %v2775_v48 = vadd.f32 %v9697_v36, %v8297_v32 }
 0x2ed   : > { %v3333_v16 = vpop.f32.mrf.mxu1  ;;  %4290 = vmatmul.mubr.bf16.gmra.mxu1 %v3600_v39 }
 0x2ee   : > { %v3488_v30 = vmax.f32 %v3332_v2, 0.0  ;;  %v3334_v23 = vadd.f32 %v3333_v16, %v8402_v7  ;;  %v8728_v16 = vpop.f32.mrf.mxu0 }
 0x2ef   : > { %v3337_v13 = vpop.f32.mrf.mxu1 }
 0x2f0   : > { %v3604_v62 = vpack.c.bf16 %v3488_v30, %v3484_v45  ;;  %v3489_v56 = vmax.f32 %v3334_v23, 0.0  ;;  %v3338_v43 = vadd.f32 %v3337_v13, %v8408_v21  ;;  %v3155_v21 = vadd.f32 %v8418_v0, %v8427_v54 }
 0x2f1   : > { %v3339_v4 = vpop.f32.mrf.mxu1 }
 0x2f2   : > { %v3605_v33 = vpack.c.bf16 %v3489_v56, %v3485_v58  ;;  %v3340_v39 = vadd.f32 %v3339_v4, %v8414_v19  ;;  %v3492_v55 = vmax.f32 %v3338_v43, 0.0  ;;  %v2968_v19 = vadd.f32 %v8443_v14, %v2775_v48  ;;  %v8735_v4 = vpop.f32.mrf.mxu0 }
 0x2f3   : > { %v3341_v18 = vpop.f32.mrf.mxu1  ;;  %v3157_v58 = vadd.f32 %v8431_v5, %v8435_v46 }
 0x2f4   : > { %v3342_v47 = vadd.f32 %v3341_v18, %v8416_v31  ;;  %4299 = vmatprep.mubr.bf16.mxu1 %v3605_v33  ;;  %v3493_v30 = vmax.f32 %v3340_v39, 0.0  ;;  %v3161_v54 = vadd.f32 %v8445_v53, %v2968_v19  ;;  %v9698_v18 = vld [vmem:[#allocation22_spill] sm:$0xff] }
 0x2f5   : > { %v3343_v7 = vpop.f32.mrf.mxu1  ;;  %4300 = vmatmul.mubr.bf16.gmra.mxu1 %v3604_v62  ;;  %v3159_v62 = vadd.f32 %v8437_v24, %v8441_v49  ;;  %v2785_v39 = vadd.f32 %v9698_v18, %v8297_v32  ;;  %v3165_v24 = vadd.f32 %v8447_v15, %v8454_v29  ;;  %v8742_v49 = vpop.f32.mrf.mxu0  ;;  %v9700_v29 = vld [vmem:[#allocation34_spill] sm:$0xff] }
 0x2f6   : > { %v3496_v2 = vmax.f32 %v3342_v47, 0.0  ;;  %v3344_v57 = vadd.f32 %v3343_v7, %v8425_v3 }
 0x2f7   : > { %v3347_v45 = vpop.f32.mrf.mxu1  ;;  %v2978_v36 = vadd.f32 %v8470_v41, %v2785_v39 }
 0x2f8   : > { %v3608_v31 = vpack.c.bf16 %v3496_v2, %v3492_v55  ;;  %v3497_v23 = vmax.f32 %v3344_v57, 0.0  ;;  %v3348_v56 = vadd.f32 %v3347_v45, %v3155_v21  ;;  %v9699_v57 = vld [vmem:[#allocation33_spill] sm:$0xff]  ;;  %v3169_v45 = vadd.f32 %v8464_v42, %v8468_v6  ;;  %v9702_v42 = vld [vmem:[#allocation103_spill] sm:$0xff] }
 0x2f9   : > { %v3349_v13 = vpop.f32.mrf.mxu1  ;;  %v3167_v21 = vadd.f32 %v9699_v57, %v8462_v1  ;;  %v3175_v6 = vadd.f32 %v9702_v42, %v8481_v22  ;;  %v9709_v42 = vld [vmem:[#allocation107_spill] sm:$0xff] }
 0x2fa   : > { %v3609_v3 = vpack.c.bf16 %v3497_v23, %v3493_v30  ;;  %v3350_v43 = vadd.f32 %v3349_v13, %v3157_v58  ;;  %v3500_v47 = vmax.f32 %v3348_v56, 0.0  ;;  %v3171_v23 = vadd.f32 %v9700_v29, %v2978_v36 }
 0x2fb   : > { %v3351_v0 = vpop.f32.mrf.mxu1 }
 0x2fc   : > { %v3352_v33 = vadd.f32 %v3351_v0, %v3159_v62  ;;  %4309 = vmatprep.mubr.bf16.mxu1 %v3609_v3  ;;  %v3501_v53 = vmax.f32 %v3350_v43, 0.0  ;;  %v9701_v62 = vld [vmem:[#allocation90_spill] sm:$0xff] }
 0x2fd   : > { %v3353_v14 = vpop.f32.mrf.mxu1  ;;  %4310 = vmatmul.mubr.bf16.gmra.mxu1 %v3608_v31  ;;  %v8749_v31 = vpop.f32.mrf.mxu0  ;;  %v2795_v56 = vadd.f32 %v9701_v62, %v8297_v32 }
 0x2fe   : > { %v3504_v5 = vmax.f32 %v3352_v33, 0.0  ;;  %v3354_v46 = vadd.f32 %v3353_v14, %v3161_v54 }
 0x2ff   : > { %v3357_v7 = vpop.f32.mrf.mxu1  ;;  %v8756_v54 = vpop.f32.mrf.mxu0  ;;  %v2988_v33 = vadd.f32 %v8497_v25, %v2795_v56 }
 0x300   : > { %v3612_v48 = vpack.c.bf16 %v3504_v5, %v3500_v47  ;;  %v3505_v55 = vmax.f32 %v3354_v46, 0.0  ;;  %v3358_v19 = vadd.f32 %v3357_v7, %v3165_v24  ;;  %v3177_v5 = vadd.f32 %v8485_v8, %v8489_v10  ;;  %v9703_v46 = vld [vmem:[#allocation106_spill] sm:$0xff]  ;;  %v9704_v24 = vld [vmem:[#allocation105_spill] sm:$0xff] }
 0x301   : > { %v3359_v2 = vpop.f32.mrf.mxu1  ;;  %v3179_v7 = vadd.f32 %v9704_v24, %v9703_v46 }
 0x302   : > { %v3613_v30 = vpack.c.bf16 %v3505_v55, %v3501_v53  ;;  %v3360_v13 = vadd.f32 %v3359_v2, %v3167_v21  ;;  %v3508_v3 = vmax.f32 %v3358_v19, 0.0  ;;  %v9705_v55 = vld [vmem:[#allocation35_spill] sm:$0xff] }
 0x303   : > { %v3361_v15 = vpop.f32.mrf.mxu1  ;;  %v3181_v2 = vadd.f32 %v9705_v55, %v2988_v33 }
 0x304   : > { %v3362_v58 = vadd.f32 %v3361_v15, %v3169_v45  ;;  %4319 = vmatprep.mubr.bf16.mxu1 %v3613_v30  ;;  %v3509_v14 = vmax.f32 %v3360_v13, 0.0  ;;  %v9706_v45 = vld [vmem:[#allocation91_spill] sm:$0xff]  ;;  %v3185_v15 = vadd.f32 %v8512_v44, %v8506_v59 }
 0x305   : > { %v3363_v41 = vpop.f32.mrf.mxu1  ;;  %4320 = vmatmul.mubr.bf16.gmra.mxu1 %v3612_v48  ;;  %v8763_v48 = vpop.f32.mrf.mxu0  ;;  %v2805_v19 = vadd.f32 %v9706_v45, %v8297_v32 }
 0x306   : > { %v3512_v1 = vmax.f32 %v3362_v58, 0.0  ;;  %v3364_v0 = vadd.f32 %v3363_v41, %v3171_v23 }
 0x307   : > { %v3367_v43 = vpop.f32.mrf.mxu1  ;;  %v8770_v29 = vpop.f32.mrf.mxu0  ;;  %v2998_v13 = vadd.f32 %v8518_v52, %v2805_v19  ;;  %v9713_v19 = vld [vmem:[#allocation108_spill] sm:$0xff] }
 0x308   : > { %v3616_v18 = vpack.c.bf16 %v3512_v1, %v3508_v3  ;;  %v3513_v39 = vmax.f32 %v3364_v0, 0.0  ;;  %v3368_v53 = vadd.f32 %v3367_v43, %v3175_v6  ;;  %v9707_v3 = vld [vmem:[#allocation36_spill] sm:$0xff]  ;;  %v9708_v1 = vld [vmem:[#allocation37_spill] sm:$0xff]  ;;  %v3189_v6 = vadd.f32 %v8530_v35, %v9709_v42 }
 0x309   : > { %v3369_v47 = vpop.f32.mrf.mxu1  ;;  %v3187_v0 = vadd.f32 %v9708_v1, %v9707_v3  ;;  %v3191_v44 = vadd.f32 %v8538_v20, %v2998_v13  ;;  %v3195_v35 = vadd.f32 %v8548_v17, %v8524_v38  ;;  %v9714_v17 = vld [vmem:[#allocation45_spill] sm:$0xff] }
 0x30a   : > { %v3617_v36 = vpack.c.bf16 %v3513_v39, %v3509_v14  ;;  %v3370_v57 = vadd.f32 %v3369_v47, %v3177_v5  ;;  %v3516_v30 = vmax.f32 %v3368_v53, 0.0  ;;  %v8777_v14 = vpop.f32.mrf.mxu0  ;;  %v9710_v47 = vld [vmem:[#allocation23_spill] sm:$0xff] }
 0x30b   : > { %v3371_v22 = vpop.f32.mrf.mxu1  ;;  %v2815_v5 = vadd.f32 %v9710_v47, %v8297_v32  ;;  %v9719_v47 = vld [vmem:[#allocation39_spill] sm:$0xff] }
 0x30c   : > { %v3372_v21 = vadd.f32 %v3371_v22, %v3179_v7  ;;  %4329 = vmatprep.mubr.bf16.mxu1 %v3617_v36  ;;  %v3517_v58 = vmax.f32 %v3370_v57, 0.0  ;;  %v8784_v36 = vpop.f32.mrf.mxu0  ;;  %v9711_v22 = vld [vmem:[#allocation110_spill] sm:$0xff] }
 0x30d   : > { %v3373_v25 = vpop.f32.mrf.mxu1  ;;  %4330 = vmatmul.mubr.bf16.gmra.mxu1 %v3616_v18  ;;  %v3008_v55 = vadd.f32 %v9711_v22, %v2815_v5  ;;  %v9720_v5 = vld [vmem:[#allocation51_spill] sm:$0xff] }
 0x30e   : > { %v3520_v10 = vmax.f32 %v3372_v21, 0.0  ;;  %v3374_v8 = vadd.f32 %v3373_v25, %v3181_v2  ;;  %v9712_v25 = vld [vmem:[#allocation38_spill] sm:$0xff] }
 0x30f   : > { %v3377_v23 = vpop.f32.mrf.mxu1  ;;  %v3197_v45 = vadd.f32 %v8556_v12, %v9712_v25 }
 0x310   : > { %v3620_v41 = vpack.c.bf16 %v3520_v10, %v3516_v30  ;;  %v3521_v62 = vmax.f32 %v3374_v8, 0.0  ;;  %v3378_v33 = vadd.f32 %v3377_v23, %v3185_v15  ;;  %v3199_v30 = vadd.f32 %v8566_v50, %v9713_v19  ;;  %v8791_v15 = vpop.f32.mrf.mxu0  ;;  %v9717_v50 = vld [vmem:[#allocation48_spill] sm:$0xff] }
 0x311   : > { %v3379_v56 = vpop.f32.mrf.mxu1  ;;  %v3201_v23 = vadd.f32 %v9714_v17, %v3008_v55  ;;  %v5970_v19 = vld [vmem:[%s9236_s5 + $0x50] sm:$0xff]  }
 0x312   : > { %v3621_v43 = vpack.c.bf16 %v3521_v62, %v3517_v58  ;;  %v3380_v18 = vadd.f32 %v3379_v56, %v3187_v0  ;;  %v3524_v46 = vmax.f32 %v3378_v33, 0.0  ;;  %v9715_v62 = vld [vmem:[#allocation24_spill] sm:$0xff]  ;;  %v9716_v0 = vld [vmem:[#allocation111_spill] sm:$0xff]  ;;  %v9718_v33 = vld [vmem:[#allocation41_spill] sm:$0xff]  ;;  %5375 = vmatprep.subr.bf16.mxu0 %v5970_v19 }
 0x313   : > { %v3381_v59 = vpop.f32.mrf.mxu1  ;;  %v2825_v56 = vadd.f32 %v9715_v62, %v8297_v32  ;;  %v3205_v42 = vadd.f32 %v9717_v50, %v9716_v0 }
 0x314   : > { %v3382_v39 = vadd.f32 %v3381_v59, %v3189_v6  ;;  %4339 = vmatprep.mubr.bf16.mxu1 %v3621_v43  ;;  %v3525_v20 = vmax.f32 %v3380_v18, 0.0  ;;  %v8798_v6 = vpop.f32.mrf.mxu0 }
 0x315   : > { %v3383_v52 = vpop.f32.mrf.mxu1  ;;  %4340 = vmatmul.mubr.bf16.gmra.mxu1 %v3620_v41  ;;  %v3018_v59 = vadd.f32 %v9718_v33, %v2825_v56  ;;  %v9728_v33 = vld [vmem:[#allocation112_spill] sm:$0xff] }
 0x316   : > { %v3528_v24 = vmax.f32 %v3382_v39, 0.0  ;;  %v3384_v7 = vadd.f32 %v3383_v52, %v3191_v44  ;;  %v8805_v55 = vpop.f32.mrf.mxu0 }
 0x317   : > { %v3387_v53 = vpop.f32.mrf.mxu1 }
 0x318   : > { %v3624_v2 = vpack.c.bf16 %v3528_v24, %v3524_v46  ;;  %v3529_v57 = vmax.f32 %v3384_v7, 0.0  ;;  %v3388_v8 = vadd.f32 %v3387_v53, %v3195_v35  ;;  %v3207_v46 = vadd.f32 %v9720_v5, %v9719_v47  ;;  %v9721_v24 = vld [vmem:[#allocation40_spill] sm:$0xff]  ;;  %v9722_v7 = vld [vmem:[#allocation54_spill] sm:$0xff]  ;;  %v8818_v62 = vpop.f32.mrf.mxu0 }
 0x319   : > { %v3389_v21 = vpop.f32.mrf.mxu1  ;;  %v3209_v35 = vadd.f32 %v9722_v7, %v9721_v24  ;;  %v5973_v47 = vld [vmem:[%s9236_s5 + $0x8] sm:$0xff]  }
 0x31a   : > { %v3625_v10 = vpack.c.bf16 %v3529_v57, %v3525_v20  ;;  %v3390_v13 = vadd.f32 %v3389_v21, %v3197_v45  ;;  %v3532_v3 = vmax.f32 %v3388_v8, 0.0  ;;  %v8831_v5 = vpop.f32.mrf.mxu0 }
 0x31b   : > { %v3391_v38 = vpop.f32.mrf.mxu1 }
 0x31c   : > { %v3392_v58 = vadd.f32 %v3391_v38, %v3199_v30  ;;  %4349 = vmatprep.mubr.bf16.mxu1 %v3625_v10  ;;  %v3533_v44 = vmax.f32 %v3390_v13, 0.0  ;;  %v9724_v30 = vld [vmem:[#allocation92_spill] sm:$0xff]  ;;  %v9725_v13 = vld [vmem:[#allocation42_spill] sm:$0xff] }
 0x31d   : > { %v3393_v41 = vpop.f32.mrf.mxu1  ;;  %4350 = vmatmul.mubr.bf16.gmra.mxu1 %v3624_v2  ;;  %v9723_v2 = vld [vmem:[#allocation57_spill] sm:$0xff]  ;;  %v2835_v10 = vadd.f32 %v9724_v30, %v8297_v32  ;;  %v9732_v30 = vld [vmem:[#allocation50_spill] sm:$0xff] }
 0x31e   : > { %v3536_v12 = vmax.f32 %v3392_v58, 0.0  ;;  %v3394_v1 = vadd.f32 %v3393_v41, %v3201_v23  ;;  %v3211_v57 = vadd.f32 %v9723_v2, %v3018_v59  ;;  %v5971_v23 = vld [vmem:[%s9236_s5 + $0x10] sm:$0xff]   ;;  %v3217_v59 = vadd.f32 %v8628_v34, %v9728_v33 }
 0x31f   : > { %v3397_v43 = vpop.f32.mrf.mxu1  ;;  %v9726_v58 = vld [vmem:[#allocation60_spill] sm:$0xff]  ;;  %5376 = vmatpush3.bf16.msra.mxu0 %v5971_v23 }
 0x320   : > { %v3628_v18 = vpack.c.bf16 %v3536_v12, %v3532_v3  ;;  %v3537_v39 = vmax.f32 %v3394_v1, 0.0  ;;  %v3398_v22 = vadd.f32 %v3397_v43, %v3205_v42  ;;  %v3215_v41 = vadd.f32 %v9726_v58, %v9725_v13  ;;  %v9727_v3 = vld [vmem:[#allocation44_spill] sm:$0xff]  ;;  %v5972_v43 = vld [vmem:[%s9236_s5 + $0x48] sm:$0xff]  }
 0x321   : > { %v3399_v52 = vpop.f32.mrf.mxu1  ;;  %v3028_v12 = vadd.f32 %v9727_v3, %v2835_v10  ;;  %5377 = vmatprep.subr.bf16.mxu0 %v5972_v43  ;;  %v9733_v13 = vld [vmem:[#allocation47_spill] sm:$0xff]  ;;  %v9735_v33 = vld [vmem:[#allocation28_spill] sm:$0xff] }
 0x322   : > { %v3629_v53 = vpack.c.bf16 %v3537_v39, %v3533_v44  ;;  %v3400_v21 = vadd.f32 %v3399_v52, %v3207_v46  ;;  %v3540_v8 = vmax.f32 %v3398_v22, 0.0  ;;  %v9729_v44 = vld [vmem:[#allocation43_spill] sm:$0xff]  ;;  %v3227_v58 = vadd.f32 %v8662_v60, %v9733_v13 }
 0x323   : > { %v3401_v20 = vpop.f32.mrf.mxu1  ;;  %v3221_v24 = vadd.f32 %v8646_v37, %v3028_v12  ;;  %5378 = vmatpush3.bf16.msra.mxu0 %v5973_v47  ;;  %v5975_v37 = vld [vmem:[%s9236_s5] sm:$0xff]  }
 0x324   : > { %v3402_v25 = vadd.f32 %v3401_v20, %v3209_v35  ;;  %4359 = vmatprep.mubr.bf16.mxu1 %v3629_v53  ;;  %v3541_v1 = vmax.f32 %v3400_v21, 0.0  ;;  %v9730_v53 = vld [vmem:[#allocation93_spill] sm:$0xff]  ;;  %v9731_v21 = vld [vmem:[#allocation46_spill] sm:$0xff] }
 0x325   : > { %v3403_v45 = vpop.f32.mrf.mxu1  ;;  %4360 = vmatmul.mubr.bf16.gmra.mxu1 %v3628_v18  ;;  %v3219_v18 = vadd.f32 %v8638_v27, %v9729_v44  ;;  %v5974_v27 = vld [vmem:[%s9236_s5 + $0x40] sm:$0xff]   ;;  %v2845_v22 = vadd.f32 %v9730_v53, %v8297_v32 }
 0x326   : > { %v3544_v38 = vmax.f32 %v3402_v25, 0.0  ;;  %v3404_v17 = vadd.f32 %v3403_v45, %v3211_v57  ;;  %v3225_v25 = vadd.f32 %v8656_v28, %v9731_v21  ;;  %v8844_v45 = vpop.f32.mrf.mxu0  ;;  %5379 = vmatprep.subr.bf16.mxu0 %v5974_v27  ;;  %v9738_v27 = vld [vmem:[#allocation53_spill] sm:$0xff] }
 0x327   : > { %v3407_v56 = vpop.f32.mrf.mxu1  ;;  %v3038_v10 = vadd.f32 %v9732_v30, %v2845_v22  ;;  %5380 = vmatpush3.bf16.msra.mxu0 %v5975_v37  ;;  %v3237_v53 = vadd.f32 %v8699_v61, %v9738_v27  ;;  %v9739_v22 = vld [vmem:[#allocation55_spill] sm:$0xff]  ;;  %v9747_v27 = vld [vmem:[#allocation66_spill] sm:$0xff] }
 0x328   : > { %v3632_v0 = vpack.c.bf16 %v3544_v38, %v3540_v8  ;;  %v3545_v50 = vmax.f32 %v3404_v17, 0.0  ;;  %v3408_v52 = vadd.f32 %v3407_v56, %v3215_v41  ;;  %v9734_v41 = vld [vmem:[#allocation49_spill] sm:$0xff]  ;;  %v8851_v28 = vpop.f32.mrf.mxu0 }
 0x329   : > { %v3409_v42 = vpop.f32.mrf.mxu1  ;;  %v3229_v56 = vadd.f32 %v8665_v63, %v9734_v41  ;;  %v9742_v41 = vld [vmem:[#allocation62_spill] sm:$0xff] }
 0x32a   : > { %v3633_v39 = vpack.c.bf16 %v3545_v50, %v3541_v1  ;;  %v3410_v7 = vadd.f32 %v3409_v42, %v3217_v59  ;;  %v3548_v20 = vmax.f32 %v3408_v52, 0.0  ;;  %v2855_v59 = vadd.f32 %v9735_v33, %v8297_v32  ;;  %v8858_v52 = vpop.f32.mrf.mxu0 }
 0x32b   : > { %v3411_v46 = vpop.f32.mrf.mxu1 }
 0x32c   : > { %v3412_v35 = vadd.f32 %v3411_v46, %v3219_v18  ;;  %4369 = vmatprep.mubr.bf16.mxu1 %v3633_v39  ;;  %v3549_v8 = vmax.f32 %v3410_v7, 0.0  ;;  %v9736_v39 = vld [vmem:[#allocation52_spill] sm:$0xff]  ;;  %v8865_v37 = vpop.f32.mrf.mxu0 }
 0x32d   : > { %v3413_v34 = vpop.f32.mrf.mxu1  ;;  %4370 = vmatmul.mubr.bf16.gmra.mxu1 %v3632_v0  ;;  %v3231_v0 = vadd.f32 %v8679_v40, %v3038_v10  ;;  %v3235_v63 = vadd.f32 %v8688_v26, %v9736_v39  ;;  %v9737_v46 = vld [vmem:[#allocation56_spill] sm:$0xff]  ;;  %v9740_v10 = vld [vmem:[#allocation98_spill] sm:$0xff] }
 0x32e   : > { %v3552_v2 = vmax.f32 %v3412_v35, 0.0  ;;  %v3414_v57 = vadd.f32 %v3413_v34, %v3221_v24  ;;  %v3048_v24 = vadd.f32 %v9737_v46, %v2855_v59  ;;  %v8872_v13 = vpop.f32.mrf.mxu0 }
 0x32f   : > { %v3417_v19 = vpop.f32.mrf.mxu1 }
 0x330   : > { %v3636_v38 = vpack.c.bf16 %v3552_v2, %v3548_v20  ;;  %v3553_v17 = vmax.f32 %v3414_v57, 0.0  ;;  %v3418_v12 = vadd.f32 %v3417_v19, %v3225_v25  ;;  %v3239_v20 = vadd.f32 %v8708_v51, %v9739_v22 }
 0x331   : > { %v3419_v23 = vpop.f32.mrf.mxu1  ;;  %v3241_v21 = vadd.f32 %v8716_v11, %v3048_v24 }
 0x332   : > { %v3637_v3 = vpack.c.bf16 %v3553_v17, %v3549_v8  ;;  %v3420_v50 = vadd.f32 %v3419_v23, %v3227_v58  ;;  %v3556_v44 = vmax.f32 %v3418_v12, 0.0  ;;  %v2865_v8 = vadd.f32 %v9740_v10, %v8297_v32  ;;  %v9741_v23 = vld [vmem:[#allocation58_spill] sm:$0xff] }
 0x333   : > { %v3421_v1 = vpop.f32.mrf.mxu1  ;;  %v3245_v51 = vadd.f32 %v8719_v9, %v9741_v23  ;;  %v9750_v23 = vld [vmem:[#allocation102_spill] sm:$0xff] }
 0x334   : > { %v3422_v42 = vadd.f32 %v3421_v1, %v3229_v56  ;;  %4379 = vmatprep.mubr.bf16.mxu1 %v3637_v3  ;;  %v3557_v40 = vmax.f32 %v3420_v50, 0.0  ;;  %v3058_v56 = vadd.f32 %v9742_v41, %v2865_v8 }
 0x335   : > { %v3423_v43 = vpop.f32.mrf.mxu1  ;;  %4380 = vmatmul.mubr.bf16.gmra.mxu1 %v3636_v38 }
 0x336   : > { %v3560_v60 = vmax.f32 %v3422_v42, 0.0  ;;  %v3424_v18 = vadd.f32 %v3423_v43, %v3231_v0  ;;  %v9743_v0 = vld [vmem:[#allocation59_spill] sm:$0xff]  ;;  %v9744_v42 = vld [vmem:[#allocation61_spill] sm:$0xff] }
 0x337   : > { %v3427_v47 = vpop.f32.mrf.mxu1  ;;  %v3247_v50 = vadd.f32 %v8728_v16, %v9743_v0  ;;  %v3249_v43 = vadd.f32 %v8735_v4, %v9744_v42 }
 0x338   : > { %v3640_v7 = vpack.c.bf16 %v3560_v60, %v3556_v44  ;;  %v3561_v35 = vmax.f32 %v3424_v18, 0.0  ;;  %v3428_v57 = vadd.f32 %v3427_v47, %v3235_v63  ;;  %v8879_v44 = vpop.f32.mrf.mxu0  ;;  %v3251_v60 = vadd.f32 %v8742_v49, %v3058_v56  ;;  %v9745_v47 = vld [vmem:[#allocation32_spill] sm:$0xff]  ;;  %v9751_v56 = vld [vmem:[#allocation67_spill] sm:$0xff] }
 0x339   : > { %v3429_v34 = vpop.f32.mrf.mxu1  ;;  %v2875_v46 = vadd.f32 %v9745_v47, %v8297_v32 }
 0x33a   : > { %v3641_v2 = vpack.c.bf16 %v3561_v35, %v3557_v40  ;;  %v3430_v25 = vadd.f32 %v3429_v34, %v3237_v53  ;;  %v3564_v38 = vmax.f32 %v3428_v57, 0.0  ;;  %v8886_v35 = vpop.f32.mrf.mxu0  ;;  %v9748_v57 = vld [vmem:[#allocation64_spill] sm:$0xff] }
 0x33b   : > { %v3431_v26 = vpop.f32.mrf.mxu1  ;;  %v3068_v53 = vadd.f32 %v9747_v27, %v2875_v46 }
 0x33c   : > { %v3432_v19 = vadd.f32 %v3431_v26, %v3239_v20  ;;  %4389 = vmatprep.mubr.bf16.mxu1 %v3641_v2  ;;  %v3565_v11 = vmax.f32 %v3430_v25, 0.0  ;;  %v3257_v26 = vadd.f32 %v8756_v54, %v9748_v57  ;;  %v8893_v10 = vpop.f32.mrf.mxu0 }
 0x33d   : > { %v3433_v30 = vpop.f32.mrf.mxu1  ;;  %4390 = vmatmul.mubr.bf16.gmra.mxu1 %v3640_v7  ;;  %v9746_v7 = vld [vmem:[#allocation63_spill] sm:$0xff]  ;;  %v3261_v8 = vadd.f32 %v8770_v29, %v3068_v53 }
 0x33e   : > { %v3568_v61 = vmax.f32 %v3432_v19, 0.0  ;;  %v3434_v17 = vadd.f32 %v3433_v30, %v3241_v21  ;;  %v3255_v4 = vadd.f32 %v8749_v31, %v9746_v7  ;;  %v9749_v21 = vld [vmem:[#allocation65_spill] sm:$0xff] }
 0x33f   : > { %v3437_v58 = vpop.f32.mrf.mxu1  ;;  %v3259_v25 = vadd.f32 %v8763_v48, %v9749_v21  ;;  %v3265_v48 = vadd.f32 %v8777_v14, %v9751_v56  ;;  %v9757_v56 = vld [vmem:[#allocation70_spill] sm:$0xff] }
 0x340   : > { %v3644_v3 = vpack.c.bf16 %v3568_v61, %v3564_v38  ;;  %v3569_v12 = vmax.f32 %v3434_v17, 0.0  ;;  %v3438_v59 = vadd.f32 %v3437_v58, %v3245_v51  ;;  %v2885_v51 = vadd.f32 %v9750_v23, %v8297_v32  ;;  %v3722_v23 = vld [vmem:[%s9235_s4] sm:$0x3] }
 0x341   : > { %v3439_v1 = vpop.f32.mrf.mxu1 }
 0x342   : > { %v3645_v33 = vpack.c.bf16 %v3569_v12, %v3565_v11  ;;  %v3440_v18 = vadd.f32 %v3439_v1, %v3247_v50  ;;  %v3572_v24 = vmax.f32 %v3438_v59, 0.0  ;;  %v8900_v11 = vpop.f32.mrf.mxu0  ;;  %v9752_v12 = vld [vmem:[#allocation74_spill] sm:$0xff]  ;;  %v9754_v59 = vld [vmem:[#allocation71_spill] sm:$0xff] }
 0x343   : > { %v3441_v9 = vpop.f32.mrf.mxu1  ;;  %v3078_v1 = vadd.f32 %v9752_v12, %v2885_v51  ;;  %v3269_v32 = vadd.f32 %v8791_v15, %v9754_v59 }
 0x344   : > { %v3442_v39 = vadd.f32 %v3441_v9, %v3249_v43  ;;  %4399 = vmatprep.mubr.bf16.mxu1 %v3645_v33  ;;  %v3573_v49 = vmax.f32 %v3440_v18, 0.0  ;;  %v9753_v43 = vld [vmem:[#allocation68_spill] sm:$0xff]  ;;  %v8907_v18 = vpop.f32.mrf.mxu0 }
 0x345   : > { %v3443_v63 = vpop.f32.mrf.mxu1  ;;  %4400 = vmatmul.mubr.bf16.gmra.mxu1 %v3644_v3  ;;  %v3267_v33 = vadd.f32 %v8784_v36, %v9753_v43 }
 0x346   : > { %v3576_v16 = vmax.f32 %v3442_v39, 0.0  ;;  %v3444_v40 = vadd.f32 %v3443_v63, %v3251_v60  ;;  %v3271_v39 = vadd.f32 %v8798_v6, %v3078_v1  ;;  %v8910_v7 = vpop.f32.mrf.mxu0 }
 0x347   : > { %v3447_v34 = vpop.f32.mrf.mxu1 }
 0x348   : > { %v3648_v22 = vpack.c.bf16 %v3576_v16, %v3572_v24  ;;  %v3577_v20 = vmax.f32 %v3444_v40, 0.0  ;;  %v3448_v30 = vadd.f32 %v3447_v34, %v3255_v4  ;;  %v8912_v27 = vpop.f32.mrf.mxu0 }
 0x349   : > { %v3449_v2 = vpop.f32.mrf.mxu1 }
 0x34a   : > { %v3649_v19 = vpack.c.bf16 %v3577_v20, %v3573_v49  ;;  %v3450_v38 = vadd.f32 %v3449_v2, %v3257_v26  ;;  %v3580_v58 = vmax.f32 %v3448_v30, 0.0  ;;  %v8914_v53 = vpop.f32.mrf.mxu0 }
 0x34b   : > { %v3451_v31 = vpop.f32.mrf.mxu1 }
 0x34c   : > { %v3452_v61 = vadd.f32 %v3451_v31, %v3259_v25  ;;  %4409 = vmatprep.mubr.bf16.mxu1 %v3649_v19  ;;  %v3581_v29 = vmax.f32 %v3450_v38, 0.0  ;;  %v8916_v6 = vpop.f32.mrf.mxu0 }
 0x34d   : > { %v3453_v17 = vpop.f32.mrf.mxu1  ;;  %4410 = vmatmul.mubr.bf16.gmra.mxu1 %v3648_v22 }
 0x34e   : > { %v3584_v54 = vmax.f32 %v3452_v61, 0.0  ;;  %v3454_v41 = vadd.f32 %v3453_v17, %v3261_v8  ;;  %v8918_v49 = vpop.f32.mrf.mxu0 }
 0x34f   : > { %v3457_v3 = vpop.f32.mrf.mxu1 }
 0x350   : > { %v3652_v0 = vpack.c.bf16 %v3584_v54, %v3580_v58  ;;  %v3585_v50 = vmax.f32 %v3454_v41, 0.0  ;;  %v3458_v60 = vadd.f32 %v3457_v3, %v3265_v48  ;;  %v8920_v22 = vpop.f32.mrf.mxu0  ;;  %v9755_v58 = vld [vmem:[#allocation69_spill] sm:$0xff]  ;;  %v8958_v48 = vrot.slane %v3722_v23, %v9757_v56 }
 0x351   : > { %v3459_v42 = vpop.f32.mrf.mxu1  ;;  %v9756_v54 = vsub.s32 1, %v9755_v58 }
 0x352   : > { %v3653_v9 = vpack.c.bf16 %v3585_v50, %v3581_v29  ;;  %v3460_v63 = vadd.f32 %v3459_v42, %v3267_v33  ;;  %v3588_v24 = vmax.f32 %v3458_v60, 0.0  ;;  %v8922_v20 = vpop.f32.mrf.mxu0  ;;  %v4089_v50 = vadd.f32 %v8805_v55, %v8958_v48 }
 0x353   : > { %v3461_v14 = vpop.f32.mrf.mxu1  ;;  %v8955_v41 = vrot.slane %v3722_v23, %v9756_v54 }
 0x354   : > { %v3462_v47 = vadd.f32 %v3461_v14, %v3269_v32  ;;  %4419 = vmatprep.mubr.bf16.mxu1 %v3653_v9  ;;  %v3589_v36 = vmax.f32 %v3460_v63, 0.0  ;;  %v8924_v2 = vpop.f32.mrf.mxu0 }
 0x355   : > { %v3463_v46 = vpop.f32.mrf.mxu1  ;;  %4420 = vmatmul.mubr.bf16.gmra.mxu1 %v3652_v0  ;;  %v4091_v29 = vadd.f32 %v8818_v62, %v8955_v41  ;;  %v4093_v0 = vadd.f32 %v8831_v5, %v8958_v48  ;;  %v4095_v43 = vadd.f32 %v8844_v45, %v8955_v41  ;;  %v4101_v55 = vadd.f32 %v8858_v52, %v8955_v41 }
 0x356   : > { %v3592_v16 = vmax.f32 %v3462_v47, 0.0  ;;  %v3464_v40 = vadd.f32 %v3463_v46, %v3271_v39  ;;  %v8926_v57 = vpop.f32.mrf.mxu0  ;;  %v4103_v45 = vadd.f32 %v8865_v37, %v8958_v48 }
 0x358   : > { %v3656_v4 = vpack.c.bf16 %v3592_v16, %v3588_v24  ;;  %v3593_v15 = vmax.f32 %v3464_v40, 0.0  ;;  %v8928_v26 = vpop.f32.mrf.mxu0  ;;  %v4099_v40 = vadd.f32 %v8851_v28, %v8958_v48 }
 0x35a   : > { %v3657_v34 = vpack.c.bf16 %v3593_v15, %v3589_v36  ;;  %v8930_v21 = vpop.f32.mrf.mxu0  ;;  %v4105_v15 = vadd.f32 %v8872_v13, %v8955_v41  ;;  %v4111_v13 = vadd.f32 %v8886_v35, %v8955_v41 }
 0x35c   : > { %4429 = vmatprep.mubr.bf16.mxu1 %v3657_v34  ;;  %v8932_v25 = vpop.f32.mrf.mxu0 }
 0x35d   : > { %4430 = vmatmul.mubr.bf16.gmra.mxu1 %v3656_v4 }
 0x35e   : > { %v8934_v19 = vpop.f32.mrf.mxu0 }
 0x360   : > { %v8936_v30 = vpop.f32.mrf.mxu0 }
 0x362   : > { %v8938_v31 = vpop.f32.mrf.mxu0 }
 0x364   : > { %v8940_v8 = vpop.f32.mrf.mxu0 }
 0x366   : > { %v8942_v38 = vpop.f32.mrf.mxu0 }
 0x368   : > { %v8944_v61 = vpop.f32.mrf.mxu0 }
 0x36a   : > { %v8946_v17 = vpop.f32.mrf.mxu0 }
 0x36c   : > { %v8951_v51 = vpop.f32.mrf.mxu0 }
 0x36e   : > { %v8960_v12 = vpop.f32.mrf.mxu0 }
 0x370   : > { %v8970_v32 = vpop.f32.mrf.mxu0 }
 0x372   : > { %v8972_v46 = vpop.f32.mrf.mxu0 }
 0x374   : > { %v8982_v54 = vpop.f32.mrf.mxu0 }
 0x3a5   : > { %v4281_v3 = vpop.f32.mrf.mxu1 }
 0x3a6   : > { %v4282_v9 = vadd.f32 %v4281_v3, %v4089_v50 }
 0x3a7   : > { %v4283_v1 = vpop.f32.mrf.mxu1 }
 0x3a8   : > { %v4284_v33 = vadd.f32 %v4283_v1, %v4091_v29  ;;  %v4440_v5 = vmax.f32 %v4282_v9, 0.0  ;;  %v4109_v9 = vadd.f32 %v8879_v44, %v8958_v48 }
 0x3a9   : > { %v4285_v42 = vpop.f32.mrf.mxu1 }
 0x3aa   : > { %v4286_v59 = vadd.f32 %v4285_v42, %v4093_v0  ;;  %v4441_v62 = vmax.f32 %v4284_v33, 0.0  ;;  %v8984_v42 = vpop.f32.mrf.mxu0  ;;  %v4113_v33 = vadd.f32 %v8893_v10, %v8958_v48 }
 0x3ab   : > { %v4287_v60 = vpop.f32.mrf.mxu1 }
 0x3ac   : > { %v4288_v14 = vadd.f32 %v4287_v60, %v4095_v43  ;;  %v4442_v39 = vmax.f32 %v4286_v59, 0.0 }
 0x3ad   : > { %v4291_v63 = vpop.f32.mrf.mxu1 }
 0x3ae   : > { %v4443_v47 = vmax.f32 %v4288_v14, 0.0  ;;  %v4504_v36 = vpack.c.bf16 %v4442_v39, %v4440_v5  ;;  %v4292_v3 = vadd.f32 %v4291_v63, %v4099_v40  ;;  %v4115_v39 = vadd.f32 %v8900_v11, %v8955_v41 }
 0x3af   : > { %v4293_v24 = vpop.f32.mrf.mxu1  ;;  %v4121_v11 = vadd.f32 %v8910_v7, %v8955_v41 }
 0x3b0   : > { %v4505_v16 = vpack.c.bf16 %v4443_v47, %v4441_v62  ;;  %v4294_v34 = vadd.f32 %v4293_v24, %v4101_v55  ;;  %v4444_v28 = vmax.f32 %v4292_v3, 0.0  ;;  %v8994_v47 = vpop.f32.mrf.mxu0 }
 0x3b1   : > { %v4295_v4 = vpop.f32.mrf.mxu1 }
 0x3b2   : > { %v4296_v23 = vadd.f32 %v4295_v4, %v4103_v45  ;;  %4703 = vmatprep.mubr.bf16.mxu0 %v4505_v16  ;;  %v4445_v0 = vmax.f32 %v4294_v34, 0.0  ;;  %v8996_v40 = vpop.f32.mrf.mxu0  ;;  %v4123_v4 = vadd.f32 %v8912_v27, %v8958_v48  ;;  %v4119_v34 = vadd.f32 %v8907_v18, %v8958_v48 }
 0x3b3   : > { %v4297_v1 = vpop.f32.mrf.mxu1  ;;  %4704 = vmatmul.mubr.bf16.vlgmr.msra.gmra.mxu0 %v4504_v36 }
 0x3b4   : > { %v4298_v52 = vadd.f32 %v4297_v1, %v4105_v15  ;;  %v4446_v29 = vmax.f32 %v4296_v23, 0.0  ;;  %v4125_v1 = vadd.f32 %v8914_v53, %v8955_v41  ;;  %v4131_v53 = vadd.f32 %v8918_v49, %v8955_v41 }
 0x3b5   : > { %v4301_v37 = vpop.f32.mrf.mxu1 }
 0x3b6   : > { %v4447_v50 = vmax.f32 %v4298_v52, 0.0  ;;  %v4506_v60 = vpack.c.bf16 %v4446_v29, %v4444_v28  ;;  %v4302_v5 = vadd.f32 %v4301_v37, %v4109_v9  ;;  %v9006_v37 = vpop.f32.mrf.mxu0  ;;  %v4133_v9 = vadd.f32 %v8920_v22, %v8958_v48 }
 0x3b7   : > { %v4303_v43 = vpop.f32.mrf.mxu1 }
 0x3b8   : > { %v4507_v59 = vpack.c.bf16 %v4447_v50, %v4445_v0  ;;  %v4304_v63 = vadd.f32 %v4303_v43, %v4111_v13  ;;  %v4448_v44 = vmax.f32 %v4302_v5, 0.0 }
 0x3b9   : > { %v4305_v14 = vpop.f32.mrf.mxu1 }
 0x3ba   : > { %v4306_v62 = vadd.f32 %v4305_v14, %v4113_v33  ;;  %4711 = vmatprep.mubr.bf16.mxu0 %v4507_v59  ;;  %v4449_v45 = vmax.f32 %v4304_v63, 0.0  ;;  %v9008_v33 = vpop.f32.mrf.mxu0  ;;  %v4129_v14 = vadd.f32 %v8916_v6, %v8958_v48 }
 0x3bb   : > { %v4307_v24 = vpop.f32.mrf.mxu1  ;;  %4712 = vmatmul.mubr.bf16.gmra.mxu0 %v4506_v60 }
 0x3bc   : > { %v4308_v35 = vadd.f32 %v4307_v24, %v4115_v39  ;;  %v4450_v55 = vmax.f32 %v4306_v62, 0.0  ;;  %v4135_v62 = vadd.f32 %v8922_v20, %v8955_v41  ;;  %v4141_v20 = vadd.f32 %v8926_v57, %v8955_v41 }
 0x3bd   : > { %v4311_v10 = vpop.f32.mrf.mxu1 }
 0x3be   : > { %v4451_v16 = vmax.f32 %v4308_v35, 0.0  ;;  %v4508_v23 = vpack.c.bf16 %v4450_v55, %v4448_v44  ;;  %v4312_v0 = vadd.f32 %v4311_v10, %v4119_v34  ;;  %v9018_v35 = vpop.f32.mrf.mxu0  ;;  %v4139_v34 = vadd.f32 %v8924_v2, %v8958_v48 }
 0x3bf   : > { %v4313_v36 = vpop.f32.mrf.mxu1 }
 0x3c0   : > { %v4509_v15 = vpack.c.bf16 %v4451_v16, %v4449_v45  ;;  %v4314_v52 = vadd.f32 %v4313_v36, %v4121_v11  ;;  %v4452_v18 = vmax.f32 %v4312_v0, 0.0  ;;  %v9020_v36 = vpop.f32.mrf.mxu0 }
 0x3c1   : > { %v4315_v3 = vpop.f32.mrf.mxu1 }
 0x3c2   : > { %v4316_v29 = vadd.f32 %v4315_v3, %v4123_v4  ;;  %4719 = vmatprep.mubr.bf16.mxu0 %v4509_v15  ;;  %v4453_v43 = vmax.f32 %v4314_v52, 0.0  ;;  %v4143_v4 = vadd.f32 %v8928_v26, %v8958_v48  ;;  %v9030_v0 = vpop.f32.mrf.mxu0 }
 0x3c3   : > { %v4317_v50 = vpop.f32.mrf.mxu1  ;;  %4720 = vmatmul.mubr.bf16.gmra.mxu0 %v4508_v23 }
 0x3c4   : > { %v4318_v7 = vadd.f32 %v4317_v50, %v4125_v1  ;;  %v4454_v28 = vmax.f32 %v4316_v29, 0.0  ;;  %v4145_v1 = vadd.f32 %v8930_v21, %v8955_v41  ;;  %v4151_v21 = vadd.f32 %v8934_v19, %v8955_v41 }
 0x3c5   : > { %v4321_v27 = vpop.f32.mrf.mxu1 }
 0x3c6   : > { %v4455_v13 = vmax.f32 %v4318_v7, 0.0  ;;  %v4510_v39 = vpack.c.bf16 %v4454_v28, %v4452_v18  ;;  %v4322_v55 = vadd.f32 %v4321_v27, %v4129_v14 }
 0x3c7   : > { %v4323_v59 = vpop.f32.mrf.mxu1 }
 0x3c8   : > { %v4511_v60 = vpack.c.bf16 %v4455_v13, %v4453_v43  ;;  %v4324_v5 = vadd.f32 %v4323_v59, %v4131_v53  ;;  %v4456_v6 = vmax.f32 %v4322_v55, 0.0  ;;  %v9032_v13 = vpop.f32.mrf.mxu0  ;;  %v4153_v59 = vadd.f32 %v8936_v30, %v8958_v48 }
 0x3c9   : > { %v4325_v63 = vpop.f32.mrf.mxu1 }
 0x3ca   : > { %v4326_v24 = vadd.f32 %v4325_v63, %v4133_v9  ;;  %4727 = vmatprep.mubr.bf16.mxu0 %v4511_v60  ;;  %v4457_v16 = vmax.f32 %v4324_v5, 0.0  ;;  %v4149_v9 = vadd.f32 %v8932_v25, %v8958_v48  ;;  %v9042_v5 = vpop.f32.mrf.mxu0 }
 0x3cb   : > { %v4327_v10 = vpop.f32.mrf.mxu1  ;;  %4728 = vmatmul.mubr.bf16.gmra.mxu0 %v4510_v39  ;;  %v4155_v39 = vadd.f32 %v8938_v31, %v8955_v41  ;;  %v4161_v31 = vadd.f32 %v8942_v38, %v8955_v41 }
 0x3cc   : > { %v4328_v49 = vadd.f32 %v4327_v10, %v4135_v62  ;;  %v4458_v45 = vmax.f32 %v4326_v24, 0.0 }
 0x3cd   : > { %v4331_v22 = vpop.f32.mrf.mxu1 }
 0x3ce   : > { %v4459_v44 = vmax.f32 %v4328_v49, 0.0  ;;  %v4512_v23 = vpack.c.bf16 %v4458_v45, %v4456_v6  ;;  %v4332_v50 = vadd.f32 %v4331_v22, %v4139_v34  ;;  %v9044_v22 = vpop.f32.mrf.mxu0 }
 0x3cf   : > { %v4333_v11 = vpop.f32.mrf.mxu1 }
 0x3d0   : > { %v4513_v15 = vpack.c.bf16 %v4459_v44, %v4457_v16  ;;  %v4334_v52 = vadd.f32 %v4333_v11, %v4141_v20  ;;  %v4460_v2 = vmax.f32 %v4332_v50, 0.0  ;;  %v4163_v44 = vadd.f32 %v8944_v61, %v8958_v48 }
 0x3d1   : > { %v4335_v3 = vpop.f32.mrf.mxu1  ;;  %v4159_v11 = vadd.f32 %v8940_v8, %v8958_v48 }
 0x3d2   : > { %v4336_v29 = vadd.f32 %v4335_v3, %v4143_v4  ;;  %4735 = vmatprep.mubr.bf16.mxu0 %v4513_v15  ;;  %v4461_v27 = vmax.f32 %v4334_v52, 0.0  ;;  %v4165_v15 = vadd.f32 %v8946_v17, %v8955_v41  ;;  %v9054_v3 = vpop.f32.mrf.mxu0  ;;  %v4171_v17 = vadd.f32 %v8960_v12, %v8955_v41 }
 0x3d3   : > { %v4337_v7 = vpop.f32.mrf.mxu1  ;;  %4736 = vmatmul.mubr.bf16.gmra.mxu0 %v4512_v23 }
 0x3d4   : > { %v4338_v57 = vadd.f32 %v4337_v7, %v4145_v1  ;;  %v4462_v28 = vmax.f32 %v4336_v29, 0.0 }
 0x3d5   : > { %v4341_v26 = vpop.f32.mrf.mxu1 }
 0x3d6   : > { %v4463_v43 = vmax.f32 %v4338_v57, 0.0  ;;  %v4514_v60 = vpack.c.bf16 %v4462_v28, %v4460_v2  ;;  %v4342_v24 = vadd.f32 %v4341_v26, %v4149_v9  ;;  %v9056_v57 = vpop.f32.mrf.mxu0  ;;  %v4173_v26 = vadd.f32 %v8970_v32, %v8958_v48 }
 0x3d7   : > { %v4343_v18 = vpop.f32.mrf.mxu1 }
 0x3d8   : > { %v4515_v53 = vpack.c.bf16 %v4463_v43, %v4461_v27  ;;  %v4344_v63 = vadd.f32 %v4343_v18, %v4151_v21  ;;  %v4464_v25 = vmax.f32 %v4342_v24, 0.0  ;;  %v4169_v43 = vadd.f32 %v8951_v51, %v8958_v48  ;;  %v9066_v9 = vpop.f32.mrf.mxu0 }
 0x3d9   : > { %v4345_v14 = vpop.f32.mrf.mxu1  ;;  %v4175_v21 = vadd.f32 %v8972_v46, %v8955_v41  ;;  %v4181_v46 = vadd.f32 %v8984_v42, %v8955_v41 }
 0x3da   : > { %v4346_v62 = vadd.f32 %v4345_v14, %v4153_v59  ;;  %4743 = vmatprep.mubr.bf16.mxu0 %v4515_v53  ;;  %v4465_v49 = vmax.f32 %v4344_v63, 0.0  ;;  %v9068_v24 = vpop.f32.mrf.mxu0 }
 0x3db   : > { %v4347_v55 = vpop.f32.mrf.mxu1  ;;  %4744 = vmatmul.mubr.bf16.gmra.mxu0 %v4514_v60 }
 0x3dc   : > { %v4348_v19 = vadd.f32 %v4347_v55, %v4155_v39  ;;  %v4466_v10 = vmax.f32 %v4346_v62, 0.0 }
 0x3dd   : > { %v4351_v30 = vpop.f32.mrf.mxu1 }
 0x3de   : > { %v4467_v45 = vmax.f32 %v4348_v19, 0.0  ;;  %v4516_v20 = vpack.c.bf16 %v4466_v10, %v4464_v25  ;;  %v4352_v1 = vadd.f32 %v4351_v30, %v4159_v11  ;;  %v4183_v19 = vadd.f32 %v8994_v47, %v8958_v48 }
 0x3df   : > { %v4353_v16 = vpop.f32.mrf.mxu1  ;;  %v4179_v30 = vadd.f32 %v8982_v54, %v8958_v48  ;;  %v4185_v25 = vadd.f32 %v8996_v40, %v8955_v41  ;;  %v4191_v40 = vadd.f32 %v9008_v33, %v8955_v41 }
 0x3e0   : > { %v4517_v6 = vpack.c.bf16 %v4467_v45, %v4465_v49  ;;  %v4354_v34 = vadd.f32 %v4353_v16, %v4161_v31  ;;  %v4468_v8 = vmax.f32 %v4352_v1, 0.0  ;;  %v4193_v1 = vadd.f32 %v9018_v35, %v8958_v48 }
 0x3e1   : > { %v4355_v4 = vpop.f32.mrf.mxu1 }
 0x3e2   : > { %v4356_v23 = vadd.f32 %v4355_v4, %v4163_v44  ;;  %4751 = vmatprep.mubr.bf16.mxu0 %v4517_v6  ;;  %v4469_v50 = vmax.f32 %v4354_v34, 0.0  ;;  %v9078_v44 = vpop.f32.mrf.mxu0 }
 0x3e3   : > { %v4357_v52 = vpop.f32.mrf.mxu1  ;;  %4752 = vmatmul.mubr.bf16.gmra.mxu0 %v4516_v20 }
 0x3e4   : > { %v4358_v38 = vadd.f32 %v4357_v52, %v4165_v15  ;;  %v4470_v29 = vmax.f32 %v4356_v23, 0.0  ;;  %v9080_v34 = vpop.f32.mrf.mxu0 }
 0x3e5   : > { %v4361_v61 = vpop.f32.mrf.mxu1 }
 0x3e6   : > { %v4471_v7 = vmax.f32 %v4358_v38, 0.0  ;;  %v4518_v2 = vpack.c.bf16 %v4470_v29, %v4468_v8  ;;  %v4362_v60 = vadd.f32 %v4361_v61, %v4169_v43  ;;  %v4189_v38 = vadd.f32 %v9006_v37, %v8958_v48 }
 0x3e7   : > { %v4363_v28 = vpop.f32.mrf.mxu1 }
 0x3e8   : > { %v4519_v27 = vpack.c.bf16 %v4471_v7, %v4469_v50  ;;  %v4364_v59 = vadd.f32 %v4363_v28, %v4171_v17  ;;  %v4472_v51 = vmax.f32 %v4362_v60, 0.0  ;;  %v4195_v50 = vadd.f32 %v9020_v36, %v8955_v41  ;;  %v4222_v28 = vpop.f32.mrf.mxu0 }
 0x3e9   : > { %v4365_v18 = vpop.f32.mrf.mxu1  ;;  %v4203_v36 = vadd.f32 %v9042_v5, %v8958_v48  ;;  %v4199_v60 = vadd.f32 %v9030_v0, %v8958_v48 }
 0x3ea   : > { %v4366_v53 = vadd.f32 %v4365_v18, %v4173_v26  ;;  %4759 = vmatprep.mubr.bf16.mxu0 %v4519_v27  ;;  %v4473_v63 = vmax.f32 %v4364_v59, 0.0  ;;  %v4224_v18 = vpop.f32.mrf.mxu0  ;;  %v4201_v59 = vadd.f32 %v9032_v13, %v8955_v41 }
 0x3eb   : > { %v4367_v14 = vpop.f32.mrf.mxu1  ;;  %4760 = vmatmul.mubr.bf16.gmra.mxu0 %v4518_v2 }
 0x3ec   : > { %v4368_v12 = vadd.f32 %v4367_v14, %v4175_v21  ;;  %v4474_v39 = vmax.f32 %v4366_v53, 0.0 }
 0x3ed   : > { %v4371_v32 = vpop.f32.mrf.mxu1 }
 0x3ee   : > { %v4475_v62 = vmax.f32 %v4368_v12, 0.0  ;;  %v4520_v49 = vpack.c.bf16 %v4474_v39, %v4472_v51  ;;  %v4372_v6 = vadd.f32 %v4371_v32, %v4179_v30  ;;  %v4205_v39 = vadd.f32 %v9044_v22, %v8955_v41 }
 0x3ef   : > { %v4373_v55 = vpop.f32.mrf.mxu1  ;;  %v4213_v22 = vadd.f32 %v9066_v9, %v8958_v48 }
 0x3f0   : > { %v4521_v10 = vpack.c.bf16 %v4475_v62, %v4473_v63  ;;  %v4374_v16 = vadd.f32 %v4373_v55, %v4181_v46  ;;  %v4476_v54 = vmax.f32 %v4372_v6, 0.0  ;;  %v4228_v62 = vpop.f32.mrf.mxu0 }
 0x3f1   : > { %v4375_v45 = vpop.f32.mrf.mxu1 }
 0x3f2   : > { %v4376_v31 = vadd.f32 %v4375_v45, %v4183_v19  ;;  %4767 = vmatprep.mubr.bf16.mxu0 %v4521_v10  ;;  %v4477_v4 = vmax.f32 %v4374_v16, 0.0  ;;  %v4230_v30 = vpop.f32.mrf.mxu0  ;;  %v4211_v45 = vadd.f32 %v9056_v57, %v8955_v41  ;;  %v4209_v16 = vadd.f32 %v9054_v3, %v8958_v48 }
 0x3f3   : > { %v4377_v11 = vpop.f32.mrf.mxu1  ;;  %4768 = vmatmul.mubr.bf16.gmra.mxu0 %v4520_v49 }
 0x3f4   : > { %v4378_v42 = vadd.f32 %v4377_v11, %v4185_v25  ;;  %v4478_v20 = vmax.f32 %v4376_v31, 0.0  ;;  %v4215_v11 = vadd.f32 %v9068_v24, %v8955_v41  ;;  %v4223_v24 = vadd.f32 %v4222_v28, %v8958_v48 }
 0x3f5   : > { %v4381_v47 = vpop.f32.mrf.mxu1 }
 0x3f6   : > { %v4479_v15 = vmax.f32 %v4378_v42, 0.0  ;;  %v4522_v29 = vpack.c.bf16 %v4478_v20, %v4476_v54  ;;  %v4382_v17 = vadd.f32 %v4381_v47, %v4189_v38  ;;  %v4232_v47 = vpop.f32.mrf.mxu0  ;;  %v4221_v38 = vadd.f32 %v9080_v34, %v8955_v41 }
 0x3f7   : > { %v4383_v23 = vpop.f32.mrf.mxu1 }
 0x3f8   : > { %v4523_v52 = vpack.c.bf16 %v4479_v15, %v4477_v4  ;;  %v4384_v7 = vadd.f32 %v4383_v23, %v4191_v40  ;;  %v4480_v21 = vmax.f32 %v4382_v17, 0.0 }
 0x3f9   : > { %v4385_v61 = vpop.f32.mrf.mxu1 }
 0x3fa   : > { %v4386_v8 = vadd.f32 %v4385_v61, %v4193_v1  ;;  %4775 = vmatprep.mubr.bf16.mxu0 %v4523_v52  ;;  %v4481_v35 = vmax.f32 %v4384_v7, 0.0  ;;  %v4234_v1 = vpop.f32.mrf.mxu0  ;;  %v4219_v61 = vadd.f32 %v9078_v44, %v8958_v48  ;;  %v4231_v44 = vadd.f32 %v4230_v30, %v8955_v41 }
 0x3fb   : > { %v4387_v26 = vpop.f32.mrf.mxu1  ;;  %4776 = vmatmul.mubr.bf16.gmra.mxu0 %v4522_v29 }
 0x3fc   : > { %v4388_v33 = vadd.f32 %v4387_v26, %v4195_v50  ;;  %v4482_v27 = vmax.f32 %v4386_v8, 0.0  ;;  %v4225_v8 = vadd.f32 %v4224_v18, %v8955_v41 }
 0x3fd   : > { %v4391_v43 = vpop.f32.mrf.mxu1 }
 0x3fe   : > { %v4483_v2 = vmax.f32 %v4388_v33, 0.0  ;;  %v4524_v14 = vpack.c.bf16 %v4482_v27, %v4480_v21  ;;  %v4392_v51 = vadd.f32 %v4391_v43, %v4199_v60  ;;  %v4238_v33 = vpop.f32.mrf.mxu0  ;;  %v4229_v60 = vadd.f32 %v4228_v62, %v8958_v48 }
 0x3ff   : > { %v4393_v37 = vpop.f32.mrf.mxu1 }
 0x400   : > { %v4525_v53 = vpack.c.bf16 %v4483_v2, %v4481_v35  ;;  %v4394_v32 = vadd.f32 %v4393_v37, %v4201_v59  ;;  %v4484_v49 = vmax.f32 %v4392_v51, 0.0  ;;  %v4240_v37 = vpop.f32.mrf.mxu0 }
 0x401   : > { %v4395_v12 = vpop.f32.mrf.mxu1  ;;  %v4241_v62 = vadd.f32 %v4240_v37, %v8955_v41 }
 0x402   : > { %v4396_v63 = vadd.f32 %v4395_v12, %v4203_v36  ;;  %4783 = vmatprep.mubr.bf16.mxu0 %v4525_v53  ;;  %v4485_v5 = vmax.f32 %v4394_v32, 0.0  ;;  %v4233_v53 = vadd.f32 %v4232_v47, %v8958_v48  ;;  %v4242_v51 = vpop.f32.mrf.mxu0 }
 0x403   : > { %v4397_v55 = vpop.f32.mrf.mxu1  ;;  %4784 = vmatmul.mubr.bf16.gmra.mxu0 %v4524_v14 }
 0x404   : > { %v4398_v13 = vadd.f32 %v4397_v55, %v4205_v39  ;;  %v4486_v46 = vmax.f32 %v4396_v63, 0.0  ;;  %v4235_v39 = vadd.f32 %v4234_v1, %v8955_v41 }
 0x405   : > { %v4401_v19 = vpop.f32.mrf.mxu1 }
 0x406   : > { %v4487_v10 = vmax.f32 %v4398_v13, 0.0  ;;  %v4526_v31 = vpack.c.bf16 %v4486_v46, %v4484_v49  ;;  %v4402_v4 = vadd.f32 %v4401_v19, %v4209_v16  ;;  %v4244_v49 = vpop.f32.mrf.mxu0  ;;  %v4239_v16 = vadd.f32 %v4238_v33, %v8958_v48 }
 0x407   : > { %v4403_v0 = vpop.f32.mrf.mxu1 }
 0x408   : > { %v4527_v25 = vpack.c.bf16 %v4487_v10, %v4485_v5  ;;  %v4404_v42 = vadd.f32 %v4403_v0, %v4211_v45  ;;  %v4488_v52 = vmax.f32 %v4402_v4, 0.0 }
 0x409   : > { %v4405_v6 = vpop.f32.mrf.mxu1 }
 0x40a   : > { %v4406_v20 = vadd.f32 %v4405_v6, %v4213_v22  ;;  %4791 = vmatprep.mubr.bf16.mxu0 %v4527_v25  ;;  %v4489_v9 = vmax.f32 %v4404_v42, 0.0  ;;  %v4243_v22 = vadd.f32 %v4242_v51, %v8958_v48 }
 0x40b   : > { %v4407_v15 = vpop.f32.mrf.mxu1  ;;  %4792 = vmatmul.mubr.bf16.gmra.mxu0 %v4526_v31 }
 0x40c   : > { %v4408_v57 = vadd.f32 %v4407_v15, %v4215_v11  ;;  %v4490_v54 = vmax.f32 %v4406_v20, 0.0  ;;  %v4245_v11 = vadd.f32 %v4244_v49, %v8955_v41  ;;  %v9123_v41 = vld [vmem:[%s9237_s6] ss:$0 sm:$0xff] }
 0x40d   : > { %v4411_v23 = vpop.f32.mrf.mxu1 }
 0x40e   : > { %v4491_v40 = vmax.f32 %v4408_v57, 0.0  ;;  %v4528_v50 = vpack.c.bf16 %v4490_v54, %v4488_v52  ;;  %v4412_v27 = vadd.f32 %v4411_v23, %v4219_v61 }
 0x40f   : > { %v4413_v3 = vpop.f32.mrf.mxu1 }
 0x410   : > { %v4529_v29 = vpack.c.bf16 %v4491_v40, %v4489_v9  ;;  %v4414_v17 = vadd.f32 %v4413_v3, %v4221_v38  ;;  %v4492_v59 = vmax.f32 %v4412_v27, 0.0 }
 0x411   : > { %v4415_v7 = vpop.f32.mrf.mxu1 }
 0x412   : > { %v4416_v26 = vadd.f32 %v4415_v7, %v4223_v24  ;;  %4799 = vmatprep.mubr.bf16.mxu0 %v4529_v29  ;;  %v4493_v21 = vmax.f32 %v4414_v17, 0.0 }
 0x413   : > { %v4417_v43 = vpop.f32.mrf.mxu1  ;;  %4800 = vmatmul.mubr.bf16.gmra.mxu0 %v4528_v50 }
 0x414   : > { %v4418_v35 = vadd.f32 %v4417_v43, %v4225_v8  ;;  %v4494_v2 = vmax.f32 %v4416_v26, 0.0 }
 0x415   : > { %v4421_v34 = vpop.f32.mrf.mxu1 }
 0x416   : > { %v4495_v28 = vmax.f32 %v4418_v35, 0.0  ;;  %v4530_v14 = vpack.c.bf16 %v4494_v2, %v4492_v59  ;;  %v4422_v55 = vadd.f32 %v4421_v34, %v4229_v60 }
 0x417   : > { %v4423_v36 = vpop.f32.mrf.mxu1 }
 0x418   : > { %v4531_v18 = vpack.c.bf16 %v4495_v28, %v4493_v21  ;;  %v4424_v32 = vadd.f32 %v4423_v36, %v4231_v44  ;;  %v4496_v0 = vmax.f32 %v4422_v55, 0.0 }
 0x419   : > { %v4425_v12 = vpop.f32.mrf.mxu1 }
 0x41a   : > { %v4426_v63 = vadd.f32 %v4425_v12, %v4233_v53  ;;  %4807 = vmatprep.mubr.bf16.mxu0 %v4531_v18  ;;  %v4497_v10 = vmax.f32 %v4424_v32, 0.0 }
 0x41b   : > { %v4427_v13 = vpop.f32.mrf.mxu1  ;;  %4808 = vmatmul.mubr.bf16.gmra.mxu0 %v4530_v14 }
 0x41c   : > { %v4428_v46 = vadd.f32 %v4427_v13, %v4235_v39  ;;  %v4498_v19 = vmax.f32 %v4426_v63, 0.0 }
 0x41d   : > { %v4431_v5 = vpop.f32.mrf.mxu1 }
 0x41e   : > { %v4499_v30 = vmax.f32 %v4428_v46, 0.0  ;;  %v4532_v31 = vpack.c.bf16 %v4498_v19, %v4496_v0  ;;  %v4432_v47 = vadd.f32 %v4431_v5, %v4239_v16 }
 0x41f   : > { %v4433_v45 = vpop.f32.mrf.mxu1 }
 0x420   : > { %v4533_v25 = vpack.c.bf16 %v4499_v30, %v4497_v10  ;;  %v4434_v42 = vadd.f32 %v4433_v45, %v4241_v62  ;;  %v4500_v9 = vmax.f32 %v4432_v47, 0.0 }
 0x421   : > { %v4435_v6 = vpop.f32.mrf.mxu1 }
 0x422   : > { %v4436_v20 = vadd.f32 %v4435_v6, %v4243_v22  ;;  %4815 = vmatprep.mubr.bf16.mxu0 %v4533_v25  ;;  %v4501_v54 = vmax.f32 %v4434_v42, 0.0 }
 0x423   : > { %v4437_v4 = vpop.f32.mrf.mxu1  ;;  %4816 = vmatmul.mubr.bf16.gmra.mxu0 %v4532_v31 }
 0x424   : > { %v4438_v15 = vadd.f32 %v4437_v4, %v4245_v11  ;;  %v4502_v57 = vmax.f32 %v4436_v20, 0.0 }
 0x426   : > { %v4503_v23 = vmax.f32 %v4438_v15, 0.0  ;;  %v4534_v1 = vpack.c.bf16 %v4502_v57, %v4500_v9 }
 0x428   : > { %v4535_v40 = vpack.c.bf16 %v4503_v23, %v4501_v54 }
 0x42a   : > { %4823 = vmatprep.mubr.bf16.mxu0 %v4535_v40 }
 0x42b   : > { %4824 = vmatmul.mubr.bf16.gmra.mxu0 %v4534_v1 }
 0x473   : > { %v5381_v48 = vpop.f32.mrf.mxu0 }
 0x475   : > { %v5382_v52 = vpop.f32.mrf.mxu0 }
 0x476   : > { %v5383_v3 = vadd.f32 %v5382_v52, %v5381_v48 }
 0x477   : > { %v5384_v38 = vpop.f32.mrf.mxu0 }
 0x478   : > { %v4706_v29 = vadd.f32 %v5383_v3, %v9123_v41 }
 0x479   : > { %v5385_v24 = vpop.f32.mrf.mxu0 }
 0x47a   : > { %v5386_v61 = vadd.f32 %v5385_v24, %v5384_v38  ;;  %v4832_v17 = vmax.f32 %v4706_v29, 0.0 }
 0x47b   : > { %v5387_v50 = vpop.f32.mrf.mxu0 }
 0x47c   : > { %v4709_v7 = vadd.f32 %v5386_v61, %v9123_v41 }
 0x47d   : > { %v5388_v8 = vpop.f32.mrf.mxu0 }
 0x47e   : > { %v4833_v26 = vmax.f32 %v4709_v7, 0.0  ;;  %v5389_v33 = vadd.f32 %v5388_v8, %v5387_v50 }
 0x47f   : > { %v5390_v27 = vpop.f32.mrf.mxu0 }
 0x480   : > { %v9127_v43 = vpack.c.bf16 %v4833_v26, %v4832_v17  ;;  %v4714_v2 = vadd.f32 %v5389_v33, %v9123_v41 }
 0x481   : > { %v5391_v35 = vpop.f32.mrf.mxu0 }
 0x482   : > { %v5392_v34 = vadd.f32 %v5391_v35, %v5390_v27  ;;  %v4834_v59 = vmax.f32 %v4714_v2, 0.0 }
 0x483   : > { %v5393_v21 = vpop.f32.mrf.mxu0 }
 0x484   : > { %v4717_v28 = vadd.f32 %v5392_v34, %v9123_v41 }
 0x485   : > { %v5394_v37 = vpop.f32.mrf.mxu0 }
 0x486   : > { %v4835_v36 = vmax.f32 %v4717_v28, 0.0  ;;  %v5395_v44 = vadd.f32 %v5394_v37, %v5393_v21 }
 0x487   : > { %v5396_v53 = vpop.f32.mrf.mxu0 }
 0x488   : > { %v9131_v18 = vpack.c.bf16 %v4835_v36, %v4834_v59  ;;  %v4722_v14 = vadd.f32 %v5395_v44, %v9123_v41 }
 0x489   : > { %v5397_v60 = vpop.f32.mrf.mxu0 }
 0x48a   : > { %v5398_v12 = vadd.f32 %v5397_v60, %v5396_v53  ;;  %v4836_v51 = vmax.f32 %v4722_v14, 0.0  ;;  %v9157_v60 = vld [vmem:[%s9238_s7] sm:$0x1] }
 0x48b   : > { %v5399_v39 = vpop.f32.mrf.mxu0  ;;  %5493 = vmatprep.mubr.bf16.mxu1 %v9157_v60 }
 0x48c   : > { %v4725_v32 = vadd.f32 %v5398_v12, %v9123_v41 }
 0x48d   : > { %v5400_v63 = vpop.f32.mrf.mxu0 }
 0x48e   : > { %v4837_v55 = vmax.f32 %v4725_v32, 0.0  ;;  %v5401_v13 = vadd.f32 %v5400_v63, %v5399_v39 }
 0x48f   : > { %v5402_v46 = vpop.f32.mrf.mxu0 }
 0x490   : > { %v9135_v19 = vpack.c.bf16 %v4837_v55, %v4836_v51  ;;  %v4730_v10 = vadd.f32 %v5401_v13, %v9123_v41 }
 0x491   : > { %v5403_v5 = vpop.f32.mrf.mxu0 }
 0x492   : > { %v5404_v30 = vadd.f32 %v5403_v5, %v5402_v46  ;;  %v4838_v62 = vmax.f32 %v4730_v10, 0.0  ;;  %v4881_v10 = vld [vmem:[#allocation2] sm:$0x1] }
 0x493   : > { %v5405_v49 = vpop.f32.mrf.mxu0  ;;  %4884 = vperm.xlu0 %5569, %v4881_v10  }
 0x494   : > { %v4733_v0 = vadd.f32 %v5404_v30, %v9123_v41 }
 0x495   : > { %v5406_v45 = vpop.f32.mrf.mxu0 }
 0x496   : > { %v4839_v22 = vmax.f32 %v4733_v0, 0.0  ;;  %v5407_v25 = vadd.f32 %v5406_v45, %v5405_v49 }
 0x497   : > { %v5408_v16 = vpop.f32.mrf.mxu0 }
 0x498   : > { %v9139_v31 = vpack.c.bf16 %v4839_v22, %v4838_v62  ;;  %v4738_v11 = vadd.f32 %v5407_v25, %v9123_v41 }
 0x499   : > { %v5409_v6 = vpop.f32.mrf.mxu0 }
 0x49a   : > { %v5410_v42 = vadd.f32 %v5409_v6, %v5408_v16  ;;  %v4840_v15 = vmax.f32 %v4738_v11, 0.0 }
 0x49b   : > { %v5411_v20 = vpop.f32.mrf.mxu0 }
 0x49c   : > { %v4741_v47 = vadd.f32 %v5410_v42, %v9123_v41 }
 0x49d   : > { %v5412_v4 = vpop.f32.mrf.mxu0 }
 0x49e   : > { %v4841_v57 = vmax.f32 %v4741_v47, 0.0  ;;  %v5413_v54 = vadd.f32 %v5412_v4, %v5411_v20 }
 0x49f   : > { %v5414_v23 = vpop.f32.mrf.mxu0 }
 0x4a0   : > { %v9143_v9 = vpack.c.bf16 %v4841_v57, %v4840_v15  ;;  %v4746_v1 = vadd.f32 %v5413_v54, %v9123_v41 }
 0x4a1   : > { %v5415_v40 = vpop.f32.mrf.mxu0 }
 0x4a2   : > { %v5416_v48 = vadd.f32 %v5415_v40, %v5414_v23  ;;  %v4842_v24 = vmax.f32 %v4746_v1, 0.0 }
 0x4a3   : > { %v5417_v52 = vpop.f32.mrf.mxu0 }
 0x4a4   : > { %v4749_v3 = vadd.f32 %v5416_v48, %v9123_v41 }
 0x4a5   : > { %v5418_v38 = vpop.f32.mrf.mxu0 }
 0x4a6   : > { %v4843_v29 = vmax.f32 %v4749_v3, 0.0  ;;  %v5419_v61 = vadd.f32 %v5418_v38, %v5417_v52 }
 0x4a7   : > { %v5420_v50 = vpop.f32.mrf.mxu0 }
 0x4a8   : > { %v9147_v7 = vpack.c.bf16 %v4843_v29, %v4842_v24  ;;  %v4754_v17 = vadd.f32 %v5419_v61, %v9123_v41 }
 0x4a9   : > { %v5421_v8 = vpop.f32.mrf.mxu0 }
 0x4aa   : > { %v5422_v26 = vadd.f32 %v5421_v8, %v5420_v50  ;;  %v4844_v2 = vmax.f32 %v4754_v17, 0.0 }
 0x4ab   : > { %v5423_v33 = vpop.f32.mrf.mxu0 }
 0x4ac   : > { %v4757_v27 = vadd.f32 %v5422_v26, %v9123_v41 }
 0x4ad   : > { %v5424_v35 = vpop.f32.mrf.mxu0 }
 0x4ae   : > { %v4845_v34 = vmax.f32 %v4757_v27, 0.0  ;;  %v5425_v21 = vadd.f32 %v5424_v35, %v5423_v33 }
 0x4af   : > { %v5426_v28 = vpop.f32.mrf.mxu0 }
 0x4b0   : > { %v9151_v37 = vpack.c.bf16 %v4845_v34, %v4844_v2  ;;  %v4762_v36 = vadd.f32 %v5425_v21, %v9123_v41 }
 0x4b1   : > { %v5427_v59 = vpop.f32.mrf.mxu0 }
 0x4b2   : > { %v5428_v44 = vadd.f32 %v5427_v59, %v5426_v28  ;;  %v4846_v39 = vmax.f32 %v4762_v36, 0.0 }
 0x4b3   : > { %v5429_v53 = vpop.f32.mrf.mxu0 }
 0x4b4   : > { %v4765_v14 = vadd.f32 %v5428_v44, %v9123_v41 }
 0x4b5   : > { %v5430_v12 = vpop.f32.mrf.mxu0 }
 0x4b6   : > { %v4847_v32 = vmax.f32 %v4765_v14, 0.0  ;;  %v5431_v63 = vadd.f32 %v5430_v12, %v5429_v53 }
 0x4b7   : > { %v5432_v51 = vpop.f32.mrf.mxu0 }
 0x4b8   : > { %v9161_v55 = vpack.c.bf16 %v4847_v32, %v4846_v39  ;;  %v4770_v46 = vadd.f32 %v5431_v63, %v9123_v41 }
 0x4b9   : > { %v5433_v13 = vpop.f32.mrf.mxu0 }
 0x4ba   : > { %v5434_v5 = vadd.f32 %v5433_v13, %v5432_v51  ;;  %v4848_v45 = vmax.f32 %v4770_v46, 0.0 }
 0x4bb   : > { %v5435_v30 = vpop.f32.mrf.mxu0 }
 0x4bc   : > { %v4773_v49 = vadd.f32 %v5434_v5, %v9123_v41 }
 0x4bd   : > { %v5436_v0 = vpop.f32.mrf.mxu0 }
 0x4be   : > { %v4849_v62 = vmax.f32 %v4773_v49, 0.0  ;;  %v5437_v22 = vadd.f32 %v5436_v0, %v5435_v30 }
 0x4bf   : > { %v5438_v25 = vpop.f32.mrf.mxu0 }
 0x4c0   : > { %v9165_v16 = vpack.c.bf16 %v4849_v62, %v4848_v45  ;;  %v4778_v11 = vadd.f32 %v5437_v22, %v9123_v41 }
 0x4c1   : > { %v5439_v6 = vpop.f32.mrf.mxu0 }
 0x4c2   : > { %v5440_v42 = vadd.f32 %v5439_v6, %v5438_v25  ;;  %v4850_v15 = vmax.f32 %v4778_v11, 0.0 }
 0x4c3   : > { %v5441_v20 = vpop.f32.mrf.mxu0 }
 0x4c4   : > { %v4781_v47 = vadd.f32 %v5440_v42, %v9123_v41 }
 0x4c5   : > { %v5442_v4 = vpop.f32.mrf.mxu0 }
 0x4c6   : > { %v4851_v57 = vmax.f32 %v4781_v47, 0.0  ;;  %v5443_v54 = vadd.f32 %v5442_v4, %v5441_v20 }
 0x4c7   : > { %v5444_v23 = vpop.f32.mrf.mxu0 }
 0x4c8   : > { %v9169_v40 = vpack.c.bf16 %v4851_v57, %v4850_v15  ;;  %v4786_v48 = vadd.f32 %v5443_v54, %v9123_v41 }
 0x4c9   : > { %v5445_v1 = vpop.f32.mrf.mxu0 }
 0x4ca   : > { %v5446_v52 = vadd.f32 %v5445_v1, %v5444_v23  ;;  %v4852_v29 = vmax.f32 %v4786_v48, 0.0 }
 0x4cb   : > { %v5447_v3 = vpop.f32.mrf.mxu0 }
 0x4cc   : > { %v4789_v38 = vadd.f32 %v5446_v52, %v9123_v41 }
 0x4cd   : > { %v5448_v24 = vpop.f32.mrf.mxu0 }
 0x4ce   : > { %v4853_v61 = vmax.f32 %v4789_v38, 0.0 }
 0x4cf   : > { %v5450_v50 = vpop.f32.mrf.mxu0 }
 0x4d0   : > { %v4875_v8 = vpack.c.bf16 %v4853_v61, %v4852_v29  ;;  %v5449_v29 = vadd.f32 %v5448_v24, %v5447_v3 }
 0x4d1   : > { %v5451_v17 = vpop.f32.mrf.mxu0 }
 0x4d2   : > { %v5452_v52 = vadd.f32 %v5451_v17, %v5450_v50 }
 0x4d3   : > { %v5453_v26 = vpop.f32.mrf.mxu0 }
 0x4d5   : > { %v5454_v33 = vpop.f32.mrf.mxu0 }
 0x4d6   : > { %v5455_v57 = vadd.f32 %v5454_v33, %v5453_v26  ;;  %v4794_v26 = vadd.f32 %v5449_v29, %v9123_v41 }
 0x4d7   : > { %v5456_v27 = vpop.f32.mrf.mxu0 }
 0x4d8   : > { %v4802_v48 = vadd.f32 %v5455_v57, %v9123_v41 }
 0x4d9   : > { %v5457_v35 = vpop.f32.mrf.mxu0 }
 0x4da   : > { %v5458_v4 = vadd.f32 %v5457_v35, %v5456_v27  ;;  %v4856_v61 = vmax.f32 %v4802_v48, 0.0  ;;  %v4854_v27 = vmax.f32 %v4794_v26, 0.0 }
 0x4db   : > { %v5459_v2 = vpop.f32.mrf.mxu0 }
 0x4dc   : > { %v4805_v23 = vadd.f32 %v5458_v4, %v9123_v41 }
 0x4dd   : > { %v5460_v34 = vpop.f32.mrf.mxu0 }
 0x4de   : > { %v5461_v25 = vadd.f32 %v5460_v34, %v5459_v2  ;;  %v4857_v38 = vmax.f32 %v4805_v23, 0.0 }
 0x4df   : > { %v5462_v21 = vpop.f32.mrf.mxu0 }
 0x4e0   : > { %v4810_v47 = vadd.f32 %v5461_v25, %v9123_v41  ;;  %v4877_v2 = vpack.c.bf16 %v4857_v38, %v4856_v61 }
 0x4e1   : > { %v5463_v28 = vpop.f32.mrf.mxu0 }
 0x4e2   : > { %v5464_v0 = vadd.f32 %v5463_v28, %v5462_v21  ;;  %v4858_v54 = vmax.f32 %v4810_v47, 0.0 }
 0x4e3   : > { %v5465_v59 = vpop.f32.mrf.mxu0 }
 0x4e4   : > { %v4813_v42 = vadd.f32 %v5464_v0, %v9123_v41 }
 0x4e5   : > { %v5466_v36 = vpop.f32.mrf.mxu0 }
 0x4e6   : > { %v5467_v51 = vadd.f32 %v5466_v36, %v5465_v59  ;;  %v4859_v15 = vmax.f32 %v4813_v42, 0.0 }
 0x4e7   : > { %v5468_v44 = vpop.f32.mrf.mxu0 }
 0x4e8   : > { %v4818_v30 = vadd.f32 %v5467_v51, %v9123_v41  ;;  %v4878_v1 = vpack.c.bf16 %v4859_v15, %v4858_v54 }
 0x4e9   : > { %v5469_v53 = vpop.f32.mrf.mxu0 }
 0x4ea   : > { %v5470_v39 = vadd.f32 %v5469_v53, %v5468_v44  ;;  %v4860_v6 = vmax.f32 %v4818_v30, 0.0  ;;  %v9758_v44 = vlaneseq }
 0x4eb   : > { %v5471_v14 = vpop.f32.mrf.mxu0 }
 0x4ec   : > { %v4821_v46 = vadd.f32 %v5470_v39, %v9123_v41  ;;  %vm4964_vm1 = vcmp.lt.s32.totalorder %v9758_v44, 256 }
 0x4ed   : > { %v5472_v12 = vpop.f32.mrf.mxu0 }
 0x4ee   : > { %v5473_v32 = vadd.f32 %v5472_v12, %v5471_v14  ;;  %v4861_v45 = vmax.f32 %v4821_v46, 0.0 }
 0x4ef   : > { %v5474_v63 = vpop.f32.mrf.mxu0 }
 0x4f0   : > { %v4826_v5 = vadd.f32 %v5473_v32, %v9123_v41  ;;  %v4879_v20 = vpack.c.bf16 %v4861_v45, %v4860_v6 }
 0x4f1   : > { %v5475_v13 = vpop.f32.mrf.mxu0 }
 0x4f2   : > { %v5476_v10 = vadd.f32 %v5475_v13, %v5474_v63  ;;  %v4862_v62 = vmax.f32 %v4826_v5, 0.0 }
 0x4f4   : > { %v4829_v49 = vadd.f32 %v5476_v10, %v9123_v41 }
 0x4f6   : > { %v4863_v22 = vmax.f32 %v4829_v49, 0.0 }
 0x4f8   : > { %v4880_v11 = vpack.c.bf16 %v4863_v22, %v4862_v62 }
 0x4fa   : > { %5477 = vmatprep.subr.bf16.mxu1 %v4880_v11 }
 0x4fb   : > { %5478 = vmatpush3.bf16.xpose.msra.mxu1 %v9161_v55  ;;  %v4797_v55 = vadd.f32 %v5452_v52, %v9123_v41 }
 0x4fc   : > { %5479 = vmatprep.subr.bf16.mxu1 %v4879_v20 }
 0x4fd   : > { %v4855_v33 = vmax.f32 %v4797_v55, 0.0 }
 0x4ff   : > { %v4876_v35 = vpack.c.bf16 %v4855_v33, %v4854_v27 }
 0x503   : > { %5480 = vmatpush3.bf16.xpose.msra.mxu1 %v9151_v37 }
 0x504   : > { %5481 = vmatprep.subr.bf16.mxu1 %v4878_v1 }
 0x50b   : > { %5482 = vmatpush3.bf16.xpose.msra.mxu1 %v9147_v7 }
 0x50c   : > { %5483 = vmatprep.subr.bf16.mxu1 %v4877_v2 }
 0x50e   : > { %v4885_v41 = vpop.permute.xlu0 %4884 }
 0x50f   : > { %v4890_v7 = vrot.slane %v4885_v41, %v9757_v56 }
 0x513   : > { %5484 = vmatpush3.bf16.xpose.msra.mxu1 %v9143_v9 }
 0x514   : > { %5485 = vmatprep.subr.bf16.mxu1 %v4876_v35 }
 0x51b   : > { %5486 = vmatpush3.bf16.xpose.msra.mxu1 %v9139_v31 }
 0x51c   : > { %5487 = vmatprep.subr.bf16.mxu1 %v4875_v8 }
 0x523   : > { %5488 = vmatpush3.bf16.xpose.msra.mxu1 %v9135_v19 }
 0x524   : > { %5489 = vmatprep.subr.bf16.mxu1 %v9169_v40 }
 0x52b   : > { %5490 = vmatpush3.bf16.xpose.msra.mxu1 %v9131_v18 }
 0x52c   : > { %5491 = vmatprep.subr.bf16.mxu1 %v9165_v16 }
 0x533   : > { %5492 = vmatpush3.bf16.xpose.msra.mxu1 %v9127_v43 }
 0x53a   : > { %5494 = vmatmul.mubr.bf16.vlgmr.msra.gmra.mxu1 %v9157_v60  ;;  %v6048_v60 = vmov 1966171168  }
 0x53b   : > { %v4948_v56 = vunpack.c.l.s4 %v6048_v60 }
 0x53d   : > { %v4949_v17 = vunpack.c.0.s8 %v4948_v56 }
 0x53f   : > { %v4952_v21 = vsub.s32 %v4949_v17, %v9755_v58 }
 0x5fa   : > { %v4925_v9 = vpop.f32.mrf.mxu1 }
 0x5fb   : > { %v4926_v37 = vadd.f32 %v4925_v9, %v4890_v7 }
 0x5fc   : > { %v4927_v3 = vpop.f32.mrf.mxu1 }
 0x5fd   : > { %v4928_v31 = vadd.f32 %v4927_v3, %v4890_v7  ;;  %v5357_v24 = vmul.f32 -1.442695, %v4926_v37 }
 0x5fe   : > { %v4929_v19 = vpop.f32.mrf.mxu1 }
 0x5ff   : > { %5976 = vpow2.f32 %v5357_v24  ;;  %v5358_v40 = vmul.f32 -1.442695, %v4928_v31 }
 0x600   : > { %v4930_v50 = vpop.f32.mrf.mxu1 }
 0x601   : > { %5978 = vpow2.f32 %v5358_v40 }
 0x60c   : > { %v5977_v18 = vpop.eup %5976 }
 0x60d   : > { %v4938_v16 = vadd.f32 1.0, %v5977_v18 }
 0x60e   : > { %v5979_v8 = vpop.eup %5978 }
 0x60f   : > { %v4939_v43 = vadd.f32 1.0, %v5979_v8  ;;  %5980 = vrcp.f32 %v4938_v16 }
 0x611   : > { %5982 = vrcp.f32 %v4939_v43 }
 0x61c   : > { %v5981_v34 = vpop.eup %5980 }
 0x61e   : > { %v5983_v28 = vpop.eup %5982 }
 0x61f   : > { %v4946_v59 = vcombine.low %v5981_v34, %v5983_v28 }
 0x621   : > { %v4953_v36 = vrot.slane %v4946_v59, %v4952_v21 }
 0x623   : > { %v4960_v53 = vrot.slane %v4953_v36, %v4952_v21 }
 0x625   : > { %4966 = vst.msk [vmem:[%s330_s23] sm:$0x3] %vm4964_vm1, %v4960_v53 }
 0x626   : > { %5998 = shalt.err (!%p5995_p3)
}
 0x627   : > { %s5999_s18 = scalar_lea.hbm %s4980_s27, 32  ;;  %s6003_s8 = scalar_lea.hbm %s9240_s9, 64 }
 0x628   : > { %p6000_p4 = scmp.ne.s32.totalorder %s4980_s27, %s5999_s18  ;;  %p6004_p9 = scmp.lt.s32.totalorder %s4980_s27, %s9240_s9 }
 0x629   : > { %p6005_p10 = scmp.lt.s32.totalorder %s6003_s8, %s5999_s18 }
 0x62a   : > { %p6001_p7 = pnand %p6000_p4, %p6138_p5 }
 0x62b   : > { %p6006_p11 = por %p6005_p10, %p6004_p9 }
 0x62c   : > { %p6002_p8 = pneg %p6001_p7 }
 0x62e   : > { %p6007_p12 = pnand %p6006_p11, %p6002_p8 }
 0x630   : > { %6010 = shalt.err (!%p6007_p12)
}
 0x631   : > { %5528 = dma.vmem_to_hbm [thread:$0]  (%p6138_p5), %s4983_s24, 32, %s4980_s27, %s4968_s28  }
 0x632 PF: > { %p5534_p13 = scmp.ge.s32.totalorder %s6045_s14, 2  ;;  %s4994_s26 = sand.u32 1, %s6033_s11  }
 0x633   : > { %s4995_s29 = scalar_lea.sflag [#allocation4], %s4994_s26 }
 0x634   : > { %p5531_p0 = pnand %p5534_p13, %p6142_p6 }
 0x636   : > { %p5532_p1 = pneg %p5531_p0 }
 0x638   : > { %6028 = dma.done.wait (%p5532_p1), %s4995_s29, 32  }
 0x639   : > { %6030 = vsyncadd (%p5532_p1), %s4995_s29, 4294967264  ;;  %p21_p2 = scmp.ge.s32.totalorder %s6126_s16, 4   ;;  %s9759_s11 = smov %s6037_s12 }
 0x63a   : > { %s9760_s12 = smov %s6041_s13  ;;  %s9761_s13 = smov %s6136_s19 }
 0x63b   : > { %s9762_s14 = smov %s6126_s16  ;;  %23 = sbr.rel (!%p21_p2) target bundleno = 6 (0x6), region = 91 }
 0x640   :  { %5000 = vsyncpa [#allocation4], 1 }
 0x641   :  { %5002 = vsyncpa [#allocation4 + $0x1], 1 }

</bundles_post_ra>
